<compile_context>
chip_gen: v6e
topology: v6e:2x2x1
jax: 0.10.0
libtpu: 0.0.40
codegen_flags: <defaults>
</compile_context>

<pallas_src>
import functools

import jax
import jax.numpy as jnp
from jax.experimental import pallas as pl
from jax.experimental.pallas import tpu as pltpu

_EPS = 1e-5
_MXU_DTYPE = jnp.bfloat16        # MXU operand dtype (accumulation stays f32)

# Row offsets of (bias, gamma, beta) triples inside the packed affine table.
_AFF_1A, _AFF_1B, _AFF_3A, _AFF_3B = 0, 3, 6, 9


# ----------------------------------------------------------------------------
# In-kernel helpers (traced inside the Pallas kernel body)
# ----------------------------------------------------------------------------
def _shift_mats(H, kh_max):
    """Constant (H, H) 0/1 operators A_s with (A_s @ c)[h] == c[h + s]
    (zero when h + s is out of range).  They fold the 'same' zero padding
    along H into a tiny MXU matmul: no VMEM pad scratch, no zero-fill, no
    sublane-misaligned reloads."""
    if kh_max <= 1:
        return {}
    ph = (kh_max - 1) // 2
    row = jax.lax.broadcasted_iota(jnp.int32, (H, H), 0)
    col = jax.lax.broadcasted_iota(jnp.int32, (H, H), 1)
    return {s: (col == row + s).astype(jnp.float32)
            for s in range(-ph, ph + 1) if s != 0}


def _band_conv(rows16, w_ref, shift):
    """'same' Conv2d in the row-folded layout.

    rows16 : (H, W*Cin) bf16 activation of one sample (cast exactly once).
    w_ref  : (KH, W*Cin, W*Cout) banded bf16 weights; the KW taps and their
             zero padding along W are folded into the band, so each tap is a
             single lane-dense MXU contraction.
    shift  : dict of (H, H) f32 shift operators for the H 'same' padding.
    """
    KH = w_ref.shape[0]
    if KH == 1:                                        # 1x1 conv: one matmul
        return jnp.dot(rows16, w_ref[0], preferred_element_type=jnp.float32)
    ph = (KH - 1) // 2
    out = None
    for kh in range(KH):                               # KH = 3, unrolled
        c = jnp.dot(rows16, w_ref[kh], preferred_element_type=jnp.float32)
        s = kh - ph
        if s != 0:
            c = jnp.dot(shift[s], c, preferred_element_type=jnp.float32)
        out = c if out is None else out + c
    return out


def _gn_affine(y, gamma_row, beta_row, eps, apply_relu):
    """GroupNorm(num_groups=1) over one sample + per-channel affine (+ ReLU).

    y : (H, W*C) f32 -- one sample, W and C folded into the lane axis.
    Two-pass moments (mu, then E[(y - mu)^2]) -- matches PyTorch (biased var)
    without the cancellation risk of E[y^2] - mu^2.
    """
    n = y.shape[0] * y.shape[1]
    s = jnp.sum(y, axis=1, keepdims=True)              # lane reduce    (H, 1)
    s = jnp.sum(s, axis=0, keepdims=True)              # sublane reduce (1, 1)
    mu = s * (1.0 / n)
    d = y - mu
    sq = jnp.sum(d * d, axis=1, keepdims=True)
    sq = jnp.sum(sq, axis=0, keepdims=True)
    var = sq * (1.0 / n)
    inv = jax.lax.rsqrt(var + eps)                     # (1, 1)
    out = d * (inv * gamma_row) + beta_row             # lane-dense VPU ops
    if apply_relu:
        out = jnp.maximum(out, 0.0)
    return out


def _decoder_kernel(xr_ref, w1a_ref, w1b_ref, w3a_ref, w3b_ref, aff_ref,
                    o_ref, *, eps):
    """One grid step = NB batch samples (GroupNorm(1,C) stats are per-sample).

    Both DoubleConvs and the final add+relu are fused: the bf16 activation is
    read from HBM once and the f32 result written once, all lane-dense."""
    nb, H, _ = xr_ref.shape
    kh_max = max(w1a_ref.shape[0], w1b_ref.shape[0],
                 w3a_ref.shape[0], w3b_ref.shape[0])
    shift = _shift_mats(H, kh_max)          # hoisted: built once per grid step

    def conv_gn(rows16, w_ref, aff_row, relu):
        lout = w_ref.shape[2]
        bias = aff_ref[aff_row + 0:aff_row + 1, :lout]   # (1, lout)
        gamma = aff_ref[aff_row + 1:aff_row + 2, :lout]
        beta = aff_ref[aff_row + 2:aff_row + 3, :lout]
        # Bias kept: GroupNorm(num_groups=1) does NOT cancel a per-channel
        # bias (mean is taken jointly over all channels of the sample).
        y = _band_conv(rows16, w_ref, shift) + bias
        return _gn_affine(y, gamma, beta, eps, relu)

    for smp in range(nb):                   # static unroll; nb is small
        x16 = xr_ref[smp]                   # (H, W*Cin) bf16, shared by dc1/dc3
        # DoubleConv(kernel_size=1): order 'cgr' then 'cg'
        y1 = conv_gn(x16, w1a_ref, _AFF_1A, True)
        x1 = conv_gn(y1.astype(x16.dtype), w1b_ref, _AFF_1B, False)
        # DoubleConv(kernel_size=3): order 'cgr' then 'cg'
        y3 = conv_gn(x16, w3a_ref, _AFF_3A, True)
        x3 = conv_gn(y3.astype(x16.dtype), w3b_ref, _AFF_3B, False)
        # M_channel == 2  ->  relu(x1 + x3); stored lane-dense (W*Cout lanes).
        o_ref[smp] = jnp.maximum(x1 + x3, 0.0)


# ----------------------------------------------------------------------------
# One-time parameter transforms (hoisted out of the hot path)
# ----------------------------------------------------------------------------
def _band_weight(wk, W):
    """(KH, KW, Cin, Cout) conv kernel -> (KH, W*Cin, W*Cout) banded matrices.

    big[kh][(w + kw - pw)*Cin + ci, w*Cout + co] = wk[kh, kw, ci, co], with
    out-of-range W taps dropped (== the 'same' zero padding along W).
    """
    KH, KW, Cin, Cout = wk.shape
    pw = (KW - 1) // 2
    mats = []
    for kh in range(KH):
        m = jnp.zeros((W * Cin, W * Cout), jnp.float32)
        for kw in range(KW):
            shift = jnp.eye(W, W, k=pw - kw, dtype=jnp.float32)
            m = m + jnp.kron(shift, wk[kh, kw])
        mats.append(m)
    return jnp.stack(mats, axis=0)


def _affine_pack(params, W):
    """Pack the 12 (bias, gamma, beta) per-channel vectors into one resident
    (12, W*Cmax) f32 table, pre-tiled over W into the lane-folded layout."""
    rows = []
    for branch in ("dc1", "dc3"):
        p = params[branch]
        for bk, gk, tk in (("b1", "g1", "be1"), ("b2", "g2", "be2")):
            for name in (bk, gk, tk):
                rows.append(jnp.tile(p[name], W))
    lanes = max(int(r.shape[0]) for r in rows)
    aff = jnp.zeros((len(rows), lanes), jnp.float32)
    for i, r in enumerate(rows):
        aff = aff.at[i, :r.shape[0]].set(r)
    return aff


def prepare_decoder_params(params, W):
    """Transform raw params into kernel-ready, lane-dense arrays:
       4 banded conv weights (bf16 MXU operands) + 1 packed affine table.
       Returns (w1a, w1b, w3a, w3b, affine_table)."""
    ws = []
    for branch in ("dc1", "dc3"):
        p = params[branch]
        ws.append(_band_weight(p["w1"], W).astype(_MXU_DTYPE))
        ws.append(_band_weight(p["w2"], W).astype(_MXU_DTYPE))
    return tuple(ws) + (_affine_pack(params, W),)


# ----------------------------------------------------------------------------
# Decoder forward (interpolate=True, M_channel=2, M_R=0)
# ----------------------------------------------------------------------------
def decoder_forward(prepped, encoder_features_nchw, x_nchw):
    w1a, w1b, w3a, w3b, aff = prepped

    # ---- pre-kernel glue (fuses into ~one XLA relayout pass -> bf16 xr) ----
    enc = jnp.transpose(encoder_features_nchw, (0, 2, 3, 1))    # NCHW -> NHWC
    xs = jnp.transpose(x_nchw, (0, 2, 3, 1))
    N, H, W, _ = enc.shape
    h, w = xs.shape[1], xs.shape[2]
    # F.interpolate(mode='nearest', size=(H, W)): src index = floor(i*in/out).
    idx_h = (jnp.arange(H) * h) // H
    idx_w = (jnp.arange(W) * w) // W
    xs = xs[:, idx_h][:, :, idx_w]
    # X_diff / Y_diff padding is identically zero after the exact resize.
    x = jnp.concatenate([enc, xs], axis=-1)                     # (N, H, W, Cin)
    Cin = x.shape[-1]
    # bf16 feed: halves the kernel's HBM read; x is only ever an MXU operand.
    xr = x.reshape(N, H, W * Cin).astype(_MXU_DTYPE)
    # TODO(synk): a producer emitting lane-folded NHWC bf16 activations would
    #             remove this relayout pass entirely.

    lanes_in = W * Cin
    lanes_out = int(w3b.shape[2])
    Cout = lanes_out // W
    assert w1a.shape[1] == lanes_in and w3a.shape[1] == lanes_in

    # v7x guard: banded weights grow O(W^2 * Cin * Cout * KH); past ~512 lanes
    # they stop fitting v7x's 32 MiB scoped VMEM and most MXU flops hit zeros.
    # TODO(synk): W-tiled (per-KW-diagonal) band fallback for larger shapes.
    if max(lanes_in, lanes_out) > 512:
        raise NotImplementedError(
            "banded-conv layout needs W-tiling once W*C exceeds 512 lanes")

    # Samples per grid step: amortize per-step overhead but keep >= 2 grid
    # steps so both v7x TensorCores get work (batch axis is "parallel").
    NB = 1
    for cand in range(min(N // 2, 8), 0, -1):
        if N % cand == 0:
            NB = cand
            break

    consts = (w1a, w1b, w3a, w3b, aff)

    def _run(single_buffer_consts):
        def const_spec(a):
            nd = a.ndim
            if single_buffer_consts:
                # Constant index_map -> double buffering buys nothing; keep a
                # single resident copy of each weight in VMEM.
                return pl.BlockSpec(a.shape, lambda n: (0,) * nd,
                                    pipeline_mode=pl.Buffered(1))
            return pl.BlockSpec(a.shape, lambda n: (0,) * nd)

        in_specs = [pl.BlockSpec((NB, H, lanes_in), lambda n: (n, 0, 0))]
        in_specs += [const_spec(a) for a in consts]

        return pl.pallas_call(
            functools.partial(_decoder_kernel, eps=_EPS),
            out_shape=jax.ShapeDtypeStruct((N, H, lanes_out), jnp.float32),
            grid_spec=pltpu.PrefetchScalarGridSpec(
                num_scalar_prefetch=0,
                grid=(N // NB,),
                in_specs=in_specs,
                out_specs=pl.BlockSpec((NB, H, lanes_out),
                                       lambda n: (n, 0, 0))),
            compiler_params=pltpu.CompilerParams(
                dimension_semantics=("parallel",),   # batch across TCs on v7x
                vmem_limit_bytes=32 * 1024 * 1024),
        )(xr, *consts)

    single = hasattr(pl, "Buffered")
    try:
        out_rows = _run(single)
    except Exception:        # pragma: no cover -- Buffered(1) not supported
        if not single:
            raise
        out_rows = _run(False)

    out = out_rows.reshape(N, H, W, Cout)                       # unfold lanes
    return jnp.transpose(out, (0, 3, 1, 2))                     # back to NCHW


# ----------------------------------------------------------------------------
# Synthetic parameters (deterministic) + pure-JAX reference for validation
# ----------------------------------------------------------------------------
def init_double_conv(key, in_ch, out_ch, k):
    """DoubleConv channel split: in<out -> (in->out//2, out//2->out),
    otherwise (in->out, out->out)."""
    if in_ch < out_ch:
        c1_in, c1_out = in_ch, out_ch // 2
        c2_in, c2_out = c1_out, out_ch
    else:
        c1_in, c1_out = in_ch, out_ch
        c2_in, c2_out = out_ch, out_ch
    ks = jax.random.split(key, 8)
    return {
        "w1": jax.random.normal(ks[0], (k, k, c1_in, c1_out), jnp.float32) * 0.1,
        "b1": jax.random.normal(ks[1], (c1_out,), jnp.float32) * 0.1,
        "g1": 1.0 + 0.1 * jax.random.normal(ks[2], (c1_out,), jnp.float32),
        "be1": 0.1 * jax.random.normal(ks[3], (c1_out,), jnp.float32),
        "w2": jax.random.normal(ks[4], (k, k, c2_in, c2_out), jnp.float32) * 0.1,
        "b2": jax.random.normal(ks[5], (c2_out,), jnp.float32) * 0.1,
        "g2": 1.0 + 0.1 * jax.random.normal(ks[6], (c2_out,), jnp.float32),
        "be2": 0.1 * jax.random.normal(ks[7], (c2_out,), jnp.float32),
    }


def _reference_forward(params, encoder_features_nchw, x_nchw):
    """Pure-JAX f32 reference mirroring the PyTorch forward."""
    enc = jnp.transpose(encoder_features_nchw, (0, 2, 3, 1))
    xs = jnp.transpose(x_nchw, (0, 2, 3, 1))
    N, H, W, _ = enc.shape
    h, w = xs.shape[1], xs.shape[2]
    idx_h = (jnp.arange(H) * h) // H
    idx_w = (jnp.arange(W) * w) // W
    xs = xs[:, idx_h][:, :, idx_w]
    x = jnp.concatenate([enc, xs], axis=-1)

    def conv_gn(x, wk, b, g, be, relu):
        y = jax.lax.conv_general_dilated(
            x, wk, window_strides=(1, 1), padding="SAME",
            dimension_numbers=("NHWC", "HWIO", "NHWC"))
        y = y + b
        mu = jnp.mean(y, axis=(1, 2, 3), keepdims=True)
        var = jnp.mean(jnp.square(y - mu), axis=(1, 2, 3), keepdims=True)
        y = (y - mu) * jax.lax.rsqrt(var + _EPS) * g + be
        return jnp.maximum(y, 0.0) if relu else y

    def dc(p, x):
        y = conv_gn(x, p["w1"], p["b1"], p["g1"], p["be1"], True)
        return conv_gn(y, p["w2"], p["b2"], p["g2"], p["be2"], False)

    out = jnp.maximum(dc(params["dc1"], x) + dc(params["dc3"], x), 0.0)
    return jnp.transpose(out, (0, 3, 1, 2))


# ----------------------------------------------------------------------------
if __name__ == "__main__":
    key = jax.random.PRNGKey(0)
    k_enc, k_x, k_dc1, k_dc3 = jax.random.split(key, 4)

    N, C_enc, C_x, H, W = 2, 4, 4, 16, 16
    out_channels = 8
    in_channels = C_enc + C_x                      # channels after concat

    encoder_features = jax.random.normal(k_enc, (N, C_enc, H, W), jnp.float32)
    x = jax.random.normal(k_x, (N, C_x, H // 2, W // 2), jnp.float32)

    params = {
        "dc1": init_double_conv(k_dc1, in_channels, out_channels, 1),
        "dc3": init_double_conv(k_dc3, in_channels, out_channels, 3),
    }
    prepped = prepare_decoder_params(params, W)

    out = decoder_forward(prepped, encoder_features, x)
    out = jax.block_until_ready(out)
    assert out.shape == (N, out_channels, H, W), out.shape
    assert bool(jnp.all(out >= 0.0))               # final ReLU

    ref = _reference_forward(params, encoder_features, x)
    max_err = float(jnp.max(jnp.abs(out - ref)))
    # bf16 MXU operands / bf16 activation feed (f32 accumulate) -> expect
    # ~1e-2 abs error vs the f32 reference at these sizes.
    assert max_err < 1e-1, f"max |kernel - reference| = {max_err}"
    print("KERNEL_OK")
</pallas_src>

<mosaic_0001>
module attributes {stable_mosaic.version = 11 : i64} {
  func.func @_decoder_kernel(%arg0: i32, %arg1: memref<1x16x128xbf16, #tpu.memory_space<vmem>>, %arg2: memref<1x128x128xbf16, #tpu.memory_space<vmem>>, %arg3: memref<1x128x128xbf16, #tpu.memory_space<vmem>>, %arg4: memref<3x128x128xbf16, #tpu.memory_space<vmem>>, %arg5: memref<3x128x128xbf16, #tpu.memory_space<vmem>>, %arg6: memref<12x128xf32, #tpu.memory_space<vmem>>, %arg7: memref<1x16x128xf32, #tpu.memory_space<vmem>>) attributes {dimension_semantics = [#tpu.dimension_semantics<parallel>], iteration_bounds = array<i64: 2>, scalar_prefetch = 0 : i64, scratch_operands = 0 : i64, tpu.core_type = #tpu.core_type<tc>, window_params = [{transform_indices = @transform_0, window_bounds = array<i64: 1, 16, 128>}, {pipeline_mode = #tpu.pipeline_mode<synchronous>, transform_indices = @transform_1, window_bounds = array<i64: 1, 128, 128>}, {pipeline_mode = #tpu.pipeline_mode<synchronous>, transform_indices = @transform_2, window_bounds = array<i64: 1, 128, 128>}, {pipeline_mode = #tpu.pipeline_mode<synchronous>, transform_indices = @transform_3, window_bounds = array<i64: 3, 128, 128>}, {pipeline_mode = #tpu.pipeline_mode<synchronous>, transform_indices = @transform_4, window_bounds = array<i64: 3, 128, 128>}, {pipeline_mode = #tpu.pipeline_mode<synchronous>, transform_indices = @transform_5, window_bounds = array<i64: 12, 128>}, {transform_indices = @transform_6, window_bounds = array<i64: 1, 16, 128>}]} {
    %0 = tpu.iota {dimensions = array<i32: 0>} : vector<16x16xi32>
    %1 = tpu.iota {dimensions = array<i32: 1>} : vector<16x16xi32>
    %c-1_i32 = arith.constant -1 : i32
    %2 = vector.broadcast %c-1_i32 : i32 to vector<16x16xi32>
    %3 = arith.addi %0, %2 : vector<16x16xi32>
    %4 = arith.cmpi eq, %1, %3 : vector<16x16xi32>
    %5 = arith.extui %4 : vector<16x16xi1> to vector<16x16xi32>
    %6 = arith.sitofp %5 : vector<16x16xi32> to vector<16x16xf32>
    %c1_i32 = arith.constant 1 : i32
    %7 = vector.broadcast %c1_i32 : i32 to vector<16x16xi32>
    %8 = arith.addi %0, %7 : vector<16x16xi32>
    %9 = arith.cmpi eq, %1, %8 : vector<16x16xi32>
    %10 = arith.extui %9 : vector<16x16xi1> to vector<16x16xi32>
    %11 = arith.sitofp %10 : vector<16x16xi32> to vector<16x16xf32>
    %c0 = arith.constant 0 : index
    %c0_0 = arith.constant 0 : index
    %c0_1 = arith.constant 0 : index
    %12 = vector.load %arg1[%c0, %c0_0, %c0_1] : memref<1x16x128xbf16, #tpu.memory_space<vmem>>, vector<1x16x128xbf16>
    %13 = vector.shape_cast %12 : vector<1x16x128xbf16> to vector<16x128xbf16>
    %c0_2 = arith.constant 0 : index
    %c0_3 = arith.constant 0 : index
    %14 = vector.load %arg6[%c0_2, %c0_3] : memref<12x128xf32, #tpu.memory_space<vmem>>, vector<1x128xf32>
    %c1 = arith.constant 1 : index
    %c0_4 = arith.constant 0 : index
    %15 = vector.load %arg6[%c1, %c0_4] : memref<12x128xf32, #tpu.memory_space<vmem>>, vector<1x128xf32>
    %c2 = arith.constant 2 : index
    %c0_5 = arith.constant 0 : index
    %16 = vector.load %arg6[%c2, %c0_5] : memref<12x128xf32, #tpu.memory_space<vmem>>, vector<1x128xf32>
    %c0_6 = arith.constant 0 : index
    %c0_7 = arith.constant 0 : index
    %c0_8 = arith.constant 0 : index
    %17 = vector.load %arg2[%c0_6, %c0_7, %c0_8] : memref<1x128x128xbf16, #tpu.memory_space<vmem>>, vector<1x128x128xbf16>
    %18 = vector.shape_cast %17 : vector<1x128x128xbf16> to vector<128x128xbf16>
    %cst = arith.constant dense<0.000000e+00> : vector<16x128xf32>
    %19 = tpu.matmul %13, %18, %cst {dimension_numbers = #tpu.dot_dimension_numbers<[1], [0], [0], [1], [0, 0, 1, 1], [], []>} : vector<16x128xbf16>, vector<128x128xbf16>, vector<16x128xf32> -> vector<16x128xf32>
    %20 = vector.broadcast %14 : vector<1x128xf32> to vector<16x128xf32>
    %21 = arith.addf %19, %20 : vector<16x128xf32>
    %cst_9 = arith.constant dense<0.000000e+00> : vector<16xf32>
    %22 = vector.multi_reduction <add>, %21, %cst_9 [1] : vector<16x128xf32> to vector<16xf32>
    %23 = vector.shape_cast %22 : vector<16xf32> to vector<16x1xf32>
    %cst_10 = arith.constant dense<0.000000e+00> : vector<1xf32>
    %24 = vector.multi_reduction <add>, %23, %cst_10 [0] : vector<16x1xf32> to vector<1xf32>
    %25 = vector.shape_cast %24 : vector<1xf32> to vector<1x1xf32>
    %cst_11 = arith.constant 4.8828125E-4 : f32
    %26 = vector.broadcast %cst_11 : f32 to vector<1x1xf32>
    %27 = arith.mulf %25, %26 : vector<1x1xf32>
    %28 = vector.broadcast %27 : vector<1x1xf32> to vector<16x128xf32>
    %29 = arith.subf %21, %28 : vector<16x128xf32>
    %30 = arith.mulf %29, %29 : vector<16x128xf32>
    %cst_12 = arith.constant dense<0.000000e+00> : vector<16xf32>
    %31 = vector.multi_reduction <add>, %30, %cst_12 [1] : vector<16x128xf32> to vector<16xf32>
    %32 = vector.shape_cast %31 : vector<16xf32> to vector<16x1xf32>
    %cst_13 = arith.constant dense<0.000000e+00> : vector<1xf32>
    %33 = vector.multi_reduction <add>, %32, %cst_13 [0] : vector<16x1xf32> to vector<1xf32>
    %34 = vector.shape_cast %33 : vector<1xf32> to vector<1x1xf32>
    %cst_14 = arith.constant 4.8828125E-4 : f32
    %35 = vector.broadcast %cst_14 : f32 to vector<1x1xf32>
    %36 = arith.mulf %34, %35 : vector<1x1xf32>
    %cst_15 = arith.constant 9.99999974E-6 : f32
    %37 = vector.broadcast %cst_15 : f32 to vector<1x1xf32>
    %38 = arith.addf %36, %37 : vector<1x1xf32>
    %39 = math.rsqrt %38 : vector<1x1xf32>
    %40 = vector.broadcast %39 : vector<1x1xf32> to vector<1x128xf32>
    %41 = arith.mulf %40, %15 : vector<1x128xf32>
    %42 = vector.broadcast %41 : vector<1x128xf32> to vector<16x128xf32>
    %43 = arith.mulf %29, %42 : vector<16x128xf32>
    %44 = vector.broadcast %16 : vector<1x128xf32> to vector<16x128xf32>
    %45 = arith.addf %43, %44 : vector<16x128xf32>
    %cst_16 = arith.constant 0.000000e+00 : f32
    %46 = vector.broadcast %cst_16 : f32 to vector<16x128xf32>
    %47 = arith.maximumf %45, %46 : vector<16x128xf32>
    %48 = arith.truncf %47 : vector<16x128xf32> to vector<16x128xbf16>
    %c3 = arith.constant 3 : index
    %c0_17 = arith.constant 0 : index
    %49 = vector.load %arg6[%c3, %c0_17] : memref<12x128xf32, #tpu.memory_space<vmem>>, vector<1x128xf32>
    %c4 = arith.constant 4 : index
    %c0_18 = arith.constant 0 : index
    %50 = vector.load %arg6[%c4, %c0_18] : memref<12x128xf32, #tpu.memory_space<vmem>>, vector<1x128xf32>
    %c5 = arith.constant 5 : index
    %c0_19 = arith.constant 0 : index
    %51 = vector.load %arg6[%c5, %c0_19] : memref<12x128xf32, #tpu.memory_space<vmem>>, vector<1x128xf32>
    %c0_20 = arith.constant 0 : index
    %c0_21 = arith.constant 0 : index
    %c0_22 = arith.constant 0 : index
    %52 = vector.load %arg3[%c0_20, %c0_21, %c0_22] : memref<1x128x128xbf16, #tpu.memory_space<vmem>>, vector<1x128x128xbf16>
    %53 = vector.shape_cast %52 : vector<1x128x128xbf16> to vector<128x128xbf16>
    %cst_23 = arith.constant dense<0.000000e+00> : vector<16x128xf32>
    %54 = tpu.matmul %48, %53, %cst_23 {dimension_numbers = #tpu.dot_dimension_numbers<[1], [0], [0], [1], [0, 0, 1, 1], [], []>} : vector<16x128xbf16>, vector<128x128xbf16>, vector<16x128xf32> -> vector<16x128xf32>
    %55 = vector.broadcast %49 : vector<1x128xf32> to vector<16x128xf32>
    %56 = arith.addf %54, %55 : vector<16x128xf32>
    %cst_24 = arith.constant dense<0.000000e+00> : vector<16xf32>
    %57 = vector.multi_reduction <add>, %56, %cst_24 [1] : vector<16x128xf32> to vector<16xf32>
    %58 = vector.shape_cast %57 : vector<16xf32> to vector<16x1xf32>
    %cst_25 = arith.constant dense<0.000000e+00> : vector<1xf32>
    %59 = vector.multi_reduction <add>, %58, %cst_25 [0] : vector<16x1xf32> to vector<1xf32>
    %60 = vector.shape_cast %59 : vector<1xf32> to vector<1x1xf32>
    %cst_26 = arith.constant 4.8828125E-4 : f32
    %61 = vector.broadcast %cst_26 : f32 to vector<1x1xf32>
    %62 = arith.mulf %60, %61 : vector<1x1xf32>
    %63 = vector.broadcast %62 : vector<1x1xf32> to vector<16x128xf32>
    %64 = arith.subf %56, %63 : vector<16x128xf32>
    %65 = arith.mulf %64, %64 : vector<16x128xf32>
    %cst_27 = arith.constant dense<0.000000e+00> : vector<16xf32>
    %66 = vector.multi_reduction <add>, %65, %cst_27 [1] : vector<16x128xf32> to vector<16xf32>
    %67 = vector.shape_cast %66 : vector<16xf32> to vector<16x1xf32>
    %cst_28 = arith.constant dense<0.000000e+00> : vector<1xf32>
    %68 = vector.multi_reduction <add>, %67, %cst_28 [0] : vector<16x1xf32> to vector<1xf32>
    %69 = vector.shape_cast %68 : vector<1xf32> to vector<1x1xf32>
    %cst_29 = arith.constant 4.8828125E-4 : f32
    %70 = vector.broadcast %cst_29 : f32 to vector<1x1xf32>
    %71 = arith.mulf %69, %70 : vector<1x1xf32>
    %cst_30 = arith.constant 9.99999974E-6 : f32
    %72 = vector.broadcast %cst_30 : f32 to vector<1x1xf32>
    %73 = arith.addf %71, %72 : vector<1x1xf32>
    %74 = math.rsqrt %73 : vector<1x1xf32>
    %75 = vector.broadcast %74 : vector<1x1xf32> to vector<1x128xf32>
    %76 = arith.mulf %75, %50 : vector<1x128xf32>
    %77 = vector.broadcast %76 : vector<1x128xf32> to vector<16x128xf32>
    %78 = arith.mulf %64, %77 : vector<16x128xf32>
    %79 = vector.broadcast %51 : vector<1x128xf32> to vector<16x128xf32>
    %80 = arith.addf %78, %79 : vector<16x128xf32>
    %c6 = arith.constant 6 : index
    %c0_31 = arith.constant 0 : index
    %81 = vector.load %arg6[%c6, %c0_31] : memref<12x128xf32, #tpu.memory_space<vmem>>, vector<1x128xf32>
    %c7 = arith.constant 7 : index
    %c0_32 = arith.constant 0 : index
    %82 = vector.load %arg6[%c7, %c0_32] : memref<12x128xf32, #tpu.memory_space<vmem>>, vector<1x128xf32>
    %c8 = arith.constant 8 : index
    %c0_33 = arith.constant 0 : index
    %83 = vector.load %arg6[%c8, %c0_33] : memref<12x128xf32, #tpu.memory_space<vmem>>, vector<1x128xf32>
    %c0_34 = arith.constant 0 : index
    %c0_35 = arith.constant 0 : index
    %c0_36 = arith.constant 0 : index
    %84 = vector.load %arg4[%c0_34, %c0_35, %c0_36] : memref<3x128x128xbf16, #tpu.memory_space<vmem>>, vector<1x128x128xbf16>
    %85 = vector.shape_cast %84 : vector<1x128x128xbf16> to vector<128x128xbf16>
    %cst_37 = arith.constant dense<0.000000e+00> : vector<16x128xf32>
    %86 = tpu.matmul %13, %85, %cst_37 {dimension_numbers = #tpu.dot_dimension_numbers<[1], [0], [0], [1], [0, 0, 1, 1], [], []>} : vector<16x128xbf16>, vector<128x128xbf16>, vector<16x128xf32> -> vector<16x128xf32>
    %cst_38 = arith.constant dense<0.000000e+00> : vector<16x128xf32>
    %87 = tpu.matmul %6, %86, %cst_38 {dimension_numbers = #tpu.dot_dimension_numbers<[1], [0], [0], [1], [0, 0, 1, 1], [], []>} : vector<16x16xf32>, vector<16x128xf32>, vector<16x128xf32> -> vector<16x128xf32>
    %c1_39 = arith.constant 1 : index
    %c0_40 = arith.constant 0 : index
    %c0_41 = arith.constant 0 : index
    %88 = vector.load %arg4[%c1_39, %c0_40, %c0_41] : memref<3x128x128xbf16, #tpu.memory_space<vmem>>, vector<1x128x128xbf16>
    %89 = vector.shape_cast %88 : vector<1x128x128xbf16> to vector<128x128xbf16>
    %cst_42 = arith.constant dense<0.000000e+00> : vector<16x128xf32>
    %90 = tpu.matmul %13, %89, %cst_42 {dimension_numbers = #tpu.dot_dimension_numbers<[1], [0], [0], [1], [0, 0, 1, 1], [], []>} : vector<16x128xbf16>, vector<128x128xbf16>, vector<16x128xf32> -> vector<16x128xf32>
    %91 = arith.addf %87, %90 : vector<16x128xf32>
    %c2_43 = arith.constant 2 : index
    %c0_44 = arith.constant 0 : index
    %c0_45 = arith.constant 0 : index
    %92 = vector.load %arg4[%c2_43, %c0_44, %c0_45] : memref<3x128x128xbf16, #tpu.memory_space<vmem>>, vector<1x128x128xbf16>
    %93 = vector.shape_cast %92 : vector<1x128x128xbf16> to vector<128x128xbf16>
    %cst_46 = arith.constant dense<0.000000e+00> : vector<16x128xf32>
    %94 = tpu.matmul %13, %93, %cst_46 {dimension_numbers = #tpu.dot_dimension_numbers<[1], [0], [0], [1], [0, 0, 1, 1], [], []>} : vector<16x128xbf16>, vector<128x128xbf16>, vector<16x128xf32> -> vector<16x128xf32>
    %cst_47 = arith.constant dense<0.000000e+00> : vector<16x128xf32>
    %95 = tpu.matmul %11, %94, %cst_47 {dimension_numbers = #tpu.dot_dimension_numbers<[1], [0], [0], [1], [0, 0, 1, 1], [], []>} : vector<16x16xf32>, vector<16x128xf32>, vector<16x128xf32> -> vector<16x128xf32>
    %96 = arith.addf %91, %95 : vector<16x128xf32>
    %97 = vector.broadcast %81 : vector<1x128xf32> to vector<16x128xf32>
    %98 = arith.addf %96, %97 : vector<16x128xf32>
    %cst_48 = arith.constant dense<0.000000e+00> : vector<16xf32>
    %99 = vector.multi_reduction <add>, %98, %cst_48 [1] : vector<16x128xf32> to vector<16xf32>
    %100 = vector.shape_cast %99 : vector<16xf32> to vector<16x1xf32>
    %cst_49 = arith.constant dense<0.000000e+00> : vector<1xf32>
    %101 = vector.multi_reduction <add>, %100, %cst_49 [0] : vector<16x1xf32> to vector<1xf32>
    %102 = vector.shape_cast %101 : vector<1xf32> to vector<1x1xf32>
    %cst_50 = arith.constant 4.8828125E-4 : f32
    %103 = vector.broadcast %cst_50 : f32 to vector<1x1xf32>
    %104 = arith.mulf %102, %103 : vector<1x1xf32>
    %105 = vector.broadcast %104 : vector<1x1xf32> to vector<16x128xf32>
    %106 = arith.subf %98, %105 : vector<16x128xf32>
    %107 = arith.mulf %106, %106 : vector<16x128xf32>
    %cst_51 = arith.constant dense<0.000000e+00> : vector<16xf32>
    %108 = vector.multi_reduction <add>, %107, %cst_51 [1] : vector<16x128xf32> to vector<16xf32>
    %109 = vector.shape_cast %108 : vector<16xf32> to vector<16x1xf32>
    %cst_52 = arith.constant dense<0.000000e+00> : vector<1xf32>
    %110 = vector.multi_reduction <add>, %109, %cst_52 [0] : vector<16x1xf32> to vector<1xf32>
    %111 = vector.shape_cast %110 : vector<1xf32> to vector<1x1xf32>
    %cst_53 = arith.constant 4.8828125E-4 : f32
    %112 = vector.broadcast %cst_53 : f32 to vector<1x1xf32>
    %113 = arith.mulf %111, %112 : vector<1x1xf32>
    %cst_54 = arith.constant 9.99999974E-6 : f32
    %114 = vector.broadcast %cst_54 : f32 to vector<1x1xf32>
    %115 = arith.addf %113, %114 : vector<1x1xf32>
    %116 = math.rsqrt %115 : vector<1x1xf32>
    %117 = vector.broadcast %116 : vector<1x1xf32> to vector<1x128xf32>
    %118 = arith.mulf %117, %82 : vector<1x128xf32>
    %119 = vector.broadcast %118 : vector<1x128xf32> to vector<16x128xf32>
    %120 = arith.mulf %106, %119 : vector<16x128xf32>
    %121 = vector.broadcast %83 : vector<1x128xf32> to vector<16x128xf32>
    %122 = arith.addf %120, %121 : vector<16x128xf32>
    %cst_55 = arith.constant 0.000000e+00 : f32
    %123 = vector.broadcast %cst_55 : f32 to vector<16x128xf32>
    %124 = arith.maximumf %122, %123 : vector<16x128xf32>
    %125 = arith.truncf %124 : vector<16x128xf32> to vector<16x128xbf16>
    %c9 = arith.constant 9 : index
    %c0_56 = arith.constant 0 : index
    %126 = vector.load %arg6[%c9, %c0_56] : memref<12x128xf32, #tpu.memory_space<vmem>>, vector<1x128xf32>
    %c10 = arith.constant 10 : index
    %c0_57 = arith.constant 0 : index
    %127 = vector.load %arg6[%c10, %c0_57] : memref<12x128xf32, #tpu.memory_space<vmem>>, vector<1x128xf32>
    %c11 = arith.constant 11 : index
    %c0_58 = arith.constant 0 : index
    %128 = vector.load %arg6[%c11, %c0_58] : memref<12x128xf32, #tpu.memory_space<vmem>>, vector<1x128xf32>
    %c0_59 = arith.constant 0 : index
    %c0_60 = arith.constant 0 : index
    %c0_61 = arith.constant 0 : index
    %129 = vector.load %arg5[%c0_59, %c0_60, %c0_61] : memref<3x128x128xbf16, #tpu.memory_space<vmem>>, vector<1x128x128xbf16>
    %130 = vector.shape_cast %129 : vector<1x128x128xbf16> to vector<128x128xbf16>
    %cst_62 = arith.constant dense<0.000000e+00> : vector<16x128xf32>
    %131 = tpu.matmul %125, %130, %cst_62 {dimension_numbers = #tpu.dot_dimension_numbers<[1], [0], [0], [1], [0, 0, 1, 1], [], []>} : vector<16x128xbf16>, vector<128x128xbf16>, vector<16x128xf32> -> vector<16x128xf32>
    %cst_63 = arith.constant dense<0.000000e+00> : vector<16x128xf32>
    %132 = tpu.matmul %6, %131, %cst_63 {dimension_numbers = #tpu.dot_dimension_numbers<[1], [0], [0], [1], [0, 0, 1, 1], [], []>} : vector<16x16xf32>, vector<16x128xf32>, vector<16x128xf32> -> vector<16x128xf32>
    %c1_64 = arith.constant 1 : index
    %c0_65 = arith.constant 0 : index
    %c0_66 = arith.constant 0 : index
    %133 = vector.load %arg5[%c1_64, %c0_65, %c0_66] : memref<3x128x128xbf16, #tpu.memory_space<vmem>>, vector<1x128x128xbf16>
    %134 = vector.shape_cast %133 : vector<1x128x128xbf16> to vector<128x128xbf16>
    %cst_67 = arith.constant dense<0.000000e+00> : vector<16x128xf32>
    %135 = tpu.matmul %125, %134, %cst_67 {dimension_numbers = #tpu.dot_dimension_numbers<[1], [0], [0], [1], [0, 0, 1, 1], [], []>} : vector<16x128xbf16>, vector<128x128xbf16>, vector<16x128xf32> -> vector<16x128xf32>
    %136 = arith.addf %132, %135 : vector<16x128xf32>
    %c2_68 = arith.constant 2 : index
    %c0_69 = arith.constant 0 : index
    %c0_70 = arith.constant 0 : index
    %137 = vector.load %arg5[%c2_68, %c0_69, %c0_70] : memref<3x128x128xbf16, #tpu.memory_space<vmem>>, vector<1x128x128xbf16>
    %138 = vector.shape_cast %137 : vector<1x128x128xbf16> to vector<128x128xbf16>
    %cst_71 = arith.constant dense<0.000000e+00> : vector<16x128xf32>
    %139 = tpu.matmul %125, %138, %cst_71 {dimension_numbers = #tpu.dot_dimension_numbers<[1], [0], [0], [1], [0, 0, 1, 1], [], []>} : vector<16x128xbf16>, vector<128x128xbf16>, vector<16x128xf32> -> vector<16x128xf32>
    %cst_72 = arith.constant dense<0.000000e+00> : vector<16x128xf32>
    %140 = tpu.matmul %11, %139, %cst_72 {dimension_numbers = #tpu.dot_dimension_numbers<[1], [0], [0], [1], [0, 0, 1, 1], [], []>} : vector<16x16xf32>, vector<16x128xf32>, vector<16x128xf32> -> vector<16x128xf32>
    %141 = arith.addf %136, %140 : vector<16x128xf32>
    %142 = vector.broadcast %126 : vector<1x128xf32> to vector<16x128xf32>
    %143 = arith.addf %141, %142 : vector<16x128xf32>
    %cst_73 = arith.constant dense<0.000000e+00> : vector<16xf32>
    %144 = vector.multi_reduction <add>, %143, %cst_73 [1] : vector<16x128xf32> to vector<16xf32>
    %145 = vector.shape_cast %144 : vector<16xf32> to vector<16x1xf32>
    %cst_74 = arith.constant dense<0.000000e+00> : vector<1xf32>
    %146 = vector.multi_reduction <add>, %145, %cst_74 [0] : vector<16x1xf32> to vector<1xf32>
    %147 = vector.shape_cast %146 : vector<1xf32> to vector<1x1xf32>
    %cst_75 = arith.constant 4.8828125E-4 : f32
    %148 = vector.broadcast %cst_75 : f32 to vector<1x1xf32>
    %149 = arith.mulf %147, %148 : vector<1x1xf32>
    %150 = vector.broadcast %149 : vector<1x1xf32> to vector<16x128xf32>
    %151 = arith.subf %143, %150 : vector<16x128xf32>
    %152 = arith.mulf %151, %151 : vector<16x128xf32>
    %cst_76 = arith.constant dense<0.000000e+00> : vector<16xf32>
    %153 = vector.multi_reduction <add>, %152, %cst_76 [1] : vector<16x128xf32> to vector<16xf32>
    %154 = vector.shape_cast %153 : vector<16xf32> to vector<16x1xf32>
    %cst_77 = arith.constant dense<0.000000e+00> : vector<1xf32>
    %155 = vector.multi_reduction <add>, %154, %cst_77 [0] : vector<16x1xf32> to vector<1xf32>
    %156 = vector.shape_cast %155 : vector<1xf32> to vector<1x1xf32>
    %cst_78 = arith.constant 4.8828125E-4 : f32
    %157 = vector.broadcast %cst_78 : f32 to vector<1x1xf32>
    %158 = arith.mulf %156, %157 : vector<1x1xf32>
    %cst_79 = arith.constant 9.99999974E-6 : f32
    %159 = vector.broadcast %cst_79 : f32 to vector<1x1xf32>
    %160 = arith.addf %158, %159 : vector<1x1xf32>
    %161 = math.rsqrt %160 : vector<1x1xf32>
    %162 = vector.broadcast %161 : vector<1x1xf32> to vector<1x128xf32>
    %163 = arith.mulf %162, %127 : vector<1x128xf32>
    %164 = vector.broadcast %163 : vector<1x128xf32> to vector<16x128xf32>
    %165 = arith.mulf %151, %164 : vector<16x128xf32>
    %166 = vector.broadcast %128 : vector<1x128xf32> to vector<16x128xf32>
    %167 = arith.addf %165, %166 : vector<16x128xf32>
    %168 = arith.addf %80, %167 : vector<16x128xf32>
    %cst_80 = arith.constant 0.000000e+00 : f32
    %169 = vector.broadcast %cst_80 : f32 to vector<16x128xf32>
    %170 = arith.maximumf %168, %169 : vector<16x128xf32>
    %c0_81 = arith.constant 0 : index
    %c0_82 = arith.constant 0 : index
    %c0_83 = arith.constant 0 : index
    %171 = vector.load %arg7[%c0_81, %c0_82, %c0_83] : memref<1x16x128xf32, #tpu.memory_space<vmem>>, vector<1x16x128xf32>
    %172 = vector.shape_cast %171 : vector<1x16x128xf32> to vector<16x128xf32>
    %173 = vector.shape_cast %170 : vector<16x128xf32> to vector<1x16x128xf32>
    tpu.vector_store %arg7[%c0_81, %c0_82, %c0_83], %173 {strides = array<i32>} : memref<1x16x128xf32, #tpu.memory_space<vmem>>, vector<1x16x128xf32>,
    return
  }
  func.func @transform_0(%arg0: i32) -> (i32, i32, i32) {
    %c0_i32 = arith.constant 0 : i32
    %c0_i32_0 = arith.constant 0 : i32
    %c0_i32_1 = arith.constant 0 : i32
    return %arg0, %c0_i32, %c0_i32_0 : i32, i32, i32
  }
  func.func @transform_1(%arg0: i32) -> (i32, i32, i32) {
    %c0_i32 = arith.constant 0 : i32
    %c0_i32_0 = arith.constant 0 : i32
    %c0_i32_1 = arith.constant 0 : i32
    %c0_i32_2 = arith.constant 0 : i32
    return %c0_i32, %c0_i32_0, %c0_i32_1 : i32, i32, i32
  }
  func.func @transform_2(%arg0: i32) -> (i32, i32, i32) {
    %c0_i32 = arith.constant 0 : i32
    %c0_i32_0 = arith.constant 0 : i32
    %c0_i32_1 = arith.constant 0 : i32
    %c0_i32_2 = arith.constant 0 : i32
    return %c0_i32, %c0_i32_0, %c0_i32_1 : i32, i32, i32
  }
  func.func @transform_3(%arg0: i32) -> (i32, i32, i32) {
    %c0_i32 = arith.constant 0 : i32
    %c0_i32_0 = arith.constant 0 : i32
    %c0_i32_1 = arith.constant 0 : i32
    %c0_i32_2 = arith.constant 0 : i32
    return %c0_i32, %c0_i32_0, %c0_i32_1 : i32, i32, i32
  }
  func.func @transform_4(%arg0: i32) -> (i32, i32, i32) {
    %c0_i32 = arith.constant 0 : i32
    %c0_i32_0 = arith.constant 0 : i32
    %c0_i32_1 = arith.constant 0 : i32
    %c0_i32_2 = arith.constant 0 : i32
    return %c0_i32, %c0_i32_0, %c0_i32_1 : i32, i32, i32
  }
  func.func @transform_5(%arg0: i32) -> (i32, i32) {
    %c0_i32 = arith.constant 0 : i32
    %c0_i32_0 = arith.constant 0 : i32
    %c0_i32_1 = arith.constant 0 : i32
    return %c0_i32, %c0_i32_0 : i32, i32
  }
  func.func @transform_6(%arg0: i32) -> (i32, i32, i32) {
    %c0_i32 = arith.constant 0 : i32
    %c0_i32_0 = arith.constant 0 : i32
    %c0_i32_1 = arith.constant 0 : i32
    return %arg0, %c0_i32, %c0_i32_0 : i32, i32, i32
  }
}

module attributes {stable_mosaic.version = 11 : i64} {
  func.func @_decoder_kernel(%arg0: i32, %arg1: memref<1x16x128xbf16, #tpu.memory_space<vmem>>, %arg2: memref<1x128x128xbf16, #tpu.memory_space<vmem>>, %arg3: memref<1x128x128xbf16, #tpu.memory_space<vmem>>, %arg4: memref<3x128x128xbf16, #tpu.memory_space<vmem>>, %arg5: memref<3x128x128xbf16, #tpu.memory_space<vmem>>, %arg6: memref<12x128xf32, #tpu.memory_space<vmem>>, %arg7: memref<1x16x128xf32, #tpu.memory_space<vmem>>) attributes {dimension_semantics = [#tpu.dimension_semantics<parallel>], iteration_bounds = array<i64: 2>, scalar_prefetch = 0 : i64, scratch_operands = 0 : i64, tpu.core_type = #tpu.core_type<tc>, window_params = [{transform_indices = @transform_0, window_bounds = array<i64: 1, 16, 128>}, {pipeline_mode = #tpu.pipeline_mode<synchronous>, transform_indices = @transform_1, window_bounds = array<i64: 1, 128, 128>}, {pipeline_mode = #tpu.pipeline_mode<synchronous>, transform_indices = @transform_2, window_bounds = array<i64: 1, 128, 128>}, {pipeline_mode = #tpu.pipeline_mode<synchronous>, transform_indices = @transform_3, window_bounds = array<i64: 3, 128, 128>}, {pipeline_mode = #tpu.pipeline_mode<synchronous>, transform_indices = @transform_4, window_bounds = array<i64: 3, 128, 128>}, {pipeline_mode = #tpu.pipeline_mode<synchronous>, transform_indices = @transform_5, window_bounds = array<i64: 12, 128>}, {transform_indices = @transform_6, window_bounds = array<i64: 1, 16, 128>}]} {
    %0 = tpu.iota {dimensions = array<i32: 0>} : vector<16x16xi32>
    %1 = tpu.iota {dimensions = array<i32: 1>} : vector<16x16xi32>
    %c-1_i32 = arith.constant -1 : i32
    %2 = vector.broadcast %c-1_i32 : i32 to vector<16x16xi32>
    %3 = arith.addi %0, %2 : vector<16x16xi32>
    %4 = arith.cmpi eq, %1, %3 : vector<16x16xi32>
    %5 = arith.extui %4 : vector<16x16xi1> to vector<16x16xi32>
    %6 = arith.sitofp %5 : vector<16x16xi32> to vector<16x16xf32>
    %c1_i32 = arith.constant 1 : i32
    %7 = vector.broadcast %c1_i32 : i32 to vector<16x16xi32>
    %8 = arith.addi %0, %7 : vector<16x16xi32>
    %9 = arith.cmpi eq, %1, %8 : vector<16x16xi32>
    %10 = arith.extui %9 : vector<16x16xi1> to vector<16x16xi32>
    %11 = arith.sitofp %10 : vector<16x16xi32> to vector<16x16xf32>
    %c0 = arith.constant 0 : index
    %c0_0 = arith.constant 0 : index
    %c0_1 = arith.constant 0 : index
    %12 = vector.load %arg1[%c0, %c0_0, %c0_1] : memref<1x16x128xbf16, #tpu.memory_space<vmem>>, vector<1x16x128xbf16>
    %13 = vector.shape_cast %12 : vector<1x16x128xbf16> to vector<16x128xbf16>
    %c0_2 = arith.constant 0 : index
    %c0_3 = arith.constant 0 : index
    %14 = vector.load %arg6[%c0_2, %c0_3] : memref<12x128xf32, #tpu.memory_space<vmem>>, vector<1x128xf32>
    %c1 = arith.constant 1 : index
    %c0_4 = arith.constant 0 : index
    %15 = vector.load %arg6[%c1, %c0_4] : memref<12x128xf32, #tpu.memory_space<vmem>>, vector<1x128xf32>
    %c2 = arith.constant 2 : index
    %c0_5 = arith.constant 0 : index
    %16 = vector.load %arg6[%c2, %c0_5] : memref<12x128xf32, #tpu.memory_space<vmem>>, vector<1x128xf32>
    %c0_6 = arith.constant 0 : index
    %c0_7 = arith.constant 0 : index
    %c0_8 = arith.constant 0 : index
    %17 = vector.load %arg2[%c0_6, %c0_7, %c0_8] : memref<1x128x128xbf16, #tpu.memory_space<vmem>>, vector<1x128x128xbf16>
    %18 = vector.shape_cast %17 : vector<1x128x128xbf16> to vector<128x128xbf16>
    %cst = arith.constant dense<0.000000e+00> : vector<16x128xf32>
    %19 = tpu.matmul %13, %18, %cst {dimension_numbers = #tpu.dot_dimension_numbers<[1], [0], [0], [1], [0, 0, 1, 1], [], []>} : vector<16x128xbf16>, vector<128x128xbf16>, vector<16x128xf32> -> vector<16x128xf32>
    %20 = vector.broadcast %14 : vector<1x128xf32> to vector<16x128xf32>
    %21 = arith.addf %19, %20 : vector<16x128xf32>
    %cst_9 = arith.constant dense<0.000000e+00> : vector<16xf32>
    %22 = vector.multi_reduction <add>, %21, %cst_9 [1] : vector<16x128xf32> to vector<16xf32>
    %23 = vector.shape_cast %22 : vector<16xf32> to vector<16x1xf32>
    %cst_10 = arith.constant dense<0.000000e+00> : vector<1xf32>
    %24 = vector.multi_reduction <add>, %23, %cst_10 [0] : vector<16x1xf32> to vector<1xf32>
    %25 = vector.shape_cast %24 : vector<1xf32> to vector<1x1xf32>
    %cst_11 = arith.constant 4.8828125E-4 : f32
    %26 = vector.broadcast %cst_11 : f32 to vector<1x1xf32>
    %27 = arith.mulf %25, %26 : vector<1x1xf32>
    %28 = vector.broadcast %27 : vector<1x1xf32> to vector<16x128xf32>
    %29 = arith.subf %21, %28 : vector<16x128xf32>
    %30 = arith.mulf %29, %29 : vector<16x128xf32>
    %cst_12 = arith.constant dense<0.000000e+00> : vector<16xf32>
    %31 = vector.multi_reduction <add>, %30, %cst_12 [1] : vector<16x128xf32> to vector<16xf32>
    %32 = vector.shape_cast %31 : vector<16xf32> to vector<16x1xf32>
    %cst_13 = arith.constant dense<0.000000e+00> : vector<1xf32>
    %33 = vector.multi_reduction <add>, %32, %cst_13 [0] : vector<16x1xf32> to vector<1xf32>
    %34 = vector.shape_cast %33 : vector<1xf32> to vector<1x1xf32>
    %cst_14 = arith.constant 4.8828125E-4 : f32
    %35 = vector.broadcast %cst_14 : f32 to vector<1x1xf32>
    %36 = arith.mulf %34, %35 : vector<1x1xf32>
    %cst_15 = arith.constant 9.99999974E-6 : f32
    %37 = vector.broadcast %cst_15 : f32 to vector<1x1xf32>
    %38 = arith.addf %36, %37 : vector<1x1xf32>
    %39 = math.rsqrt %38 : vector<1x1xf32>
    %40 = vector.broadcast %39 : vector<1x1xf32> to vector<1x128xf32>
    %41 = arith.mulf %40, %15 : vector<1x128xf32>
    %42 = vector.broadcast %41 : vector<1x128xf32> to vector<16x128xf32>
    %43 = arith.mulf %29, %42 : vector<16x128xf32>
    %44 = vector.broadcast %16 : vector<1x128xf32> to vector<16x128xf32>
    %45 = arith.addf %43, %44 : vector<16x128xf32>
    %cst_16 = arith.constant 0.000000e+00 : f32
    %46 = vector.broadcast %cst_16 : f32 to vector<16x128xf32>
    %47 = arith.maximumf %45, %46 : vector<16x128xf32>
    %48 = arith.truncf %47 : vector<16x128xf32> to vector<16x128xbf16>
    %c3 = arith.constant 3 : index
    %c0_17 = arith.constant 0 : index
    %49 = vector.load %arg6[%c3, %c0_17] : memref<12x128xf32, #tpu.memory_space<vmem>>, vector<1x128xf32>
    %c4 = arith.constant 4 : index
    %c0_18 = arith.constant 0 : index
    %50 = vector.load %arg6[%c4, %c0_18] : memref<12x128xf32, #tpu.memory_space<vmem>>, vector<1x128xf32>
    %c5 = arith.constant 5 : index
    %c0_19 = arith.constant 0 : index
    %51 = vector.load %arg6[%c5, %c0_19] : memref<12x128xf32, #tpu.memory_space<vmem>>, vector<1x128xf32>
    %c0_20 = arith.constant 0 : index
    %c0_21 = arith.constant 0 : index
    %c0_22 = arith.constant 0 : index
    %52 = vector.load %arg3[%c0_20, %c0_21, %c0_22] : memref<1x128x128xbf16, #tpu.memory_space<vmem>>, vector<1x128x128xbf16>
    %53 = vector.shape_cast %52 : vector<1x128x128xbf16> to vector<128x128xbf16>
    %cst_23 = arith.constant dense<0.000000e+00> : vector<16x128xf32>
    %54 = tpu.matmul %48, %53, %cst_23 {dimension_numbers = #tpu.dot_dimension_numbers<[1], [0], [0], [1], [0, 0, 1, 1], [], []>} : vector<16x128xbf16>, vector<128x128xbf16>, vector<16x128xf32> -> vector<16x128xf32>
    %55 = vector.broadcast %49 : vector<1x128xf32> to vector<16x128xf32>
    %56 = arith.addf %54, %55 : vector<16x128xf32>
    %cst_24 = arith.constant dense<0.000000e+00> : vector<16xf32>
    %57 = vector.multi_reduction <add>, %56, %cst_24 [1] : vector<16x128xf32> to vector<16xf32>
    %58 = vector.shape_cast %57 : vector<16xf32> to vector<16x1xf32>
    %cst_25 = arith.constant dense<0.000000e+00> : vector<1xf32>
    %59 = vector.multi_reduction <add>, %58, %cst_25 [0] : vector<16x1xf32> to vector<1xf32>
    %60 = vector.shape_cast %59 : vector<1xf32> to vector<1x1xf32>
    %cst_26 = arith.constant 4.8828125E-4 : f32
    %61 = vector.broadcast %cst_26 : f32 to vector<1x1xf32>
    %62 = arith.mulf %60, %61 : vector<1x1xf32>
    %63 = vector.broadcast %62 : vector<1x1xf32> to vector<16x128xf32>
    %64 = arith.subf %56, %63 : vector<16x128xf32>
    %65 = arith.mulf %64, %64 : vector<16x128xf32>
    %cst_27 = arith.constant dense<0.000000e+00> : vector<16xf32>
    %66 = vector.multi_reduction <add>, %65, %cst_27 [1] : vector<16x128xf32> to vector<16xf32>
    %67 = vector.shape_cast %66 : vector<16xf32> to vector<16x1xf32>
    %cst_28 = arith.constant dense<0.000000e+00> : vector<1xf32>
    %68 = vector.multi_reduction <add>, %67, %cst_28 [0] : vector<16x1xf32> to vector<1xf32>
    %69 = vector.shape_cast %68 : vector<1xf32> to vector<1x1xf32>
    %cst_29 = arith.constant 4.8828125E-4 : f32
    %70 = vector.broadcast %cst_29 : f32 to vector<1x1xf32>
    %71 = arith.mulf %69, %70 : vector<1x1xf32>
    %cst_30 = arith.constant 9.99999974E-6 : f32
    %72 = vector.broadcast %cst_30 : f32 to vector<1x1xf32>
    %73 = arith.addf %71, %72 : vector<1x1xf32>
    %74 = math.rsqrt %73 : vector<1x1xf32>
    %75 = vector.broadcast %74 : vector<1x1xf32> to vector<1x128xf32>
    %76 = arith.mulf %75, %50 : vector<1x128xf32>
    %77 = vector.broadcast %76 : vector<1x128xf32> to vector<16x128xf32>
    %78 = arith.mulf %64, %77 : vector<16x128xf32>
    %79 = vector.broadcast %51 : vector<1x128xf32> to vector<16x128xf32>
    %80 = arith.addf %78, %79 : vector<16x128xf32>
    %c6 = arith.constant 6 : index
    %c0_31 = arith.constant 0 : index
    %81 = vector.load %arg6[%c6, %c0_31] : memref<12x128xf32, #tpu.memory_space<vmem>>, vector<1x128xf32>
    %c7 = arith.constant 7 : index
    %c0_32 = arith.constant 0 : index
    %82 = vector.load %arg6[%c7, %c0_32] : memref<12x128xf32, #tpu.memory_space<vmem>>, vector<1x128xf32>
    %c8 = arith.constant 8 : index
    %c0_33 = arith.constant 0 : index
    %83 = vector.load %arg6[%c8, %c0_33] : memref<12x128xf32, #tpu.memory_space<vmem>>, vector<1x128xf32>
    %c0_34 = arith.constant 0 : index
    %c0_35 = arith.constant 0 : index
    %c0_36 = arith.constant 0 : index
    %84 = vector.load %arg4[%c0_34, %c0_35, %c0_36] : memref<3x128x128xbf16, #tpu.memory_space<vmem>>, vector<1x128x128xbf16>
    %85 = vector.shape_cast %84 : vector<1x128x128xbf16> to vector<128x128xbf16>
    %cst_37 = arith.constant dense<0.000000e+00> : vector<16x128xf32>
    %86 = tpu.matmul %13, %85, %cst_37 {dimension_numbers = #tpu.dot_dimension_numbers<[1], [0], [0], [1], [0, 0, 1, 1], [], []>} : vector<16x128xbf16>, vector<128x128xbf16>, vector<16x128xf32> -> vector<16x128xf32>
    %cst_38 = arith.constant dense<0.000000e+00> : vector<16x128xf32>
    %87 = tpu.matmul %6, %86, %cst_38 {dimension_numbers = #tpu.dot_dimension_numbers<[1], [0], [0], [1], [0, 0, 1, 1], [], []>} : vector<16x16xf32>, vector<16x128xf32>, vector<16x128xf32> -> vector<16x128xf32>
    %c1_39 = arith.constant 1 : index
    %c0_40 = arith.constant 0 : index
    %c0_41 = arith.constant 0 : index
    %88 = vector.load %arg4[%c1_39, %c0_40, %c0_41] : memref<3x128x128xbf16, #tpu.memory_space<vmem>>, vector<1x128x128xbf16>
    %89 = vector.shape_cast %88 : vector<1x128x128xbf16> to vector<128x128xbf16>
    %cst_42 = arith.constant dense<0.000000e+00> : vector<16x128xf32>
    %90 = tpu.matmul %13, %89, %cst_42 {dimension_numbers = #tpu.dot_dimension_numbers<[1], [0], [0], [1], [0, 0, 1, 1], [], []>} : vector<16x128xbf16>, vector<128x128xbf16>, vector<16x128xf32> -> vector<16x128xf32>
    %91 = arith.addf %87, %90 : vector<16x128xf32>
    %c2_43 = arith.constant 2 : index
    %c0_44 = arith.constant 0 : index
    %c0_45 = arith.constant 0 : index
    %92 = vector.load %arg4[%c2_43, %c0_44, %c0_45] : memref<3x128x128xbf16, #tpu.memory_space<vmem>>, vector<1x128x128xbf16>
    %93 = vector.shape_cast %92 : vector<1x128x128xbf16> to vector<128x128xbf16>
    %cst_46 = arith.constant dense<0.000000e+00> : vector<16x128xf32>
    %94 = tpu.matmul %13, %93, %cst_46 {dimension_numbers = #tpu.dot_dimension_numbers<[1], [0], [0], [1], [0, 0, 1, 1], [], []>} : vector<16x128xbf16>, vector<128x128xbf16>, vector<16x128xf32> -> vector<16x128xf32>
    %cst_47 = arith.constant dense<0.000000e+00> : vector<16x128xf32>
    %95 = tpu.matmul %11, %94, %cst_47 {dimension_numbers = #tpu.dot_dimension_numbers<[1], [0], [0], [1], [0, 0, 1, 1], [], []>} : vector<16x16xf32>, vector<16x128xf32>, vector<16x128xf32> -> vector<16x128xf32>
    %96 = arith.addf %91, %95 : vector<16x128xf32>
    %97 = vector.broadcast %81 : vector<1x128xf32> to vector<16x128xf32>
    %98 = arith.addf %96, %97 : vector<16x128xf32>
    %cst_48 = arith.constant dense<0.000000e+00> : vector<16xf32>
    %99 = vector.multi_reduction <add>, %98, %cst_48 [1] : vector<16x128xf32> to vector<16xf32>
    %100 = vector.shape_cast %99 : vector<16xf32> to vector<16x1xf32>
    %cst_49 = arith.constant dense<0.000000e+00> : vector<1xf32>
    %101 = vector.multi_reduction <add>, %100, %cst_49 [0] : vector<16x1xf32> to vector<1xf32>
    %102 = vector.shape_cast %101 : vector<1xf32> to vector<1x1xf32>
    %cst_50 = arith.constant 4.8828125E-4 : f32
    %103 = vector.broadcast %cst_50 : f32 to vector<1x1xf32>
    %104 = arith.mulf %102, %103 : vector<1x1xf32>
    %105 = vector.broadcast %104 : vector<1x1xf32> to vector<16x128xf32>
    %106 = arith.subf %98, %105 : vector<16x128xf32>
    %107 = arith.mulf %106, %106 : vector<16x128xf32>
    %cst_51 = arith.constant dense<0.000000e+00> : vector<16xf32>
    %108 = vector.multi_reduction <add>, %107, %cst_51 [1] : vector<16x128xf32> to vector<16xf32>
    %109 = vector.shape_cast %108 : vector<16xf32> to vector<16x1xf32>
    %cst_52 = arith.constant dense<0.000000e+00> : vector<1xf32>
    %110 = vector.multi_reduction <add>, %109, %cst_52 [0] : vector<16x1xf32> to vector<1xf32>
    %111 = vector.shape_cast %110 : vector<1xf32> to vector<1x1xf32>
    %cst_53 = arith.constant 4.8828125E-4 : f32
    %112 = vector.broadcast %cst_53 : f32 to vector<1x1xf32>
    %113 = arith.mulf %111, %112 : vector<1x1xf32>
    %cst_54 = arith.constant 9.99999974E-6 : f32
    %114 = vector.broadcast %cst_54 : f32 to vector<1x1xf32>
    %115 = arith.addf %113, %114 : vector<1x1xf32>
    %116 = math.rsqrt %115 : vector<1x1xf32>
    %117 = vector.broadcast %116 : vector<1x1xf32> to vector<1x128xf32>
    %118 = arith.mulf %117, %82 : vector<1x128xf32>
    %119 = vector.broadcast %118 : vector<1x128xf32> to vector<16x128xf32>
    %120 = arith.mulf %106, %119 : vector<16x128xf32>
    %121 = vector.broadcast %83 : vector<1x128xf32> to vector<16x128xf32>
    %122 = arith.addf %120, %121 : vector<16x128xf32>
    %cst_55 = arith.constant 0.000000e+00 : f32
    %123 = vector.broadcast %cst_55 : f32 to vector<16x128xf32>
    %124 = arith.maximumf %122, %123 : vector<16x128xf32>
    %125 = arith.truncf %124 : vector<16x128xf32> to vector<16x128xbf16>
    %c9 = arith.constant 9 : index
    %c0_56 = arith.constant 0 : index
    %126 = vector.load %arg6[%c9, %c0_56] : memref<12x128xf32, #tpu.memory_space<vmem>>, vector<1x128xf32>
    %c10 = arith.constant 10 : index
    %c0_57 = arith.constant 0 : index
    %127 = vector.load %arg6[%c10, %c0_57] : memref<12x128xf32, #tpu.memory_space<vmem>>, vector<1x128xf32>
    %c11 = arith.constant 11 : index
    %c0_58 = arith.constant 0 : index
    %128 = vector.load %arg6[%c11, %c0_58] : memref<12x128xf32, #tpu.memory_space<vmem>>, vector<1x128xf32>
    %c0_59 = arith.constant 0 : index
    %c0_60 = arith.constant 0 : index
    %c0_61 = arith.constant 0 : index
    %129 = vector.load %arg5[%c0_59, %c0_60, %c0_61] : memref<3x128x128xbf16, #tpu.memory_space<vmem>>, vector<1x128x128xbf16>
    %130 = vector.shape_cast %129 : vector<1x128x128xbf16> to vector<128x128xbf16>
    %cst_62 = arith.constant dense<0.000000e+00> : vector<16x128xf32>
    %131 = tpu.matmul %125, %130, %cst_62 {dimension_numbers = #tpu.dot_dimension_numbers<[1], [0], [0], [1], [0, 0, 1, 1], [], []>} : vector<16x128xbf16>, vector<128x128xbf16>, vector<16x128xf32> -> vector<16x128xf32>
    %cst_63 = arith.constant dense<0.000000e+00> : vector<16x128xf32>
    %132 = tpu.matmul %6, %131, %cst_63 {dimension_numbers = #tpu.dot_dimension_numbers<[1], [0], [0], [1], [0, 0, 1, 1], [], []>} : vector<16x16xf32>, vector<16x128xf32>, vector<16x128xf32> -> vector<16x128xf32>
    %c1_64 = arith.constant 1 : index
    %c0_65 = arith.constant 0 : index
    %c0_66 = arith.constant 0 : index
    %133 = vector.load %arg5[%c1_64, %c0_65, %c0_66] : memref<3x128x128xbf16, #tpu.memory_space<vmem>>, vector<1x128x128xbf16>
    %134 = vector.shape_cast %133 : vector<1x128x128xbf16> to vector<128x128xbf16>
    %cst_67 = arith.constant dense<0.000000e+00> : vector<16x128xf32>
    %135 = tpu.matmul %125, %134, %cst_67 {dimension_numbers = #tpu.dot_dimension_numbers<[1], [0], [0], [1], [0, 0, 1, 1], [], []>} : vector<16x128xbf16>, vector<128x128xbf16>, vector<16x128xf32> -> vector<16x128xf32>
    %136 = arith.addf %132, %135 : vector<16x128xf32>
    %c2_68 = arith.constant 2 : index
    %c0_69 = arith.constant 0 : index
    %c0_70 = arith.constant 0 : index
    %137 = vector.load %arg5[%c2_68, %c0_69, %c0_70] : memref<3x128x128xbf16, #tpu.memory_space<vmem>>, vector<1x128x128xbf16>
    %138 = vector.shape_cast %137 : vector<1x128x128xbf16> to vector<128x128xbf16>
    %cst_71 = arith.constant dense<0.000000e+00> : vector<16x128xf32>
    %139 = tpu.matmul %125, %138, %cst_71 {dimension_numbers = #tpu.dot_dimension_numbers<[1], [0], [0], [1], [0, 0, 1, 1], [], []>} : vector<16x128xbf16>, vector<128x128xbf16>, vector<16x128xf32> -> vector<16x128xf32>
    %cst_72 = arith.constant dense<0.000000e+00> : vector<16x128xf32>
    %140 = tpu.matmul %11, %139, %cst_72 {dimension_numbers = #tpu.dot_dimension_numbers<[1], [0], [0], [1], [0, 0, 1, 1], [], []>} : vector<16x16xf32>, vector<16x128xf32>, vector<16x128xf32> -> vector<16x128xf32>
    %141 = arith.addf %136, %140 : vector<16x128xf32>
    %142 = vector.broadcast %126 : vector<1x128xf32> to vector<16x128xf32>
    %143 = arith.addf %141, %142 : vector<16x128xf32>
    %cst_73 = arith.constant dense<0.000000e+00> : vector<16xf32>
    %144 = vector.multi_reduction <add>, %143, %cst_73 [1] : vector<16x128xf32> to vector<16xf32>
    %145 = vector.shape_cast %144 : vector<16xf32> to vector<16x1xf32>
    %cst_74 = arith.constant dense<0.000000e+00> : vector<1xf32>
    %146 = vector.multi_reduction <add>, %145, %cst_74 [0] : vector<16x1xf32> to vector<1xf32>
    %147 = vector.shape_cast %146 : vector<1xf32> to vector<1x1xf32>
    %cst_75 = arith.constant 4.8828125E-4 : f32
    %148 = vector.broadcast %cst_75 : f32 to vector<1x1xf32>
    %149 = arith.mulf %147, %148 : vector<1x1xf32>
    %150 = vector.broadcast %149 : vector<1x1xf32> to vector<16x128xf32>
    %151 = arith.subf %143, %150 : vector<16x128xf32>
    %152 = arith.mulf %151, %151 : vector<16x128xf32>
    %cst_76 = arith.constant dense<0.000000e+00> : vector<16xf32>
    %153 = vector.multi_reduction <add>, %152, %cst_76 [1] : vector<16x128xf32> to vector<16xf32>
    %154 = vector.shape_cast %153 : vector<16xf32> to vector<16x1xf32>
    %cst_77 = arith.constant dense<0.000000e+00> : vector<1xf32>
    %155 = vector.multi_reduction <add>, %154, %cst_77 [0] : vector<16x1xf32> to vector<1xf32>
    %156 = vector.shape_cast %155 : vector<1xf32> to vector<1x1xf32>
    %cst_78 = arith.constant 4.8828125E-4 : f32
    %157 = vector.broadcast %cst_78 : f32 to vector<1x1xf32>
    %158 = arith.mulf %156, %157 : vector<1x1xf32>
    %cst_79 = arith.constant 9.99999974E-6 : f32
    %159 = vector.broadcast %cst_79 : f32 to vector<1x1xf32>
    %160 = arith.addf %158, %159 : vector<1x1xf32>
    %161 = math.rsqrt %160 : vector<1x1xf32>
    %162 = vector.broadcast %161 : vector<1x1xf32> to vector<1x128xf32>
    %163 = arith.mulf %162, %127 : vector<1x128xf32>
    %164 = vector.broadcast %163 : vector<1x128xf32> to vector<16x128xf32>
    %165 = arith.mulf %151, %164 : vector<16x128xf32>
    %166 = vector.broadcast %128 : vector<1x128xf32> to vector<16x128xf32>
    %167 = arith.addf %165, %166 : vector<16x128xf32>
    %168 = arith.addf %80, %167 : vector<16x128xf32>
    %cst_80 = arith.constant 0.000000e+00 : f32
    %169 = vector.broadcast %cst_80 : f32 to vector<16x128xf32>
    %170 = arith.maximumf %168, %169 : vector<16x128xf32>
    %c0_81 = arith.constant 0 : index
    %c0_82 = arith.constant 0 : index
    %c0_83 = arith.constant 0 : index
    %171 = vector.load %arg7[%c0_81, %c0_82, %c0_83] : memref<1x16x128xf32, #tpu.memory_space<vmem>>, vector<1x16x128xf32>
    %172 = vector.shape_cast %171 : vector<1x16x128xf32> to vector<16x128xf32>
    %173 = vector.shape_cast %170 : vector<16x128xf32> to vector<1x16x128xf32>
    tpu.vector_store %arg7[%c0_81, %c0_82, %c0_83], %173 {strides = array<i32>} : memref<1x16x128xf32, #tpu.memory_space<vmem>>, vector<1x16x128xf32>,
    return
  }
  func.func @transform_0(%arg0: i32) -> (i32, i32, i32) {
    %c0_i32 = arith.constant 0 : i32
    %c0_i32_0 = arith.constant 0 : i32
    %c0_i32_1 = arith.constant 0 : i32
    return %arg0, %c0_i32, %c0_i32_0 : i32, i32, i32
  }
  func.func @transform_1(%arg0: i32) -> (i32, i32, i32) {
    %c0_i32 = arith.constant 0 : i32
    %c0_i32_0 = arith.constant 0 : i32
    %c0_i32_1 = arith.constant 0 : i32
    %c0_i32_2 = arith.constant 0 : i32
    return %c0_i32, %c0_i32_0, %c0_i32_1 : i32, i32, i32
  }
  func.func @transform_2(%arg0: i32) -> (i32, i32, i32) {
    %c0_i32 = arith.constant 0 : i32
    %c0_i32_0 = arith.constant 0 : i32
    %c0_i32_1 = arith.constant 0 : i32
    %c0_i32_2 = arith.constant 0 : i32
    return %c0_i32, %c0_i32_0, %c0_i32_1 : i32, i32, i32
  }
  func.func @transform_3(%arg0: i32) -> (i32, i32, i32) {
    %c0_i32 = arith.constant 0 : i32
    %c0_i32_0 = arith.constant 0 : i32
    %c0_i32_1 = arith.constant 0 : i32
    %c0_i32_2 = arith.constant 0 : i32
    return %c0_i32, %c0_i32_0, %c0_i32_1 : i32, i32, i32
  }
  func.func @transform_4(%arg0: i32) -> (i32, i32, i32) {
    %c0_i32 = arith.constant 0 : i32
    %c0_i32_0 = arith.constant 0 : i32
    %c0_i32_1 = arith.constant 0 : i32
    %c0_i32_2 = arith.constant 0 : i32
    return %c0_i32, %c0_i32_0, %c0_i32_1 : i32, i32, i32
  }
  func.func @transform_5(%arg0: i32) -> (i32, i32) {
    %c0_i32 = arith.constant 0 : i32
    %c0_i32_0 = arith.constant 0 : i32
    %c0_i32_1 = arith.constant 0 : i32
    return %c0_i32, %c0_i32_0 : i32, i32
  }
  func.func @transform_6(%arg0: i32) -> (i32, i32, i32) {
    %c0_i32 = arith.constant 0 : i32
    %c0_i32_0 = arith.constant 0 : i32
    %c0_i32_1 = arith.constant 0 : i32
    return %arg0, %c0_i32, %c0_i32_0 : i32, i32, i32
  }
}

</mosaic_0001>

<bundles_post_ra>
// kernel: tpu_custom_call.1
= control target key start
LH: loop header
LB: loop body
LE: loop exit
PB: predicated region body
PF: predicated region fallthrough
CT: control target
= control target key end

     0   :  { %11 = vsyncpa [#allocation3], 0  ;;  %s3150_s0 = inlined_call_operand.hbm [shape: bf16[2,16,128], index: 0, kind: input, shape index: {}]   ;;  %s3151_s1 = inlined_call_operand.hbm [shape: bf16[1,128,128], index: 1, kind: input, shape index: {}]   ;;  %s3152_s2 = inlined_call_operand.hbm [shape: bf16[1,128,128], index: 2, kind: input, shape index: {}]   ;;  %s3153_s3 = inlined_call_operand.hbm [shape: bf16[3,128,128], index: 3, kind: input, shape index: {}]   ;;  %s3154_s4 = inlined_call_operand.hbm [shape: bf16[3,128,128], index: 4, kind: input, shape index: {}]   ;;  %s3155_s5 = inlined_call_operand.hbm [shape: f32[12,128], index: 5, kind: input, shape index: {}]   ;;  %s3156_s6 = inlined_call_operand.hbm [shape: f32[2,16,128], index: 6, kind: output, shape index: {}]  }
   0x1   :  { %13 = vsyncpa [#allocation3 + $0x1], 0 }
   0x2   :  { %14 = vsyncpa [#allocation6], 0 }
   0x3   :  { %15 = vsyncpa [#allocation9], 0 }
   0x4   :  { %16 = vsyncpa [#allocation12], 0 }
   0x5   :  { %17 = vsyncpa [#allocation4], 0 }
   0x6   :  { %19 = vsyncpa [#allocation4 + $0x1], 0  ;;  %s2736_s21 = smov 0   ;;  %s2738_s22 = smov 0  }
   0x7   :  { %s2740_s23 = smov 0   ;;  %s2742_s24 = smov 0  }
   0x8 LB: > { %s2686_s25 = smov [#allocation5]   ;;  %s2757_s27 = sadd.s32 4294967295, %s2684_s24   ;;  %s2684_s24 = sphi %s2742_s24, %s3186_s24   ;;  %s2680_s23 = sphi %s2740_s23, %s3185_s23   ;;  %s2676_s22 = sphi %s2738_s22, %s3184_s22   ;;  %s2672_s21 = sphi %s2736_s21, %s3183_s21  }
   0x9   : > { %s199_s26 = sshll.u32 %s2686_s25, 4  ;;  %p1886_p0 = scmp.ge.s32.totalorder %s2684_s24, 1  ;;  %s200_s26 = int_to_ptr.vmem [resolvable:$true] %s199_s26 }
   0xa   : > { %p3157_p1 = scmp.eq.s32.totalorder %s2757_s27, 0  ;;  %p187_p2 = scmp.lt.s32.totalorder %s2684_s24, 3 }
   0xb   : > { %s2687_s29 = smov [#allocation8]   ;;  %s2688_s8 = smov [#allocation7]  }
   0xc   : > { %p2762_p3 = pnand %p1886_p0, %p187_p2  ;;  %s225_s30 = sshll.u32 %s2687_s29, 4  ;;  %s2775_s30 = int_to_ptr.vmem [resolvable:$true] %s225_s30 }
   0xd   : > { %s212_s9 = sshll.u32 %s2688_s8, 4  ;;  %s2461_s11 = scalar_lea.vmem %s200_s26, 1024  ;;  %s2777_s9 = int_to_ptr.vmem [resolvable:$true] %s212_s9 }
   0xe   : > { %s3163_s28 = scalar_select %p2762_p3, 1, 0 }
   0xf   : > { %p2296_p5 = pneg %p2762_p3  ;;  %p2462_p8 = scmp.ne.s32.totalorder %s200_s26, %s2461_s11 }
  0x10   : > { %p2469_p11 = scmp.lt.s32.totalorder %s200_s26, %s200_s26  ;;  %p2470_p12 = scmp.lt.s32.totalorder %s2461_s11, %s2461_s11 }
  0x11   : > { %p2771_p6 = pnand %p2296_p5, %p3157_p1 }
  0x12   : > { %p2471_p13 = por %p2470_p12, %p2469_p11 }
  0x13   : > { %p2781_p7 = pneg %p2771_p6 }
  0x15   : > { %p2464_p9 = pnand %p2462_p8, %p2781_p7 }
  0x17   : > { %p2465_p10 = pneg %p2464_p9 }
  0x19   : > { %p2472_p0 = pnand %p2471_p13, %p2465_p10 }
  0x1b   : > { %2475 = shalt.err (!%p2472_p0)
}
  0x1c   : > { %s3158_s12 = smov 64   ;;  %s3159_s13 = smov 4  }
  0x1d   : > { %2299 = dma.hbm_to_vmem [thread:$0]  (!%p2771_p6), %s3151_s1, 1024, %s200_s26, [#allocation6], %s3158_s12, %s3158_s12, %s3159_s13  }
  0x1e   : > { %s2487_s16 = scalar_lea.vmem %s2775_s30, 3072  ;;  %p2495_p9 = scmp.lt.s32.totalorder %s2775_s30, %s2775_s30 }
  0x1f   : > { %p2488_p2 = scmp.ne.s32.totalorder %s2775_s30, %s2487_s16  ;;  %p2496_p10 = scmp.lt.s32.totalorder %s2487_s16, %s2487_s16 }
  0x21   : > { %p2490_p5 = pnand %p2488_p2, %p2781_p7  ;;  %p2497_p11 = por %p2496_p10, %p2495_p9 }
  0x23   : > { %p2491_p8 = pneg %p2490_p5 }
  0x25   : > { %p2498_p12 = pnand %p2497_p11, %p2491_p8 }
  0x27   : > { %2501 = shalt.err (!%p2498_p12)
}
  0x28   : > { %2305 = dma.hbm_to_vmem [thread:$0]  (!%p2771_p6), %s3153_s3, 3072, %s2775_s30, [#allocation9], %s3158_s12, %s3158_s12, %s3159_s13  }
  0x29   : > { %s2513_s19 = scalar_lea.vmem %s2777_s9, 1024  ;;  %p2521_p5 = scmp.lt.s32.totalorder %s2777_s9, %s2777_s9 }
  0x2a   : > { %p2514_p13 = scmp.ne.s32.totalorder %s2777_s9, %s2513_s19  ;;  %p2522_p8 = scmp.lt.s32.totalorder %s2513_s19, %s2513_s19 }
  0x2c   : > { %p2516_p0 = pnand %p2514_p13, %p2781_p7  ;;  %p2523_p9 = por %p2522_p8, %p2521_p5 }
  0x2e   : > { %p2517_p2 = pneg %p2516_p0 }
  0x30   : > { %p2524_p10 = pnand %p2523_p9, %p2517_p2 }
  0x32   : > { %2527 = shalt.err (!%p2524_p10)
}
  0x33   : > { %2302 = dma.hbm_to_vmem [thread:$0]  (!%p2771_p6), %s3152_s2, 1024, %s2777_s9, [#allocation6], %s3158_s12, %s3158_s12, %s3159_s13  }
  0x34   : > { %s2691_s26 = smov [#allocation10]   ;;  %s2692_s30 = smov [#allocation11]  }
  0x35   : > { %s238_s29 = sshll.u32 %s2691_s26, 4  ;;  %s251_s8 = sshll.u32 %s2692_s30, 4  ;;  %s239_s29 = int_to_ptr.vmem [resolvable:$true] %s238_s29  ;;  %s252_s8 = int_to_ptr.vmem [resolvable:$true] %s251_s8 }
  0x36   : > { %s2539_s11 = scalar_lea.vmem %s239_s29, 3072  ;;  %p2547_p0 = scmp.lt.s32.totalorder %s239_s29, %s239_s29 }
  0x37   : > { %p2540_p11 = scmp.ne.s32.totalorder %s239_s29, %s2539_s11  ;;  %p2548_p2 = scmp.lt.s32.totalorder %s2539_s11, %s2539_s11 }
  0x39   : > { %p2542_p12 = pnand %p2540_p11, %p2781_p7  ;;  %p2549_p5 = por %p2548_p2, %p2547_p0 }
  0x3b   : > { %p2543_p13 = pneg %p2542_p12 }
  0x3d   : > { %p2550_p8 = pnand %p2549_p5, %p2543_p13 }
  0x3f   : > { %2553 = shalt.err (!%p2550_p8)
}
  0x40   : > { %2308 = dma.hbm_to_vmem [thread:$0]  (!%p2771_p6), %s3154_s4, 3072, %s239_s29, [#allocation9], %s3158_s12, %s3158_s12, %s3159_s13  }
  0x41   : > { %s2565_s15 = scalar_lea.vmem %s252_s8, 256  ;;  %p2573_p12 = scmp.lt.s32.totalorder %s252_s8, %s252_s8 }
  0x42   : > { %p2566_p9 = scmp.ne.s32.totalorder %s252_s8, %s2565_s15  ;;  %p2574_p0 = scmp.lt.s32.totalorder %s2565_s15, %s2565_s15 }
  0x44   : > { %p2568_p10 = pnand %p2566_p9, %p2781_p7  ;;  %p2575_p13 = por %p2574_p0, %p2573_p12 }
  0x46   : > { %p2569_p11 = pneg %p2568_p10 }
  0x48   : > { %p2576_p2 = pnand %p2575_p13, %p2569_p11 }
  0x4a   : > { %2579 = shalt.err (!%p2576_p2)
}
  0x4b   : > { %s2693_s16 = smov 128   ;;  %s2694_s10 = smov 8  }
  0x4c   : > { %2311 = dma.hbm_to_vmem [thread:$0]  (!%p2771_p6), %s3155_s5, 256, %s252_s8, [#allocation12], %s2693_s16, %s2693_s16, %s2694_s10  }
  0x4d   : > { %s1885_s19 = sadd.s32 4294967294, %s2684_s24   ;;  %s2844_s20 = sadd.s32 1, %s2684_s24  }
  0x4e   : > { %s32_s25 = sadd.s32 1, %s2680_s23  ;;  %s29_s26 = ssub.s32 %s2684_s24, %s2844_s20 }
  0x4f   : > { %p39_p7 = scmp.ne.s32.totalorder %s2680_s23, %s2676_s22  ;;  %p30_p5 = scmp.eq.s32.totalorder %s29_s26, 0 }
  0x50   : > { %p40_p8 = scmp.eq.s32.totalorder %s2684_s24, 0  ;;  %p45_p9 = scmp.ne.s32.totalorder %s2676_s22, %s2672_s21 }
  0x51   : > { %p174_p10 = scmp.eq.s32.totalorder %s2757_s27, 1  ;;  %p180_p0 = scmp.eq.s32.totalorder %s1885_s19, 1 }
  0x52   : > { %s2856_s29 = scalar_select %p30_p5, %s2680_s23, %s32_s25  }
  0x53   : > { %p41_p11 = por %p40_p8, %p39_p7  ;;  %p2860_p12 = por %p3157_p1, %p45_p9 }
  0x54   : > { %p2864_p6 = por %p174_p10, %p39_p7  ;;  %p2325_p13 = scmp.lt.s32.totalorder %s2684_s24, 2 }
  0x55   : > { %s3166_s7 = scalar_select %p2860_p12, 1, 0 }
  0x56   : > { %s3167_s30 = scalar_select %p2864_p6, 1, 0 }
  0x57   : > { %s265_s8 = sand.u32 1, %s2680_s23   ;;  %p2870_p2 = por %p180_p0, %p45_p9 }
  0x58   : > { %s1893_s9 = sshll.u32 %s265_s8, 3  ;;  %s1994_s14 = sshll.u32 %s2684_s24, 7 }
  0x59   : > { %s3168_s11 = scalar_select %p2870_p2, 1, 0 }
  0x5a   : > { %s2878_s10 = scalar_lea.hbm %s3150_s0, %s1994_s14  ;;  %s269_s17 = scalar_lea.vmem [#allocation2], %s1893_s9 }
  0x5b   : > { %s276_s18 = sshll.u32 %s269_s17, 4  ;;  %p2880_p7 = pnand %p2325_p13, %p41_p11  ;;  %s2884_s18 = int_to_ptr.vmem [resolvable:$true] %s276_s18 }
  0x5c   : > { %s2886_s25 = scalar_lea.sflag [#allocation3], %s265_s8  ;;  %s2580_s26 = scalar_lea.hbm %s2878_s10, 128 }
  0x5d   : > { %p2581_p5 = scmp.ne.s32.totalorder %s2878_s10, %s2580_s26  ;;  %p2582_p8 = pneg %p2880_p7 }
  0x5e   : > { %s2585_s9 = scalar_lea.hbm %s3150_s0, 256  ;;  %p2586_p11 = scmp.lt.s32.totalorder %s2878_s10, %s3150_s0 }
  0x5f   : > { %p2583_p9 = pnand %p2582_p8, %p2581_p5  ;;  %p2587_p0 = scmp.lt.s32.totalorder %s2585_s9, %s2580_s26 }
  0x61   : > { %p2584_p10 = pneg %p2583_p9  ;;  %p2588_p13 = por %p2587_p0, %p2586_p11 }
  0x63   : > { %p2589_p4 = pnand %p2588_p13, %p2584_p10 }
  0x65   : > { %2592 = shalt.err (!%p2589_p4)
}
  0x66   : > { %s2593_s8 = scalar_lea.vmem %s2884_s18, 128  ;;  %s2695_s12 = smov [#allocation2]  }
  0x67   : > { %p2594_p1 = scmp.ne.s32.totalorder %s2884_s18, %s2593_s8  ;;  %s2598_s13 = sshll.u32 %s2695_s12, 4  ;;  %s2599_s13 = int_to_ptr.vmem [resolvable:$false] %s2598_s13 }
  0x68   : > { %s2600_s14 = scalar_lea.vmem %s2599_s13, 256  ;;  %p2601_p9 = scmp.lt.s32.totalorder %s2884_s18, %s2599_s13 }
  0x69   : > { %p2596_p2 = pnand %p2594_p1, %p2582_p8  ;;  %p2602_p6 = scmp.lt.s32.totalorder %s2600_s14, %s2593_s8 }
  0x6b   : > { %p2597_p5 = pneg %p2596_p2  ;;  %p2603_p12 = por %p2602_p6, %p2601_p9 }
  0x6d   : > { %p2604_p3 = pnand %p2603_p12, %p2597_p5 }
  0x6f   : > { %2607 = shalt.err (!%p2604_p3)
}
  0x70   : > { %s3170_s26 = smov 4   ;;  %s3171_s15 = smov 64  }
  0x71   : > { %2315 = dma.hbm_to_vmem [thread:$0]  (!%p2880_p7), %s2878_s10, 128, %s2884_s18, %s2886_s25, %s3171_s15, %s3171_s15, %s3170_s26  }
  0x72   : > { %p3172_p1 = scmp.ne.s32.totalorder %s3163_s28, 0 }
  0x73   : > { %s2913_s12 = sand.u32 (!%p3172_p1), 1, %s2676_s22   ;;  %p3173_p3 = scmp.ne.s32.totalorder (!%p3172_p1), %s3166_s7, 0 }
  0x74   : > { %288 = sbr.rel (%p3172_p1) target bundleno = 2299 (0x8fb), region = 44  ;;  %s1897_s13 = sshll.u32 (!%p3172_p1), %s2913_s12, 3 }
  0x75   : > { %s291_s9 = scalar_lea.sflag (!%p3172_p1), [#allocation3], %s2913_s12  ;;  %s2917_s16 = scalar_lea.vmem (!%p3172_p1), [#allocation2], %s1897_s13 }
  0x79   : > { %2651 = dma.done.wait (%p3173_p3), %s291_s9, 128  }
  0x7a   : > { %2653 = vsyncadd (%p3173_p3), %s291_s9, 4294967168  ;;  %p3174_p4 = scmp.eq.s32.totalorder %s2757_s27, 0 }
  0x7c   : > { %2655 = dma.done.wait (%p3174_p4), [#allocation6], 2048   ;;  %p3175_p12 = pmov %p3174_p4 }
  0x7d   : > { %p3176_p6 = pmov %p3174_p4 }
  0x7e   : > { %2657 = vsyncadd (%p3175_p12), [#allocation6], 4294965248 }
  0x7f   : > { %2659 = dma.done.wait (%p3176_p6), [#allocation9], 6144   ;;  %p3177_p2 = pmov %p3174_p4 }
  0x81   : > { %2661 = vsyncadd (%p3177_p2), [#allocation9], 4294961152  ;;  %p3178_p7 = pmov %p3177_p2 }
  0x82   : > { %p3179_p8 = pmov %p3177_p2 }
  0x83   : > { %2663 = dma.done.wait (%p3178_p7), [#allocation12], 256  }
  0x84   : > { %2665 = vsyncadd (%p3179_p8), [#allocation12], 4294967040  ;;  %v2696_v0 = vmov 0.0   ;;  %vm2697_vm0 = vmmov 0   ;;  %v2377_v1 = vld [vmem:[#allocation5 + $0x38] sm:$0xff]   ;;  %v2378_v2 = vld [vmem:[#allocation5 + $0x30] sm:$0xff]   ;;  %v344_v47 = vlaneseq }
  0x85   : > { %2084 = vmatprep.subr.bf16.mxu0 %v2696_v0  ;;  %2100 = vmatprep.mubr.msk.bf16.mxu0 %vm2697_vm0, %v2696_v0  ;;  %v2379_v3 = vld [vmem:[#allocation5 + $0x28] sm:$0xff]   ;;  %v2380_v4 = vld [vmem:[#allocation5 + $0x20] sm:$0xff]   ;;  %v2381_v5 = vld [vmem:[#allocation5 + $0x18] sm:$0xff]   ;;  %vm900_vm2 = vcmask 130048   ;;  %s1903_s28 = sshll.u32 %s2913_s12, 4  ;;  %s1995_s7 = sshll.u32 %s2757_s27, 8 }
  0x86   : > { %2104 = vmatprep.subr.bf16.mxu1 %v2696_v0  ;;  %2120 = vmatprep.mubr.msk.bf16.mxu1 %vm2697_vm0, %v2696_v0  ;;  %v2382_v6 = vld [vmem:[#allocation5 + $0x10] sm:$0xff]   ;;  %v2383_v7 = vld [vmem:[#allocation5 + $0x8] sm:$0xff]   ;;  %v2384_v8 = vld [vmem:[#allocation5] sm:$0xff]   ;;  %v2979_v49 = vshrl.u32 %v344_v47, 7  ;;  %v2984_v53 = vand.u32 127, %v344_v47  ;;  %s342_s10 = scalar_lea.vmem [#allocation13], %s1903_s28  ;;  %s3105_s17 = scalar_lea.hbm %s3156_s6, %s1995_s7 }
  0x87   : > { %2085 = vmatpush3.bf16.msra.mxu0 %v2377_v1  ;;  %v2949_v9 = vld [vmem:[%s2917_s16] sm:$0xff]   ;;  %v1908_v10 = vld [vmem:[#allocation11] ss:$0 sm:$0xff]  ;;  %v2388_v19 = vld [vmem:[#allocation8 + $0x28] sm:$0xff]   ;;  %s1764_s18 = sshll.u32 %s342_s10, 4  ;;  %s1751_s8 = scalar_lea.sflag [#allocation4], %s2913_s12  ;;  %s3107_s18 = int_to_ptr.vmem [resolvable:$true] %s1764_s18 }
  0x88   : > { %2086 = vmatprep.subr.bf16.mxu0 %v2696_v0  ;;  %v2386_v17 = vld [vmem:[#allocation8 + $0x38] sm:$0xff]   ;;  %v2387_v18 = vld [vmem:[#allocation8 + $0x30] sm:$0xff]   ;;  %v2389_v20 = vld [vmem:[#allocation8 + $0x20] sm:$0xff]   ;;  %v2982_v52 = vadd.s32 8, %v2979_v49  ;;  %v349_v54 = vadd.s32 4294967295, %v2979_v49  ;;  %s2608_s27 = scalar_lea.vmem %s3107_s18, 256 }
  0x89   : > { %v2390_v21 = vld [vmem:[#allocation8 + $0x18] sm:$0xff]   ;;  %v2391_v22 = vld [vmem:[#allocation8 + $0x10] sm:$0xff]   ;;  %v2392_v23 = vld [vmem:[#allocation8 + $0x8] sm:$0xff]   ;;  %p2609_p10 = scmp.ne.s32.totalorder %s3107_s18, %s2608_s27  ;;  %p3180_p11 = scmp.ne.s32.totalorder %s3167_s30, 0 }
  0x8a   : > { %v2393_v24 = vld [vmem:[#allocation8] sm:$0xff]   ;;  %v2394_v39 = vld [vmem:[#allocation7 + $0x38] sm:$0xff]   ;;  %v2395_v40 = vld [vmem:[#allocation7 + $0x30] sm:$0xff]   ;;  %v350_v55 = vadd.s32 4294967295, %v2982_v52  ;;  %vm351_vm1 = vcmp.eq.s32.totalorder %v2984_v53, %v349_v54  ;;  %s2698_s14 = smov [#allocation13]  }
  0x8b   : > { %2087 = vmatpush3.bf16.msra.mxu0 %v2378_v2  ;;  %2105 = vmatpush3.bf16.msra.mxu1 %v2394_v39  ;;  %v2396_v41 = vld [vmem:[#allocation7 + $0x28] sm:$0xff]   ;;  %v2397_v42 = vld [vmem:[#allocation7 + $0x20] sm:$0xff]   ;;  %v2398_v43 = vld [vmem:[#allocation7 + $0x18] sm:$0xff]   ;;  %v2990_v57 = vsel %vm351_vm1, 1.0, %v2696_v0  ;;  %p2610_p0 = pnand %p2609_p10, %p3180_p11  ;;  %s2612_s26 = sshll.u32 %s2698_s14, 4  ;;  %s2613_s26 = int_to_ptr.vmem [resolvable:$false] %s2612_s26 }
  0x8c   : > { %2088 = vmatprep.subr.bf16.mxu0 %v2696_v0  ;;  %2106 = vmatprep.subr.bf16.mxu1 %v2696_v0  ;;  %v2399_v44 = vld [vmem:[#allocation7 + $0x10] sm:$0xff]   ;;  %v2400_v45 = vld [vmem:[#allocation7 + $0x8] sm:$0xff]   ;;  %v2401_v46 = vld [vmem:[#allocation7] sm:$0xff]   ;;  %vm352_vm3 = vcmp.eq.s32.totalorder %v2984_v53, %v350_v55  ;;  %s2614_s15 = scalar_lea.vmem %s2613_s26, 512  ;;  %p2615_p5 = scmp.lt.s32.totalorder %s3107_s18, %s2613_s26 }
  0x8d   : > { %v2996_v58 = vsel %vm352_vm3, 1.0, %v2696_v0  ;;  %p2611_p13 = pneg %p2610_p0  ;;  %p2616_p9 = scmp.lt.s32.totalorder %s2614_s15, %s2608_s27 }
  0x8f   : > { %2089 = vmatpush3.bf16.msra.mxu0 %v2379_v3  ;;  %2107 = vmatpush3.bf16.msra.mxu1 %v2395_v40  ;;  %p2617_p1 = por %p2616_p9, %p2615_p5 }
  0x90   : > { %2090 = vmatprep.subr.bf16.mxu0 %v2696_v0  ;;  %2108 = vmatprep.subr.bf16.mxu1 %v2696_v0 }
  0x91   : > { %p2618_p3 = pnand %p2617_p1, %p2611_p13 }
  0x93   : > { %2091 = vmatpush3.bf16.msra.mxu0 %v2380_v4  ;;  %2109 = vmatpush3.bf16.msra.mxu1 %v2396_v41 }
  0x94   : > { %2092 = vmatprep.subr.bf16.mxu0 %v2696_v0  ;;  %2110 = vmatprep.subr.bf16.mxu1 %v2696_v0 }
  0x97   : > { %2093 = vmatpush3.bf16.msra.mxu0 %v2381_v5  ;;  %2111 = vmatpush3.bf16.msra.mxu1 %v2397_v42 }
  0x98   : > { %2094 = vmatprep.subr.bf16.mxu0 %v2696_v0  ;;  %2112 = vmatprep.subr.bf16.mxu1 %v2696_v0 }
  0x9b   : > { %2095 = vmatpush3.bf16.msra.mxu0 %v2382_v6  ;;  %2113 = vmatpush3.bf16.msra.mxu1 %v2398_v43 }
  0x9c   : > { %2096 = vmatprep.subr.bf16.mxu0 %v2696_v0  ;;  %2114 = vmatprep.subr.bf16.mxu1 %v2696_v0 }
  0x9f   : > { %2097 = vmatpush3.bf16.msra.mxu0 %v2383_v7  ;;  %2115 = vmatpush3.bf16.msra.mxu1 %v2399_v44  ;;  %v368_v7 = vld [vmem:[#allocation11 + $0x1] sm:$0x1] }
  0xa0   : > { %2098 = vmatprep.subr.bf16.mxu0 %v2696_v0  ;;  %2116 = vmatprep.subr.bf16.mxu1 %v2696_v0 }
  0xa3   : > { %2099 = vmatpush3.bf16.msra.mxu0 %v2384_v8  ;;  %2117 = vmatpush3.bf16.msra.mxu1 %v2400_v45  ;;  %v3001_v8 = vsub.s32 0, %v2979_v49 }
  0xa4   : > { %2124 = vmatprep.subr.bf16.mxu0 %v2696_v0  ;;  %2118 = vmatprep.subr.bf16.mxu1 %v2696_v0 }
  0xa6   : > { %2101 = vmatmul.mubr.bf16.vlgmr.msra.gmra.mxu0 %v2949_v9 }
  0xa7   : > { %2140 = vmatprep.mubr.msk.bf16.mxu0 %vm2697_vm0, %v2696_v0  ;;  %2125 = vmatpush3.bf16.msra.mxu0 %v2386_v17 }
  0xa8   : > { %2126 = vmatprep.subr.bf16.mxu0 %v2696_v0  ;;  %2119 = vmatpush3.bf16.msra.mxu1 %v2401_v46  ;;  %v358_v46 = vadd.s32 1, %v2982_v52 }
  0xa9   : > { %2144 = vmatprep.subr.bf16.mxu1 %v2696_v0 }
  0xaa   : > { %vm360_vm5 = vcmp.eq.s32.totalorder %v2984_v53, %v358_v46 }
  0xab   : > { %2127 = vmatpush3.bf16.msra.mxu0 %v2387_v18 }
  0xac   : > { %2128 = vmatprep.subr.bf16.mxu0 %v2696_v0 }
  0xaf   : > { %2129 = vmatpush3.bf16.msra.mxu0 %v2388_v19 }
  0xb0   : > { %2130 = vmatprep.subr.bf16.mxu0 %v2696_v0 }
  0xb3   : > { %2131 = vmatpush3.bf16.msra.mxu0 %v2389_v20  ;;  %v2402_v20 = vld [vmem:[#allocation8 + $0x78] sm:$0xff]  }
  0xb4   : > { %2132 = vmatprep.subr.bf16.mxu0 %v2696_v0 }
  0xb7   : > { %2133 = vmatpush3.bf16.msra.mxu0 %v2390_v21 }
  0xb8   : > { %2134 = vmatprep.subr.bf16.mxu0 %v2696_v0 }
  0xbb   : > { %2135 = vmatpush3.bf16.msra.mxu0 %v2391_v22  ;;  %v2403_v22 = vld [vmem:[#allocation8 + $0x70] sm:$0xff]  }
  0xbc   : > { %2136 = vmatprep.subr.bf16.mxu0 %v2696_v0 }
  0xbf   : > { %2137 = vmatpush3.bf16.msra.mxu0 %v2392_v23  ;;  %v2404_v23 = vld [vmem:[#allocation8 + $0x68] sm:$0xff]  }
  0xc0   : > { %2138 = vmatprep.subr.bf16.mxu0 %v2696_v0 }
  0xc3   : > { %2139 = vmatpush3.bf16.msra.mxu0 %v2393_v24  ;;  %v2405_v24 = vld [vmem:[#allocation8 + $0x60] sm:$0xff]  }
  0xc6   : > { %2141 = vmatmul.mubr.bf16.vlgmr.msra.gmra.mxu0 %v2949_v9 }
  0xc7   : > { %2168 = vmatprep.mubr.msk.f32.mxu0 %vm900_vm2, %v2990_v57 }
 0x166   : > { %v478_v11 = vpop.f32.mrf.mxu0 }
 0x167   : > { %v479_v12 = vadd.f32 %v1908_v10, %v478_v11 }
 0x168   : > { %v2102_v13 = vpop.f32.mrf.mxu0 }
 0x169   : > { %485 = vadd.xlane.f32.xlu0 %v479_v12  ;;  %v1918_v13 = vld [vmem:[#allocation11 + $0x2] ss:$0 sm:$0xff] }
 0x16a   : > { %v481_v14 = vpop.f32.mrf.mxu0 }
 0x16b   : > { %v482_v15 = vadd.f32 %v1908_v10, %v481_v14 }
 0x16c   : > { %v2103_v16 = vpop.f32.mrf.mxu0 }
 0x16d   : > { %487 = vadd.xlane.f32.xlu0 %v482_v15 }
 0x186   : > { %v787_v48 = vpop.f32.mrf.mxu0 }
 0x188   : > { %v2142_v50 = vpop.f32.mrf.mxu0 }
 0x18a   : > { %v790_v51 = vpop.f32.mrf.mxu0 }
 0x18b   : > { %2164 = vmatprep.subr.mxu0 %v790_v51 }
 0x18c   : > { %2165 = vmatpush3.msra.mxu0 %v790_v51  ;;  %v2143_v56 = vpop.f32.mrf.mxu0  ;;  %v3040_v51 = vsel %vm360_vm5, 1.0, %v2696_v0 }
 0x18d   : > { %2166 = vmatprep.subr.mxu0 %v787_v48  ;;  %v1957_v56 = vld [vmem:[#allocation11 + $0x6] ss:$0 sm:$0xff] }
 0x18e   : > { %2167 = vmatpush3.msra.mxu0 %v787_v48 }
 0x18f   : > { %2169 = vmatmul.mubr.msk.f32.vlgmr.msra.gmra.mxu0 %vm900_vm2, %v2996_v58 }
 0x1f2   : > { %v486_v25 = vpop.xlane.xlu0 %485 }
 0x1f6   : > { %v488_v26 = vpop.xlane.xlu0 %487 }
 0x1f7   : > { %v489_v27 = vadd.f32 %v488_v26, %v486_v25  ;;  %v2406_v25 = vld [vmem:[#allocation8 + $0x58] sm:$0xff]   ;;  %v2407_v26 = vld [vmem:[#allocation8 + $0x50] sm:$0xff]  }
 0x1f9   : > { %v490_v28 = vrot.slane %v489_v27, 4 }
 0x1fb   : > { %v491_v29 = vadd.f32 %v490_v28, %v489_v27  ;;  %v2408_v27 = vld [vmem:[#allocation8 + $0x48] sm:$0xff]   ;;  %v2409_v28 = vld [vmem:[#allocation8 + $0x40] sm:$0xff]  }
 0x1fd   : > { %v492_v30 = vrot.slane %v491_v29, 2 }
 0x1ff   : > { %v493_v31 = vadd.f32 %v492_v30, %v491_v29  ;;  %v2410_v29 = vld [vmem:[#allocation8 + $0xb8] sm:$0xff]   ;;  %v2411_v30 = vld [vmem:[#allocation8 + $0xb0] sm:$0xff]  }
 0x201   : > { %v494_v32 = vrot.slane %v493_v31, 1 }
 0x203   : > { %v495_v33 = vadd.f32 %v494_v32, %v493_v31  ;;  %v2412_v31 = vld [vmem:[#allocation8 + $0xa8] sm:$0xff]   ;;  %v2413_v32 = vld [vmem:[#allocation8 + $0xa0] sm:$0xff]  }
 0x205   : > { %v496_v34 = vmul.f32 0.00048828125, %v495_v33  ;;  %v2414_v33 = vld [vmem:[#allocation8 + $0x98] sm:$0xff]  }
 0x207   : > { %v2963_v35 = vsub.f32 %v479_v12, %v496_v34  ;;  %v2967_v37 = vsub.f32 %v482_v15, %v496_v34  ;;  %v2415_v34 = vld [vmem:[#allocation8 + $0x90] sm:$0xff]  }
 0x209   : > { %v499_v36 = vmul.f32 %v2963_v35, %v2963_v35  ;;  %v500_v38 = vmul.f32 %v2967_v37, %v2967_v37 }
 0x20b   : > { %501 = vadd.xlane.f32.xlu1 %v499_v36  ;;  %v2417_v36 = vld [vmem:[#allocation8 + $0x80] sm:$0xff]  }
 0x20f   : > { %503 = vadd.xlane.f32.xlu1 %v500_v38 }
 0x24f   : > { %v2170_v52 = vpop.f32.mrf.mxu0 }
 0x251   : > { %v973_v54 = vpop.f32.mrf.mxu0 }
 0x294   : > { %v502_v59 = vpop.xlane.xlu1 %501 }
 0x298   : > { %v504_v60 = vpop.xlane.xlu1 %503 }
 0x299   : > { %v505_v61 = vadd.f32 %v504_v60, %v502_v59 }
 0x29b   : > { %v506_v62 = vrot.slane %v505_v61, 4 }
 0x29d   : > { %v507_v63 = vadd.f32 %v506_v62, %v505_v61 }
 0x29f   : > { %v508_v1 = vrot.slane %v507_v63, 2 }
 0x2a1   : > { %v509_v2 = vadd.f32 %v508_v1, %v507_v63 }
 0x2a3   : > { %v510_v3 = vrot.slane %v509_v2, 1 }
 0x2a5   : > { %v511_v4 = vadd.f32 %v510_v3, %v509_v2 }
 0x2a7   : > { %v512_v5 = vmul.f32 0.00048828125, %v511_v4 }
 0x2a9   : > { %v513_v6 = vadd.f32 1e-05, %v512_v5 }
 0x2ab   : > { %2442 = vrsqrt.f32 %v513_v6 }
 0x2b8   : > { %v2443_v10 = vpop.eup %2442 }
 0x2b9   : > { %v515_v11 = vmul.f32 %v2443_v10, %v368_v7 }
 0x2bb   : > { %v519_v12 = vrot.slane %v515_v11, %v3001_v8 }
 0x2bd   : > { %v520_v14 = vmul.f32 %v519_v12, %v2963_v35  ;;  %v521_v15 = vmul.f32 %v519_v12, %v2967_v37  ;;  %v2416_v35 = vld [vmem:[#allocation8 + $0x88] sm:$0xff]   ;;  %v357_v37 = vadd.s32 1, %v2979_v49 }
 0x2bf   : > { %v526_v16 = vadd.f32 %v1918_v13, %v520_v14  ;;  %v527_v17 = vadd.f32 %v1918_v13, %v521_v15  ;;  %vm359_vm4 = vcmp.eq.s32.totalorder %v2984_v53, %v357_v37 }
 0x2c0   : > { %v3033_v38 = vsel %vm359_vm4, 1.0, %v2696_v0 }
 0x2c1   : > { %v528_v18 = vmax.f32 %v526_v16, 0.0  ;;  %v529_v19 = vmax.f32 %v527_v17, 0.0  ;;  %2195 = vmatprep.mubr.msk.f32.mxu0 %vm900_vm2, %v3033_v38 }
 0x2c3   : > { %v530_v21 = vpack.c.bf16 %v529_v19, %v528_v18  ;;  %v1919_v18 = vld [vmem:[#allocation11 + $0x3] ss:$0 sm:$0xff] }
 0x2c5   : > { %2121 = vmatmul.mubr.bf16.vlgmr.msra.gmra.mxu1 %v530_v21  ;;  %v2418_v21 = vld [vmem:[#allocation10 + $0x38] sm:$0xff]  }
 0x2c6   : > { %2145 = vmatpush3.bf16.msra.mxu1 %v2402_v20  ;;  %2160 = vmatprep.mubr.msk.bf16.mxu1 %vm2697_vm0, %v2696_v0 }
 0x2c7   : > { %2146 = vmatprep.subr.bf16.mxu1 %v2696_v0 }
 0x2ca   : > { %2147 = vmatpush3.bf16.msra.mxu1 %v2403_v22  ;;  %v2419_v22 = vld [vmem:[#allocation10 + $0x78] sm:$0xff]  }
 0x2cb   : > { %2148 = vmatprep.subr.bf16.mxu1 %v2696_v0 }
 0x2ce   : > { %2149 = vmatpush3.bf16.msra.mxu1 %v2404_v23  ;;  %v2420_v23 = vld [vmem:[#allocation10 + $0x30] sm:$0xff]  }
 0x2cf   : > { %2150 = vmatprep.subr.bf16.mxu1 %v2696_v0 }
 0x2d2   : > { %2151 = vmatpush3.bf16.msra.mxu1 %v2405_v24  ;;  %v2421_v24 = vld [vmem:[#allocation10 + $0x70] sm:$0xff]  }
 0x2d3   : > { %2152 = vmatprep.subr.bf16.mxu1 %v2696_v0 }
 0x2d6   : > { %2153 = vmatpush3.bf16.msra.mxu1 %v2406_v25  ;;  %v2422_v25 = vld [vmem:[#allocation10 + $0x28] sm:$0xff]  }
 0x2d7   : > { %2154 = vmatprep.subr.bf16.mxu1 %v2696_v0 }
 0x2da   : > { %2155 = vmatpush3.bf16.msra.mxu1 %v2407_v26  ;;  %v2423_v26 = vld [vmem:[#allocation10 + $0x68] sm:$0xff]  }
 0x2db   : > { %2156 = vmatprep.subr.bf16.mxu1 %v2696_v0 }
 0x2de   : > { %2157 = vmatpush3.bf16.msra.mxu1 %v2408_v27  ;;  %v2424_v27 = vld [vmem:[#allocation10 + $0x20] sm:$0xff]  }
 0x2df   : > { %2158 = vmatprep.subr.bf16.mxu1 %v2696_v0 }
 0x2e2   : > { %2159 = vmatpush3.bf16.msra.mxu1 %v2409_v28  ;;  %v2425_v28 = vld [vmem:[#allocation10 + $0x60] sm:$0xff]  }
 0x2e3   : > { %2171 = vmatprep.subr.bf16.mxu1 %v2696_v0 }
 0x2e5   : > { %2161 = vmatmul.mubr.bf16.vlgmr.msra.gmra.mxu1 %v2949_v9 }
 0x2e6   : > { %2172 = vmatpush3.bf16.msra.mxu1 %v2410_v29  ;;  %2187 = vmatprep.mubr.msk.bf16.mxu1 %vm2697_vm0, %v2696_v0  ;;  %v2426_v29 = vld [vmem:[#allocation10 + $0x18] sm:$0xff]  }
 0x2e7   : > { %2173 = vmatprep.subr.bf16.mxu1 %v2696_v0 }
 0x2ea   : > { %2174 = vmatpush3.bf16.msra.mxu1 %v2411_v30  ;;  %v2427_v30 = vld [vmem:[#allocation10 + $0x58] sm:$0xff]  }
 0x2eb   : > { %2175 = vmatprep.subr.bf16.mxu1 %v2696_v0 }
 0x2ee   : > { %2176 = vmatpush3.bf16.msra.mxu1 %v2412_v31  ;;  %v2428_v31 = vld [vmem:[#allocation10 + $0x10] sm:$0xff]  }
 0x2ef   : > { %2177 = vmatprep.subr.bf16.mxu1 %v2696_v0 }
 0x2f2   : > { %2178 = vmatpush3.bf16.msra.mxu1 %v2413_v32  ;;  %v2429_v32 = vld [vmem:[#allocation10 + $0x50] sm:$0xff]  }
 0x2f3   : > { %2179 = vmatprep.subr.bf16.mxu1 %v2696_v0 }
 0x2f6   : > { %2180 = vmatpush3.bf16.msra.mxu1 %v2414_v33  ;;  %v2430_v33 = vld [vmem:[#allocation10 + $0x8] sm:$0xff]  }
 0x2f7   : > { %2181 = vmatprep.subr.bf16.mxu1 %v2696_v0 }
 0x2fa   : > { %2182 = vmatpush3.bf16.msra.mxu1 %v2415_v34  ;;  %v2431_v34 = vld [vmem:[#allocation10 + $0x48] sm:$0xff]  }
 0x2fb   : > { %2183 = vmatprep.subr.bf16.mxu1 %v2696_v0 }
 0x2fe   : > { %2184 = vmatpush3.bf16.msra.mxu1 %v2416_v35  ;;  %v2432_v35 = vld [vmem:[#allocation10] sm:$0xff]  }
 0x2ff   : > { %2185 = vmatprep.subr.bf16.mxu1 %v2696_v0 }
 0x302   : > { %2186 = vmatpush3.bf16.msra.mxu1 %v2417_v36  ;;  %v2433_v36 = vld [vmem:[#allocation10 + $0x40] sm:$0xff]  }
 0x303   : > { %2218 = vmatprep.subr.bf16.mxu1 %v2696_v0 }
 0x305   : > { %2188 = vmatmul.mubr.bf16.vlgmr.msra.gmra.mxu1 %v2949_v9 }
 0x306   : > { %2234 = vmatprep.mubr.msk.bf16.mxu1 %vm2697_vm0, %v2696_v0  ;;  %2219 = vmatpush3.bf16.msra.mxu1 %v2419_v22 }
 0x307   : > { %2220 = vmatprep.subr.bf16.mxu1 %v2696_v0 }
 0x30a   : > { %2221 = vmatpush3.bf16.msra.mxu1 %v2421_v24 }
 0x30b   : > { %2222 = vmatprep.subr.bf16.mxu1 %v2696_v0 }
 0x30e   : > { %2223 = vmatpush3.bf16.msra.mxu1 %v2423_v26 }
 0x30f   : > { %2224 = vmatprep.subr.bf16.mxu1 %v2696_v0 }
 0x312   : > { %2225 = vmatpush3.bf16.msra.mxu1 %v2425_v28 }
 0x313   : > { %2226 = vmatprep.subr.bf16.mxu1 %v2696_v0 }
 0x316   : > { %2227 = vmatpush3.bf16.msra.mxu1 %v2427_v30 }
 0x317   : > { %2228 = vmatprep.subr.bf16.mxu1 %v2696_v0 }
 0x31a   : > { %2229 = vmatpush3.bf16.msra.mxu1 %v2429_v32 }
 0x31b   : > { %2230 = vmatprep.subr.bf16.mxu1 %v2696_v0 }
 0x31e   : > { %2231 = vmatpush3.bf16.msra.mxu1 %v2431_v34  ;;  %v1987_v34 = vld [vmem:[#allocation11 + $0x9] ss:$0 sm:$0xff] }
 0x31f   : > { %2232 = vmatprep.subr.bf16.mxu1 %v2696_v0 }
 0x322   : > { %2233 = vmatpush3.bf16.msra.mxu1 %v2433_v36 }
 0x385   : > { %v636_v39 = vpop.f32.mrf.mxu1 }
 0x386   : > { %v3055_v19 = vadd.f32 %v1919_v18, %v636_v39 }
 0x387   : > { %v2122_v40 = vpop.f32.mrf.mxu1 }
 0x389   : > { %v639_v41 = vpop.f32.mrf.mxu1 }
 0x38a   : > { %v3057_v20 = vadd.f32 %v1919_v18, %v639_v41 }
 0x38b   : > { %v2123_v42 = vpop.f32.mrf.mxu1 }
 0x3a5   : > { %v893_v43 = vpop.f32.mrf.mxu1 }
 0x3a6   : > { %v974_v59 = vadd.f32 %v973_v54, %v893_v43  ;;  %v1958_v54 = vld [vmem:[#allocation11 + $0x8] ss:$0 sm:$0xff] }
 0x3a7   : > { %v2162_v44 = vpop.f32.mrf.mxu1 }
 0x3a9   : > { %v896_v9 = vpop.f32.mrf.mxu1 }
 0x3aa   : > { %v979_v53 = vadd.f32 %v2170_v52, %v896_v9 }
 0x3ab   : > { %v2163_v45 = vpop.f32.mrf.mxu1 }
 0x3c5   : > { %v1081_v47 = vpop.f32.mrf.mxu1 }
 0x3c7   : > { %v2189_v48 = vpop.f32.mrf.mxu1 }
 0x3c8   : > { %v687_v48 = vld [vmem:[#allocation11 + $0x7] sm:$0x1] }
 0x3c9   : > { %v1084_v49 = vpop.f32.mrf.mxu1 }
 0x3ca   : > { %2191 = vmatprep.subr.mxu0 %v1084_v49 }
 0x3cb   : > { %v2190_v50 = vpop.f32.mrf.mxu1  ;;  %2192 = vmatpush3.msra.mxu0 %v1084_v49 }
 0x3cc   : > { %2193 = vmatprep.subr.mxu0 %v1081_v47 }
 0x3cd   : > { %2194 = vmatpush3.msra.mxu0 %v1081_v47 }
 0x3ce   : > { %2196 = vmatmul.mubr.msk.f32.vlgmr.msra.gmra.mxu0 %vm900_vm2, %v3040_v51  ;;  %2198 = vmatprep.subr.bf16.mxu0 %v2696_v0 }
 0x3cf   : > { %2214 = vmatprep.mubr.msk.bf16.mxu0 %vm2697_vm0, %v2696_v0  ;;  %2199 = vmatpush3.bf16.msra.mxu0 %v2418_v21 }
 0x3d0   : > { %2200 = vmatprep.subr.bf16.mxu0 %v2696_v0 }
 0x3d3   : > { %2201 = vmatpush3.bf16.msra.mxu0 %v2420_v23 }
 0x3d4   : > { %2202 = vmatprep.subr.bf16.mxu0 %v2696_v0 }
 0x3d7   : > { %2203 = vmatpush3.bf16.msra.mxu0 %v2422_v25 }
 0x3d8   : > { %2204 = vmatprep.subr.bf16.mxu0 %v2696_v0 }
 0x3db   : > { %2205 = vmatpush3.bf16.msra.mxu0 %v2424_v27 }
 0x3dc   : > { %2206 = vmatprep.subr.bf16.mxu0 %v2696_v0 }
 0x3df   : > { %2207 = vmatpush3.bf16.msra.mxu0 %v2426_v29 }
 0x3e0   : > { %2208 = vmatprep.subr.bf16.mxu0 %v2696_v0 }
 0x3e3   : > { %2209 = vmatpush3.bf16.msra.mxu0 %v2428_v31 }
 0x3e4   : > { %2210 = vmatprep.subr.bf16.mxu0 %v2696_v0 }
 0x3e7   : > { %2211 = vmatpush3.bf16.msra.mxu0 %v2430_v33 }
 0x3e8   : > { %2212 = vmatprep.subr.bf16.mxu0 %v2696_v0 }
 0x3eb   : > { %2213 = vmatpush3.bf16.msra.mxu0 %v2432_v35 }
 0x3ec   : > { %2245 = vmatprep.subr.bf16.mxu0 %v2696_v0 }
 0x48e   : > { %v2197_v55 = vpop.f32.mrf.mxu0 }
 0x48f   : > { %v1170_v60 = vadd.f32 %v2197_v55, %v979_v53 }
 0x490   : > { %v1160_v61 = vpop.f32.mrf.mxu0 }
 0x491   : > { %v1169_v62 = vadd.f32 %v1160_v61, %v974_v59  ;;  %v1176_v63 = vadd.f32 %v1957_v56, %v1170_v60 }
 0x493   : > { %1179 = vadd.xlane.f32.xlu1 %v1176_v63  ;;  %v1175_v1 = vadd.f32 %v1957_v56, %v1169_v62  ;;  %v2434_v62 = vld [vmem:[#allocation10 + $0xb8] sm:$0xff]  }
 0x495   : > { %1177 = vadd.xlane.f32.xlu0 %v1175_v1 }
 0x51c   : > { %v1180_v2 = vpop.xlane.xlu1 %1179 }
 0x51e   : > { %v1178_v3 = vpop.xlane.xlu0 %1177 }
 0x51f   : > { %v1181_v4 = vadd.f32 %v1180_v2, %v1178_v3  ;;  %v2436_v2 = vld [vmem:[#allocation10 + $0xa8] sm:$0xff]   ;;  %v2437_v3 = vld [vmem:[#allocation10 + $0xa0] sm:$0xff]  }
 0x521   : > { %v1182_v5 = vrot.slane %v1181_v4, 4 }
 0x523   : > { %v1183_v6 = vadd.f32 %v1182_v5, %v1181_v4  ;;  %v2438_v4 = vld [vmem:[#allocation10 + $0x98] sm:$0xff]   ;;  %v2439_v5 = vld [vmem:[#allocation10 + $0x90] sm:$0xff]  }
 0x525   : > { %v1184_v7 = vrot.slane %v1183_v6, 2 }
 0x527   : > { %v1185_v10 = vadd.f32 %v1184_v7, %v1183_v6  ;;  %v2440_v6 = vld [vmem:[#allocation10 + $0x88] sm:$0xff]  }
 0x529   : > { %v1186_v11 = vrot.slane %v1185_v10, 1 }
 0x52b   : > { %v1187_v12 = vadd.f32 %v1186_v11, %v1185_v10 }
 0x52d   : > { %v1188_v13 = vmul.f32 0.00048828125, %v1187_v12 }
 0x52f   : > { %v3047_v14 = vsub.f32 %v1176_v63, %v1188_v13  ;;  %v3049_v15 = vsub.f32 %v1175_v1, %v1188_v13  ;;  %v2435_v1 = vld [vmem:[#allocation10 + $0xb0] sm:$0xff]  }
 0x531   : > { %v1192_v16 = vmul.f32 %v3047_v14, %v3047_v14  ;;  %v1191_v17 = vmul.f32 %v3049_v15, %v3049_v15 }
 0x533   : > { %1195 = vadd.xlane.f32.xlu1 %v1192_v16  ;;  %1193 = vadd.xlane.f32.xlu0 %v1191_v17 }
 0x537   : > { %645 = vadd.xlane.f32.xlu1 %v3057_v20  ;;  %643 = vadd.xlane.f32.xlu0 %v3055_v19 }
 0x5bc   : > { %v1196_v37 = vpop.xlane.xlu1 %1195  ;;  %v1194_v39 = vpop.xlane.xlu0 %1193 }
 0x5bd   : > { %v1197_v40 = vadd.f32 %v1196_v37, %v1194_v39 }
 0x5bf   : > { %v1198_v41 = vrot.slane %v1197_v40, 4 }
 0x5c0   : > { %v646_v22 = vpop.xlane.xlu1 %645  ;;  %v644_v23 = vpop.xlane.xlu0 %643 }
 0x5c1   : > { %v1199_v42 = vadd.f32 %v1198_v41, %v1197_v40  ;;  %v647_v24 = vadd.f32 %v646_v22, %v644_v23  ;;  %v1224_v23 = vld [vmem:[#allocation11 + $0xa] sm:$0x1] }
 0x5c3   : > { %v1200_v43 = vrot.slane %v1199_v42, 2  ;;  %v648_v25 = vrot.slane %v647_v24, 4 }
 0x5c5   : > { %v1201_v44 = vadd.f32 %v1200_v43, %v1199_v42  ;;  %v649_v26 = vadd.f32 %v648_v25, %v647_v24 }
 0x5c7   : > { %v1202_v9 = vrot.slane %v1201_v44, 1 }
 0x5c9   : > { %v1203_v45 = vadd.f32 %v1202_v9, %v1201_v44 }
 0x5cb   : > { %v1204_v46 = vmul.f32 0.00048828125, %v1203_v45 }
 0x5cd   : > { %v1205_v47 = vadd.f32 1e-05, %v1204_v46 }
 0x5cf   : > { %2444 = vrsqrt.f32 %v1205_v47 }
 0x5dc   : > { %v2445_v49 = vpop.eup %2444 }
 0x5dd   : > { %v1207_v50 = vmul.f32 %v2445_v49, %v687_v48 }
 0x5df   : > { %v1211_v52 = vrot.slane %v1207_v50, %v3001_v8 }
 0x5e1   : > { %v1212_v53 = vmul.f32 %v1211_v52, %v3049_v15  ;;  %v1213_v55 = vmul.f32 %v1211_v52, %v3047_v14 }
 0x5e3   : > { %v1218_v56 = vadd.f32 %v1958_v54, %v1212_v53  ;;  %v1219_v59 = vadd.f32 %v1958_v54, %v1213_v55 }
 0x5e5   : > { %v1220_v60 = vmax.f32 %v1218_v56, 0.0  ;;  %v1221_v61 = vmax.f32 %v1219_v59, 0.0 }
 0x5e7   : > { %v1222_v63 = vpack.c.bf16 %v1221_v61, %v1220_v60 }
 0x5e9   : > { %2215 = vmatmul.mubr.bf16.vlgmr.msra.gmra.mxu0 %v1222_v63  ;;  %2235 = vmatmul.mubr.bf16.vlgmr.msra.gmra.mxu1 %v1222_v63 }
 0x5ea   : > { %2246 = vmatpush3.bf16.msra.mxu0 %v2434_v62  ;;  %2261 = vmatprep.mubr.msk.bf16.mxu0 %vm2697_vm0, %v2696_v0 }
 0x5eb   : > { %2247 = vmatprep.subr.bf16.mxu0 %v2696_v0  ;;  %2242 = vmatprep.mubr.msk.f32.mxu1 %vm900_vm2, %v2990_v57  ;;  %v2441_v57 = vld [vmem:[#allocation10 + $0x80] sm:$0xff]  }
 0x5ee   : > { %2248 = vmatpush3.bf16.msra.mxu0 %v2435_v1 }
 0x5ef   : > { %2249 = vmatprep.subr.bf16.mxu0 %v2696_v0 }
 0x5f2   : > { %2250 = vmatpush3.bf16.msra.mxu0 %v2436_v2 }
 0x5f3   : > { %2251 = vmatprep.subr.bf16.mxu0 %v2696_v0 }
 0x5f6   : > { %2252 = vmatpush3.bf16.msra.mxu0 %v2437_v3 }
 0x5f7   : > { %2253 = vmatprep.subr.bf16.mxu0 %v2696_v0 }
 0x5fa   : > { %2254 = vmatpush3.bf16.msra.mxu0 %v2438_v4 }
 0x5fb   : > { %2255 = vmatprep.subr.bf16.mxu0 %v2696_v0 }
 0x5fe   : > { %2256 = vmatpush3.bf16.msra.mxu0 %v2439_v5 }
 0x5ff   : > { %2257 = vmatprep.subr.bf16.mxu0 %v2696_v0 }
 0x602   : > { %2258 = vmatpush3.bf16.msra.mxu0 %v2440_v6 }
 0x603   : > { %2259 = vmatprep.subr.bf16.mxu0 %v2696_v0 }
 0x606   : > { %2260 = vmatpush3.bf16.msra.mxu0 %v2441_v57 }
 0x609   : > { %2262 = vmatmul.mubr.bf16.vlgmr.msra.gmra.mxu0 %v1222_v63 }
 0x6a9   : > { %v1324_v7 = vpop.f32.mrf.mxu0  ;;  %v1430_v10 = vpop.f32.mrf.mxu1 }
 0x6ab   : > { %v2216_v11 = vpop.f32.mrf.mxu0  ;;  %v2236_v12 = vpop.f32.mrf.mxu1 }
 0x6ad   : > { %v1327_v13 = vpop.f32.mrf.mxu0  ;;  %v1433_v14 = vpop.f32.mrf.mxu1 }
 0x6ae   : > { %2238 = vmatprep.subr.mxu1 %v1327_v13 }
 0x6af   : > { %v2217_v15 = vpop.f32.mrf.mxu0  ;;  %v2237_v16 = vpop.f32.mrf.mxu1  ;;  %2239 = vmatpush3.msra.mxu1 %v1327_v13 }
 0x6b0   : > { %2240 = vmatprep.subr.mxu1 %v1324_v7 }
 0x6b1   : > { %2241 = vmatpush3.msra.mxu1 %v1324_v7 }
 0x6b2   : > { %2243 = vmatmul.mubr.msk.f32.vlgmr.msra.gmra.mxu1 %vm900_vm2, %v2996_v58  ;;  %v650_v58 = vrot.slane %v649_v26, 2 }
 0x6b3   : > { %2269 = vmatprep.mubr.msk.f32.mxu1 %vm900_vm2, %v3033_v38 }
 0x6b4   : > { %v651_v27 = vadd.f32 %v650_v58, %v649_v26 }
 0x6b6   : > { %v652_v28 = vrot.slane %v651_v27, 1 }
 0x6b8   : > { %v653_v29 = vadd.f32 %v652_v28, %v651_v27 }
 0x6ba   : > { %v654_v32 = vmul.f32 0.00048828125, %v653_v29  ;;  %v1988_v29 = vld [vmem:[#allocation11 + $0xb] ss:$0 sm:$0xff] }
 0x6bc   : > { %v656_v40 = vsub.f32 %v3057_v20, %v654_v32  ;;  %v655_v42 = vsub.f32 %v3055_v19, %v654_v32 }
 0x6be   : > { %v658_v43 = vmul.f32 %v656_v40, %v656_v40  ;;  %v657_v44 = vmul.f32 %v655_v42, %v655_v42 }
 0x6c9   : > { %v1611_v0 = vpop.f32.mrf.mxu0 }
 0x6cb   : > { %v2263_v17 = vpop.f32.mrf.mxu0 }
 0x6cd   : > { %v1614_v18 = vpop.f32.mrf.mxu0 }
 0x6ce   : > { %2265 = vmatprep.subr.mxu1 %v1614_v18 }
 0x6cf   : > { %v2264_v21 = vpop.f32.mrf.mxu0  ;;  %2266 = vmatpush3.msra.mxu1 %v1614_v18 }
 0x6d0   : > { %2267 = vmatprep.subr.mxu1 %v1611_v0  ;;  %v532_v21 = vld [vmem:[#allocation11 + $0x4] sm:$0x1] }
 0x6d1   : > { %2268 = vmatpush3.msra.mxu1 %v1611_v0 }
 0x6d2   : > { %2270 = vmatmul.mubr.msk.f32.vlgmr.msra.gmra.mxu1 %vm900_vm2, %v3040_v51 }
 0x772   : > { %v2244_v38 = vpop.f32.mrf.mxu1 }
 0x773   : > { %v1509_v31 = vadd.f32 %v2244_v38, %v1433_v14  ;;  %v1928_v38 = vld [vmem:[#allocation11 + $0x5] ss:$0 sm:$0xff] }
 0x774   : > { %v1503_v30 = vpop.f32.mrf.mxu1 }
 0x775   : > { %v1504_v35 = vadd.f32 %v1503_v30, %v1430_v10 }
 0x792   : > { %v2271_v33 = vpop.f32.mrf.mxu1 }
 0x793   : > { %v1694_v36 = vadd.f32 %v2271_v33, %v1509_v31 }
 0x794   : > { %v1684_v37 = vpop.f32.mrf.mxu1 }
 0x795   : > { %v1693_v39 = vadd.f32 %v1684_v37, %v1504_v35  ;;  %v1700_v51 = vadd.f32 %v1987_v34, %v1694_v36 }
 0x797   : > { %1703 = vadd.xlane.f32.xlu1 %v1700_v51  ;;  %v1699_v41 = vadd.f32 %v1987_v34, %v1693_v39 }
 0x799   : > { %1701 = vadd.xlane.f32.xlu0 %v1699_v41 }
 0x79b   : > { %661 = vadd.xlane.f32.xlu1 %v658_v43 }
 0x79d   : > { %659 = vadd.xlane.f32.xlu0 %v657_v44 }
 0x820   : > { %v1704_v9 = vpop.xlane.xlu1 %1703 }
 0x822   : > { %v1702_v45 = vpop.xlane.xlu0 %1701 }
 0x823   : > { %v1705_v46 = vadd.f32 %v1704_v9, %v1702_v45 }
 0x824   : > { %v662_v60 = vpop.xlane.xlu1 %661 }
 0x825   : > { %v1706_v47 = vrot.slane %v1705_v46, 4 }
 0x826   : > { %v660_v19 = vpop.xlane.xlu0 %659 }
 0x827   : > { %v1707_v48 = vadd.f32 %v1706_v47, %v1705_v46  ;;  %v663_v61 = vadd.f32 %v662_v60, %v660_v19 }
 0x829   : > { %v1708_v49 = vrot.slane %v1707_v48, 2  ;;  %v664_v62 = vrot.slane %v663_v61, 4 }
 0x82b   : > { %v1709_v50 = vadd.f32 %v1708_v49, %v1707_v48  ;;  %v665_v63 = vadd.f32 %v664_v62, %v663_v61 }
 0x82d   : > { %v1710_v52 = vrot.slane %v1709_v50, 1  ;;  %v666_v1 = vrot.slane %v665_v63, 2 }
 0x82f   : > { %v1711_v54 = vadd.f32 %v1710_v52, %v1709_v50  ;;  %v667_v2 = vadd.f32 %v666_v1, %v665_v63 }
 0x831   : > { %v1712_v53 = vmul.f32 0.00048828125, %v1711_v54  ;;  %v668_v3 = vrot.slane %v667_v2, 1 }
 0x833   : > { %v1714_v20 = vsub.f32 %v1700_v51, %v1712_v53  ;;  %v1713_v55 = vsub.f32 %v1699_v41, %v1712_v53  ;;  %v669_v4 = vadd.f32 %v668_v3, %v667_v2 }
 0x835   : > { %v1716_v56 = vmul.f32 %v1714_v20, %v1714_v20  ;;  %v1715_v59 = vmul.f32 %v1713_v55, %v1713_v55  ;;  %v670_v7 = vmul.f32 0.00048828125, %v669_v4 }
 0x837   : > { %1719 = vadd.xlane.f32.xlu1 %v1716_v56  ;;  %1717 = vadd.xlane.f32.xlu0 %v1715_v59  ;;  %v671_v12 = vadd.f32 1e-05, %v670_v7 }
 0x839   : > { %2446 = vrsqrt.f32 %v671_v12 }
 0x846   : > { %v2447_v18 = vpop.eup %2446 }
 0x847   : > { %v673_v22 = vmul.f32 %v2447_v18, %v532_v21 }
 0x849   : > { %v677_v24 = vrot.slane %v673_v22, %v3001_v8 }
 0x84b   : > { %v678_v27 = vmul.f32 %v677_v24, %v655_v42  ;;  %v679_v28 = vmul.f32 %v677_v24, %v656_v40 }
 0x84d   : > { %v684_v32 = vadd.f32 %v1928_v38, %v678_v27  ;;  %v685_v33 = vadd.f32 %v1928_v38, %v679_v28 }
 0x8c0   : > { %v1720_v5 = vpop.xlane.xlu1 %1719  ;;  %v1718_v6 = vpop.xlane.xlu0 %1717 }
 0x8c1   : > { %v1721_v57 = vadd.f32 %v1720_v5, %v1718_v6 }
 0x8c3   : > { %v1722_v10 = vrot.slane %v1721_v57, 4 }
 0x8c5   : > { %v1723_v11 = vadd.f32 %v1722_v10, %v1721_v57 }
 0x8c7   : > { %v1724_v13 = vrot.slane %v1723_v11, 2 }
 0x8c9   : > { %v1725_v14 = vadd.f32 %v1724_v13, %v1723_v11 }
 0x8cb   : > { %v1726_v15 = vrot.slane %v1725_v14, 1 }
 0x8cd   : > { %v1727_v16 = vadd.f32 %v1726_v15, %v1725_v14 }
 0x8cf   : > { %v1728_v0 = vmul.f32 0.00048828125, %v1727_v16 }
 0x8d1   : > { %v1729_v17 = vadd.f32 1e-05, %v1728_v0 }
 0x8d3   : > { %2448 = vrsqrt.f32 %v1729_v17 }
 0x8e0   : > { %v2449_v25 = vpop.eup %2448 }
 0x8e1   : > { %v1731_v26 = vmul.f32 %v2449_v25, %v1224_v23 }
 0x8e3   : > { %v1735_v58 = vrot.slane %v1731_v26, %v3001_v8 }
 0x8e5   : > { %v1736_v30 = vmul.f32 %v1735_v58, %v1713_v55  ;;  %v1737_v31 = vmul.f32 %v1735_v58, %v1714_v20 }
 0x8e7   : > { %v1742_v34 = vadd.f32 %v1988_v29, %v1736_v30  ;;  %v1743_v35 = vadd.f32 %v1988_v29, %v1737_v31 }
 0x8e9   : > { %v1744_v36 = vadd.f32 %v1742_v34, %v684_v32  ;;  %v1745_v37 = vadd.f32 %v1743_v35, %v685_v33 }
 0x8eb   : > { %v1746_v8 = vmax.f32 %v1744_v36, 0.0  ;;  %v1747_v39 = vmax.f32 %v1745_v37, 0.0 }
 0x8ed   : > { %1748 = vst [vmem:[%s342_s10] sm:$0xff] %v1746_v8  ;;  %1749 = vst [vmem:[%s342_s10 + $0x8] sm:$0xff] %v1747_v39 }
 0x8ee   : > { %2621 = shalt.err (!%p2618_p3)
}
 0x8ef   : > { %s2622_s13 = scalar_lea.hbm %s3105_s17, 256  ;;  %s2626_s28 = scalar_lea.hbm %s3156_s6, 512 }
 0x8f0   : > { %p2623_p4 = scmp.ne.s32.totalorder %s3105_s17, %s2622_s13  ;;  %p2627_p2 = scmp.lt.s32.totalorder %s3105_s17, %s3156_s6 }
 0x8f1   : > { %p2628_p7 = scmp.lt.s32.totalorder %s2626_s28, %s2622_s13 }
 0x8f2   : > { %p2624_p12 = pnand %p2623_p4, %p3180_p11 }
 0x8f3   : > { %p2629_p8 = por %p2628_p7, %p2627_p2 }
 0x8f4   : > { %p2625_p6 = pneg %p2624_p12 }
 0x8f6   : > { %p2630_p10 = pnand %p2629_p8, %p2625_p6 }
 0x8f8   : > { %2633 = shalt.err (!%p2630_p10)
}
 0x8f9   : > { %s2699_s19 = smov 128   ;;  %s2700_s25 = smov 8  }
 0x8fa   : > { %2294 = dma.vmem_to_hbm [thread:$0]  (%p3180_p11), %s3107_s18, 256, %s3105_s17, %s1751_s8, %s2699_s19, %s2699_s19, %s2700_s25  }
 0x8fb PF: > { %s1779_s27 = sand.u32 1, %s2672_s21   ;;  %p3181_p0 = scmp.ne.s32.totalorder %s3168_s11, 0 }
 0x8fc   : > { %p3182_p13 = scmp.ge.s32.totalorder %s2684_s24, 2  ;;  %s1780_s14 = scalar_lea.sflag [#allocation4], %s1779_s27 }
 0x8fe   : > { %p2317_p5 = pnand %p3182_p13, %p3181_p0 }
 0x900   : > { %p2318_p9 = pneg %p2317_p5 }
 0x902   : > { %2667 = dma.done.wait (%p2318_p9), %s1780_s14, 256  }
 0x903   : > { %2669 = vsyncadd (%p2318_p9), %s1780_s14, 4294967040  ;;  %p22_p1 = scmp.ge.s32.totalorder %s2844_s20, 4   ;;  %s3183_s21 = smov %s2676_s22 }
 0x904   : > { %s3184_s22 = smov %s2680_s23  ;;  %s3185_s23 = smov %s2856_s29 }
 0x905   : > { %s3186_s24 = smov %s2844_s20  ;;  %24 = sbr.rel (!%p22_p1) target bundleno = 8 (0x8), region = 113 }
 0x90a   :  { %1785 = vsyncpa [#allocation3], 1 }
 0x90b   :  { %1787 = vsyncpa [#allocation3 + $0x1], 1 }
 0x90c   :  { %1788 = vsyncpa [#allocation6], 1 }
 0x90d   :  { %1789 = vsyncpa [#allocation9], 1 }
 0x90e   :  { %1790 = vsyncpa [#allocation12], 1 }
 0x90f   :  { %1791 = vsyncpa [#allocation4], 1 }
 0x910   :  { %1793 = vsyncpa [#allocation4 + $0x1], 1 }

// kernel: tpu_custom_call.1
= control target key start
LH: loop header
LB: loop body
LE: loop exit
PB: predicated region body
PF: predicated region fallthrough
CT: control target
= control target key end

     0   :  { %11 = vsyncpa [#allocation3], 0  ;;  %s3150_s0 = inlined_call_operand.hbm [shape: bf16[2,16,128], index: 0, kind: input, shape index: {}]   ;;  %s3151_s1 = inlined_call_operand.hbm [shape: bf16[1,128,128], index: 1, kind: input, shape index: {}]   ;;  %s3152_s2 = inlined_call_operand.hbm [shape: bf16[1,128,128], index: 2, kind: input, shape index: {}]   ;;  %s3153_s3 = inlined_call_operand.hbm [shape: bf16[3,128,128], index: 3, kind: input, shape index: {}]   ;;  %s3154_s4 = inlined_call_operand.hbm [shape: bf16[3,128,128], index: 4, kind: input, shape index: {}]   ;;  %s3155_s5 = inlined_call_operand.hbm [shape: f32[12,128], index: 5, kind: input, shape index: {}]   ;;  %s3156_s6 = inlined_call_operand.hbm [shape: f32[2,16,128], index: 6, kind: output, shape index: {}]  }
   0x1   :  { %13 = vsyncpa [#allocation3 + $0x1], 0 }
   0x2   :  { %14 = vsyncpa [#allocation6], 0 }
   0x3   :  { %15 = vsyncpa [#allocation9], 0 }
   0x4   :  { %16 = vsyncpa [#allocation12], 0 }
   0x5   :  { %17 = vsyncpa [#allocation4], 0 }
   0x6   :  { %19 = vsyncpa [#allocation4 + $0x1], 0  ;;  %s2736_s21 = smov 0   ;;  %s2738_s22 = smov 0  }
   0x7   :  { %s2740_s23 = smov 0   ;;  %s2742_s24 = smov 0  }
   0x8 LB: > { %s2686_s25 = smov [#allocation5]   ;;  %s2757_s27 = sadd.s32 4294967295, %s2684_s24   ;;  %s2684_s24 = sphi %s2742_s24, %s3186_s24   ;;  %s2680_s23 = sphi %s2740_s23, %s3185_s23   ;;  %s2676_s22 = sphi %s2738_s22, %s3184_s22   ;;  %s2672_s21 = sphi %s2736_s21, %s3183_s21  }
   0x9   : > { %s199_s26 = sshll.u32 %s2686_s25, 4  ;;  %p1886_p0 = scmp.ge.s32.totalorder %s2684_s24, 1  ;;  %s200_s26 = int_to_ptr.vmem [resolvable:$true] %s199_s26 }
   0xa   : > { %p3157_p1 = scmp.eq.s32.totalorder %s2757_s27, 0  ;;  %p187_p2 = scmp.lt.s32.totalorder %s2684_s24, 3 }
   0xb   : > { %s2687_s29 = smov [#allocation8]   ;;  %s2688_s8 = smov [#allocation7]  }
   0xc   : > { %p2762_p3 = pnand %p1886_p0, %p187_p2  ;;  %s225_s30 = sshll.u32 %s2687_s29, 4  ;;  %s2775_s30 = int_to_ptr.vmem [resolvable:$true] %s225_s30 }
   0xd   : > { %s212_s9 = sshll.u32 %s2688_s8, 4  ;;  %s2461_s11 = scalar_lea.vmem %s200_s26, 1024  ;;  %s2777_s9 = int_to_ptr.vmem [resolvable:$true] %s212_s9 }
   0xe   : > { %s3163_s28 = scalar_select %p2762_p3, 1, 0 }
   0xf   : > { %p2296_p5 = pneg %p2762_p3  ;;  %p2462_p8 = scmp.ne.s32.totalorder %s200_s26, %s2461_s11 }
  0x10   : > { %p2469_p11 = scmp.lt.s32.totalorder %s200_s26, %s200_s26  ;;  %p2470_p12 = scmp.lt.s32.totalorder %s2461_s11, %s2461_s11 }
  0x11   : > { %p2771_p6 = pnand %p2296_p5, %p3157_p1 }
  0x12   : > { %p2471_p13 = por %p2470_p12, %p2469_p11 }
  0x13   : > { %p2781_p7 = pneg %p2771_p6 }
  0x15   : > { %p2464_p9 = pnand %p2462_p8, %p2781_p7 }
  0x17   : > { %p2465_p10 = pneg %p2464_p9 }
  0x19   : > { %p2472_p0 = pnand %p2471_p13, %p2465_p10 }
  0x1b   : > { %2475 = shalt.err (!%p2472_p0)
}
  0x1c   : > { %s3158_s12 = smov 64   ;;  %s3159_s13 = smov 4  }
  0x1d   : > { %2299 = dma.hbm_to_vmem [thread:$0]  (!%p2771_p6), %s3151_s1, 1024, %s200_s26, [#allocation6], %s3158_s12, %s3158_s12, %s3159_s13  }
  0x1e   : > { %s2487_s16 = scalar_lea.vmem %s2775_s30, 3072  ;;  %p2495_p9 = scmp.lt.s32.totalorder %s2775_s30, %s2775_s30 }
  0x1f   : > { %p2488_p2 = scmp.ne.s32.totalorder %s2775_s30, %s2487_s16  ;;  %p2496_p10 = scmp.lt.s32.totalorder %s2487_s16, %s2487_s16 }
  0x21   : > { %p2490_p5 = pnand %p2488_p2, %p2781_p7  ;;  %p2497_p11 = por %p2496_p10, %p2495_p9 }
  0x23   : > { %p2491_p8 = pneg %p2490_p5 }
  0x25   : > { %p2498_p12 = pnand %p2497_p11, %p2491_p8 }
  0x27   : > { %2501 = shalt.err (!%p2498_p12)
}
  0x28   : > { %2305 = dma.hbm_to_vmem [thread:$0]  (!%p2771_p6), %s3153_s3, 3072, %s2775_s30, [#allocation9], %s3158_s12, %s3158_s12, %s3159_s13  }
  0x29   : > { %s2513_s19 = scalar_lea.vmem %s2777_s9, 1024  ;;  %p2521_p5 = scmp.lt.s32.totalorder %s2777_s9, %s2777_s9 }
  0x2a   : > { %p2514_p13 = scmp.ne.s32.totalorder %s2777_s9, %s2513_s19  ;;  %p2522_p8 = scmp.lt.s32.totalorder %s2513_s19, %s2513_s19 }
  0x2c   : > { %p2516_p0 = pnand %p2514_p13, %p2781_p7  ;;  %p2523_p9 = por %p2522_p8, %p2521_p5 }
  0x2e   : > { %p2517_p2 = pneg %p2516_p0 }
  0x30   : > { %p2524_p10 = pnand %p2523_p9, %p2517_p2 }
  0x32   : > { %2527 = shalt.err (!%p2524_p10)
}
  0x33   : > { %2302 = dma.hbm_to_vmem [thread:$0]  (!%p2771_p6), %s3152_s2, 1024, %s2777_s9, [#allocation6], %s3158_s12, %s3158_s12, %s3159_s13  }
  0x34   : > { %s2691_s26 = smov [#allocation10]   ;;  %s2692_s30 = smov [#allocation11]  }
  0x35   : > { %s238_s29 = sshll.u32 %s2691_s26, 4  ;;  %s251_s8 = sshll.u32 %s2692_s30, 4  ;;  %s239_s29 = int_to_ptr.vmem [resolvable:$true] %s238_s29  ;;  %s252_s8 = int_to_ptr.vmem [resolvable:$true] %s251_s8 }
  0x36   : > { %s2539_s11 = scalar_lea.vmem %s239_s29, 3072  ;;  %p2547_p0 = scmp.lt.s32.totalorder %s239_s29, %s239_s29 }
  0x37   : > { %p2540_p11 = scmp.ne.s32.totalorder %s239_s29, %s2539_s11  ;;  %p2548_p2 = scmp.lt.s32.totalorder %s2539_s11, %s2539_s11 }
  0x39   : > { %p2542_p12 = pnand %p2540_p11, %p2781_p7  ;;  %p2549_p5 = por %p2548_p2, %p2547_p0 }
  0x3b   : > { %p2543_p13 = pneg %p2542_p12 }
  0x3d   : > { %p2550_p8 = pnand %p2549_p5, %p2543_p13 }
  0x3f   : > { %2553 = shalt.err (!%p2550_p8)
}
  0x40   : > { %2308 = dma.hbm_to_vmem [thread:$0]  (!%p2771_p6), %s3154_s4, 3072, %s239_s29, [#allocation9], %s3158_s12, %s3158_s12, %s3159_s13  }
  0x41   : > { %s2565_s15 = scalar_lea.vmem %s252_s8, 256  ;;  %p2573_p12 = scmp.lt.s32.totalorder %s252_s8, %s252_s8 }
  0x42   : > { %p2566_p9 = scmp.ne.s32.totalorder %s252_s8, %s2565_s15  ;;  %p2574_p0 = scmp.lt.s32.totalorder %s2565_s15, %s2565_s15 }
  0x44   : > { %p2568_p10 = pnand %p2566_p9, %p2781_p7  ;;  %p2575_p13 = por %p2574_p0, %p2573_p12 }
  0x46   : > { %p2569_p11 = pneg %p2568_p10 }
  0x48   : > { %p2576_p2 = pnand %p2575_p13, %p2569_p11 }
  0x4a   : > { %2579 = shalt.err (!%p2576_p2)
}
  0x4b   : > { %s2693_s16 = smov 128   ;;  %s2694_s10 = smov 8  }
  0x4c   : > { %2311 = dma.hbm_to_vmem [thread:$0]  (!%p2771_p6), %s3155_s5, 256, %s252_s8, [#allocation12], %s2693_s16, %s2693_s16, %s2694_s10  }
  0x4d   : > { %s1885_s19 = sadd.s32 4294967294, %s2684_s24   ;;  %s2844_s20 = sadd.s32 1, %s2684_s24  }
  0x4e   : > { %s32_s25 = sadd.s32 1, %s2680_s23  ;;  %s29_s26 = ssub.s32 %s2684_s24, %s2844_s20 }
  0x4f   : > { %p39_p7 = scmp.ne.s32.totalorder %s2680_s23, %s2676_s22  ;;  %p30_p5 = scmp.eq.s32.totalorder %s29_s26, 0 }
  0x50   : > { %p40_p8 = scmp.eq.s32.totalorder %s2684_s24, 0  ;;  %p45_p9 = scmp.ne.s32.totalorder %s2676_s22, %s2672_s21 }
  0x51   : > { %p174_p10 = scmp.eq.s32.totalorder %s2757_s27, 1  ;;  %p180_p0 = scmp.eq.s32.totalorder %s1885_s19, 1 }
  0x52   : > { %s2856_s29 = scalar_select %p30_p5, %s2680_s23, %s32_s25  }
  0x53   : > { %p41_p11 = por %p40_p8, %p39_p7  ;;  %p2860_p12 = por %p3157_p1, %p45_p9 }
  0x54   : > { %p2864_p6 = por %p174_p10, %p39_p7  ;;  %p2325_p13 = scmp.lt.s32.totalorder %s2684_s24, 2 }
  0x55   : > { %s3166_s7 = scalar_select %p2860_p12, 1, 0 }
  0x56   : > { %s3167_s30 = scalar_select %p2864_p6, 1, 0 }
  0x57   : > { %s265_s8 = sand.u32 1, %s2680_s23   ;;  %p2870_p2 = por %p180_p0, %p45_p9 }
  0x58   : > { %s1893_s9 = sshll.u32 %s265_s8, 3  ;;  %s1994_s14 = sshll.u32 %s2684_s24, 7 }
  0x59   : > { %s3168_s11 = scalar_select %p2870_p2, 1, 0 }
  0x5a   : > { %s2878_s10 = scalar_lea.hbm %s3150_s0, %s1994_s14  ;;  %s269_s17 = scalar_lea.vmem [#allocation2], %s1893_s9 }
  0x5b   : > { %s276_s18 = sshll.u32 %s269_s17, 4  ;;  %p2880_p7 = pnand %p2325_p13, %p41_p11  ;;  %s2884_s18 = int_to_ptr.vmem [resolvable:$true] %s276_s18 }
  0x5c   : > { %s2886_s25 = scalar_lea.sflag [#allocation3], %s265_s8  ;;  %s2580_s26 = scalar_lea.hbm %s2878_s10, 128 }
  0x5d   : > { %p2581_p5 = scmp.ne.s32.totalorder %s2878_s10, %s2580_s26  ;;  %p2582_p8 = pneg %p2880_p7 }
  0x5e   : > { %s2585_s9 = scalar_lea.hbm %s3150_s0, 256  ;;  %p2586_p11 = scmp.lt.s32.totalorder %s2878_s10, %s3150_s0 }
  0x5f   : > { %p2583_p9 = pnand %p2582_p8, %p2581_p5  ;;  %p2587_p0 = scmp.lt.s32.totalorder %s2585_s9, %s2580_s26 }
  0x61   : > { %p2584_p10 = pneg %p2583_p9  ;;  %p2588_p13 = por %p2587_p0, %p2586_p11 }
  0x63   : > { %p2589_p4 = pnand %p2588_p13, %p2584_p10 }
  0x65   : > { %2592 = shalt.err (!%p2589_p4)
}
  0x66   : > { %s2593_s8 = scalar_lea.vmem %s2884_s18, 128  ;;  %s2695_s12 = smov [#allocation2]  }
  0x67   : > { %p2594_p1 = scmp.ne.s32.totalorder %s2884_s18, %s2593_s8  ;;  %s2598_s13 = sshll.u32 %s2695_s12, 4  ;;  %s2599_s13 = int_to_ptr.vmem [resolvable:$false] %s2598_s13 }
  0x68   : > { %s2600_s14 = scalar_lea.vmem %s2599_s13, 256  ;;  %p2601_p9 = scmp.lt.s32.totalorder %s2884_s18, %s2599_s13 }
  0x69   : > { %p2596_p2 = pnand %p2594_p1, %p2582_p8  ;;  %p2602_p6 = scmp.lt.s32.totalorder %s2600_s14, %s2593_s8 }
  0x6b   : > { %p2597_p5 = pneg %p2596_p2  ;;  %p2603_p12 = por %p2602_p6, %p2601_p9 }
  0x6d   : > { %p2604_p3 = pnand %p2603_p12, %p2597_p5 }
  0x6f   : > { %2607 = shalt.err (!%p2604_p3)
}
  0x70   : > { %s3170_s26 = smov 4   ;;  %s3171_s15 = smov 64  }
  0x71   : > { %2315 = dma.hbm_to_vmem [thread:$0]  (!%p2880_p7), %s2878_s10, 128, %s2884_s18, %s2886_s25, %s3171_s15, %s3171_s15, %s3170_s26  }
  0x72   : > { %p3172_p1 = scmp.ne.s32.totalorder %s3163_s28, 0 }
  0x73   : > { %s2913_s12 = sand.u32 (!%p3172_p1), 1, %s2676_s22   ;;  %p3173_p3 = scmp.ne.s32.totalorder (!%p3172_p1), %s3166_s7, 0 }
  0x74   : > { %288 = sbr.rel (%p3172_p1) target bundleno = 2299 (0x8fb), region = 44  ;;  %s1897_s13 = sshll.u32 (!%p3172_p1), %s2913_s12, 3 }
  0x75   : > { %s291_s9 = scalar_lea.sflag (!%p3172_p1), [#allocation3], %s2913_s12  ;;  %s2917_s16 = scalar_lea.vmem (!%p3172_p1), [#allocation2], %s1897_s13 }
  0x79   : > { %2651 = dma.done.wait (%p3173_p3), %s291_s9, 128  }
  0x7a   : > { %2653 = vsyncadd (%p3173_p3), %s291_s9, 4294967168  ;;  %p3174_p4 = scmp.eq.s32.totalorder %s2757_s27, 0 }
  0x7c   : > { %2655 = dma.done.wait (%p3174_p4), [#allocation6], 2048   ;;  %p3175_p12 = pmov %p3174_p4 }
  0x7d   : > { %p3176_p6 = pmov %p3174_p4 }
  0x7e   : > { %2657 = vsyncadd (%p3175_p12), [#allocation6], 4294965248 }
  0x7f   : > { %2659 = dma.done.wait (%p3176_p6), [#allocation9], 6144   ;;  %p3177_p2 = pmov %p3174_p4 }
  0x81   : > { %2661 = vsyncadd (%p3177_p2), [#allocation9], 4294961152  ;;  %p3178_p7 = pmov %p3177_p2 }
  0x82   : > { %p3179_p8 = pmov %p3177_p2 }
  0x83   : > { %2663 = dma.done.wait (%p3178_p7), [#allocation12], 256  }
  0x84   : > { %2665 = vsyncadd (%p3179_p8), [#allocation12], 4294967040  ;;  %v2696_v0 = vmov 0.0   ;;  %vm2697_vm0 = vmmov 0   ;;  %v2377_v1 = vld [vmem:[#allocation5 + $0x38] sm:$0xff]   ;;  %v2378_v2 = vld [vmem:[#allocation5 + $0x30] sm:$0xff]   ;;  %v344_v47 = vlaneseq }
  0x85   : > { %2084 = vmatprep.subr.bf16.mxu0 %v2696_v0  ;;  %2100 = vmatprep.mubr.msk.bf16.mxu0 %vm2697_vm0, %v2696_v0  ;;  %v2379_v3 = vld [vmem:[#allocation5 + $0x28] sm:$0xff]   ;;  %v2380_v4 = vld [vmem:[#allocation5 + $0x20] sm:$0xff]   ;;  %v2381_v5 = vld [vmem:[#allocation5 + $0x18] sm:$0xff]   ;;  %vm900_vm2 = vcmask 130048   ;;  %s1903_s28 = sshll.u32 %s2913_s12, 4  ;;  %s1995_s7 = sshll.u32 %s2757_s27, 8 }
  0x86   : > { %2104 = vmatprep.subr.bf16.mxu1 %v2696_v0  ;;  %2120 = vmatprep.mubr.msk.bf16.mxu1 %vm2697_vm0, %v2696_v0  ;;  %v2382_v6 = vld [vmem:[#allocation5 + $0x10] sm:$0xff]   ;;  %v2383_v7 = vld [vmem:[#allocation5 + $0x8] sm:$0xff]   ;;  %v2384_v8 = vld [vmem:[#allocation5] sm:$0xff]   ;;  %v2979_v49 = vshrl.u32 %v344_v47, 7  ;;  %v2984_v53 = vand.u32 127, %v344_v47  ;;  %s342_s10 = scalar_lea.vmem [#allocation13], %s1903_s28  ;;  %s3105_s17 = scalar_lea.hbm %s3156_s6, %s1995_s7 }
  0x87   : > { %2085 = vmatpush3.bf16.msra.mxu0 %v2377_v1  ;;  %v2949_v9 = vld [vmem:[%s2917_s16] sm:$0xff]   ;;  %v1908_v10 = vld [vmem:[#allocation11] ss:$0 sm:$0xff]  ;;  %v2388_v19 = vld [vmem:[#allocation8 + $0x28] sm:$0xff]   ;;  %s1764_s18 = sshll.u32 %s342_s10, 4  ;;  %s1751_s8 = scalar_lea.sflag [#allocation4], %s2913_s12  ;;  %s3107_s18 = int_to_ptr.vmem [resolvable:$true] %s1764_s18 }
  0x88   : > { %2086 = vmatprep.subr.bf16.mxu0 %v2696_v0  ;;  %v2386_v17 = vld [vmem:[#allocation8 + $0x38] sm:$0xff]   ;;  %v2387_v18 = vld [vmem:[#allocation8 + $0x30] sm:$0xff]   ;;  %v2389_v20 = vld [vmem:[#allocation8 + $0x20] sm:$0xff]   ;;  %v2982_v52 = vadd.s32 8, %v2979_v49  ;;  %v349_v54 = vadd.s32 4294967295, %v2979_v49  ;;  %s2608_s27 = scalar_lea.vmem %s3107_s18, 256 }
  0x89   : > { %v2390_v21 = vld [vmem:[#allocation8 + $0x18] sm:$0xff]   ;;  %v2391_v22 = vld [vmem:[#allocation8 + $0x10] sm:$0xff]   ;;  %v2392_v23 = vld [vmem:[#allocation8 + $0x8] sm:$0xff]   ;;  %p2609_p10 = scmp.ne.s32.totalorder %s3107_s18, %s2608_s27  ;;  %p3180_p11 = scmp.ne.s32.totalorder %s3167_s30, 0 }
  0x8a   : > { %v2393_v24 = vld [vmem:[#allocation8] sm:$0xff]   ;;  %v2394_v39 = vld [vmem:[#allocation7 + $0x38] sm:$0xff]   ;;  %v2395_v40 = vld [vmem:[#allocation7 + $0x30] sm:$0xff]   ;;  %v350_v55 = vadd.s32 4294967295, %v2982_v52  ;;  %vm351_vm1 = vcmp.eq.s32.totalorder %v2984_v53, %v349_v54  ;;  %s2698_s14 = smov [#allocation13]  }
  0x8b   : > { %2087 = vmatpush3.bf16.msra.mxu0 %v2378_v2  ;;  %2105 = vmatpush3.bf16.msra.mxu1 %v2394_v39  ;;  %v2396_v41 = vld [vmem:[#allocation7 + $0x28] sm:$0xff]   ;;  %v2397_v42 = vld [vmem:[#allocation7 + $0x20] sm:$0xff]   ;;  %v2398_v43 = vld [vmem:[#allocation7 + $0x18] sm:$0xff]   ;;  %v2990_v57 = vsel %vm351_vm1, 1.0, %v2696_v0  ;;  %p2610_p0 = pnand %p2609_p10, %p3180_p11  ;;  %s2612_s26 = sshll.u32 %s2698_s14, 4  ;;  %s2613_s26 = int_to_ptr.vmem [resolvable:$false] %s2612_s26 }
  0x8c   : > { %2088 = vmatprep.subr.bf16.mxu0 %v2696_v0  ;;  %2106 = vmatprep.subr.bf16.mxu1 %v2696_v0  ;;  %v2399_v44 = vld [vmem:[#allocation7 + $0x10] sm:$0xff]   ;;  %v2400_v45 = vld [vmem:[#allocation7 + $0x8] sm:$0xff]   ;;  %v2401_v46 = vld [vmem:[#allocation7] sm:$0xff]   ;;  %vm352_vm3 = vcmp.eq.s32.totalorder %v2984_v53, %v350_v55  ;;  %s2614_s15 = scalar_lea.vmem %s2613_s26, 512  ;;  %p2615_p5 = scmp.lt.s32.totalorder %s3107_s18, %s2613_s26 }
  0x8d   : > { %v2996_v58 = vsel %vm352_vm3, 1.0, %v2696_v0  ;;  %p2611_p13 = pneg %p2610_p0  ;;  %p2616_p9 = scmp.lt.s32.totalorder %s2614_s15, %s2608_s27 }
  0x8f   : > { %2089 = vmatpush3.bf16.msra.mxu0 %v2379_v3  ;;  %2107 = vmatpush3.bf16.msra.mxu1 %v2395_v40  ;;  %p2617_p1 = por %p2616_p9, %p2615_p5 }
  0x90   : > { %2090 = vmatprep.subr.bf16.mxu0 %v2696_v0  ;;  %2108 = vmatprep.subr.bf16.mxu1 %v2696_v0 }
  0x91   : > { %p2618_p3 = pnand %p2617_p1, %p2611_p13 }
  0x93   : > { %2091 = vmatpush3.bf16.msra.mxu0 %v2380_v4  ;;  %2109 = vmatpush3.bf16.msra.mxu1 %v2396_v41 }
  0x94   : > { %2092 = vmatprep.subr.bf16.mxu0 %v2696_v0  ;;  %2110 = vmatprep.subr.bf16.mxu1 %v2696_v0 }
  0x97   : > { %2093 = vmatpush3.bf16.msra.mxu0 %v2381_v5  ;;  %2111 = vmatpush3.bf16.msra.mxu1 %v2397_v42 }
  0x98   : > { %2094 = vmatprep.subr.bf16.mxu0 %v2696_v0  ;;  %2112 = vmatprep.subr.bf16.mxu1 %v2696_v0 }
  0x9b   : > { %2095 = vmatpush3.bf16.msra.mxu0 %v2382_v6  ;;  %2113 = vmatpush3.bf16.msra.mxu1 %v2398_v43 }
  0x9c   : > { %2096 = vmatprep.subr.bf16.mxu0 %v2696_v0  ;;  %2114 = vmatprep.subr.bf16.mxu1 %v2696_v0 }
  0x9f   : > { %2097 = vmatpush3.bf16.msra.mxu0 %v2383_v7  ;;  %2115 = vmatpush3.bf16.msra.mxu1 %v2399_v44  ;;  %v368_v7 = vld [vmem:[#allocation11 + $0x1] sm:$0x1] }
  0xa0   : > { %2098 = vmatprep.subr.bf16.mxu0 %v2696_v0  ;;  %2116 = vmatprep.subr.bf16.mxu1 %v2696_v0 }
  0xa3   : > { %2099 = vmatpush3.bf16.msra.mxu0 %v2384_v8  ;;  %2117 = vmatpush3.bf16.msra.mxu1 %v2400_v45  ;;  %v3001_v8 = vsub.s32 0, %v2979_v49 }
  0xa4   : > { %2124 = vmatprep.subr.bf16.mxu0 %v2696_v0  ;;  %2118 = vmatprep.subr.bf16.mxu1 %v2696_v0 }
  0xa6   : > { %2101 = vmatmul.mubr.bf16.vlgmr.msra.gmra.mxu0 %v2949_v9 }
  0xa7   : > { %2140 = vmatprep.mubr.msk.bf16.mxu0 %vm2697_vm0, %v2696_v0  ;;  %2125 = vmatpush3.bf16.msra.mxu0 %v2386_v17 }
  0xa8   : > { %2126 = vmatprep.subr.bf16.mxu0 %v2696_v0  ;;  %2119 = vmatpush3.bf16.msra.mxu1 %v2401_v46  ;;  %v358_v46 = vadd.s32 1, %v2982_v52 }
  0xa9   : > { %2144 = vmatprep.subr.bf16.mxu1 %v2696_v0 }
  0xaa   : > { %vm360_vm5 = vcmp.eq.s32.totalorder %v2984_v53, %v358_v46 }
  0xab   : > { %2127 = vmatpush3.bf16.msra.mxu0 %v2387_v18 }
  0xac   : > { %2128 = vmatprep.subr.bf16.mxu0 %v2696_v0 }
  0xaf   : > { %2129 = vmatpush3.bf16.msra.mxu0 %v2388_v19 }
  0xb0   : > { %2130 = vmatprep.subr.bf16.mxu0 %v2696_v0 }
  0xb3   : > { %2131 = vmatpush3.bf16.msra.mxu0 %v2389_v20  ;;  %v2402_v20 = vld [vmem:[#allocation8 + $0x78] sm:$0xff]  }
  0xb4   : > { %2132 = vmatprep.subr.bf16.mxu0 %v2696_v0 }
  0xb7   : > { %2133 = vmatpush3.bf16.msra.mxu0 %v2390_v21 }
  0xb8   : > { %2134 = vmatprep.subr.bf16.mxu0 %v2696_v0 }
  0xbb   : > { %2135 = vmatpush3.bf16.msra.mxu0 %v2391_v22  ;;  %v2403_v22 = vld [vmem:[#allocation8 + $0x70] sm:$0xff]  }
  0xbc   : > { %2136 = vmatprep.subr.bf16.mxu0 %v2696_v0 }
  0xbf   : > { %2137 = vmatpush3.bf16.msra.mxu0 %v2392_v23  ;;  %v2404_v23 = vld [vmem:[#allocation8 + $0x68] sm:$0xff]  }
  0xc0   : > { %2138 = vmatprep.subr.bf16.mxu0 %v2696_v0 }
  0xc3   : > { %2139 = vmatpush3.bf16.msra.mxu0 %v2393_v24  ;;  %v2405_v24 = vld [vmem:[#allocation8 + $0x60] sm:$0xff]  }
  0xc6   : > { %2141 = vmatmul.mubr.bf16.vlgmr.msra.gmra.mxu0 %v2949_v9 }
  0xc7   : > { %2168 = vmatprep.mubr.msk.f32.mxu0 %vm900_vm2, %v2990_v57 }
 0x166   : > { %v478_v11 = vpop.f32.mrf.mxu0 }
 0x167   : > { %v479_v12 = vadd.f32 %v1908_v10, %v478_v11 }
 0x168   : > { %v2102_v13 = vpop.f32.mrf.mxu0 }
 0x169   : > { %485 = vadd.xlane.f32.xlu0 %v479_v12  ;;  %v1918_v13 = vld [vmem:[#allocation11 + $0x2] ss:$0 sm:$0xff] }
 0x16a   : > { %v481_v14 = vpop.f32.mrf.mxu0 }
 0x16b   : > { %v482_v15 = vadd.f32 %v1908_v10, %v481_v14 }
 0x16c   : > { %v2103_v16 = vpop.f32.mrf.mxu0 }
 0x16d   : > { %487 = vadd.xlane.f32.xlu0 %v482_v15 }
 0x186   : > { %v787_v48 = vpop.f32.mrf.mxu0 }
 0x188   : > { %v2142_v50 = vpop.f32.mrf.mxu0 }
 0x18a   : > { %v790_v51 = vpop.f32.mrf.mxu0 }
 0x18b   : > { %2164 = vmatprep.subr.mxu0 %v790_v51 }
 0x18c   : > { %2165 = vmatpush3.msra.mxu0 %v790_v51  ;;  %v2143_v56 = vpop.f32.mrf.mxu0  ;;  %v3040_v51 = vsel %vm360_vm5, 1.0, %v2696_v0 }
 0x18d   : > { %2166 = vmatprep.subr.mxu0 %v787_v48  ;;  %v1957_v56 = vld [vmem:[#allocation11 + $0x6] ss:$0 sm:$0xff] }
 0x18e   : > { %2167 = vmatpush3.msra.mxu0 %v787_v48 }
 0x18f   : > { %2169 = vmatmul.mubr.msk.f32.vlgmr.msra.gmra.mxu0 %vm900_vm2, %v2996_v58 }
 0x1f2   : > { %v486_v25 = vpop.xlane.xlu0 %485 }
 0x1f6   : > { %v488_v26 = vpop.xlane.xlu0 %487 }
 0x1f7   : > { %v489_v27 = vadd.f32 %v488_v26, %v486_v25  ;;  %v2406_v25 = vld [vmem:[#allocation8 + $0x58] sm:$0xff]   ;;  %v2407_v26 = vld [vmem:[#allocation8 + $0x50] sm:$0xff]  }
 0x1f9   : > { %v490_v28 = vrot.slane %v489_v27, 4 }
 0x1fb   : > { %v491_v29 = vadd.f32 %v490_v28, %v489_v27  ;;  %v2408_v27 = vld [vmem:[#allocation8 + $0x48] sm:$0xff]   ;;  %v2409_v28 = vld [vmem:[#allocation8 + $0x40] sm:$0xff]  }
 0x1fd   : > { %v492_v30 = vrot.slane %v491_v29, 2 }
 0x1ff   : > { %v493_v31 = vadd.f32 %v492_v30, %v491_v29  ;;  %v2410_v29 = vld [vmem:[#allocation8 + $0xb8] sm:$0xff]   ;;  %v2411_v30 = vld [vmem:[#allocation8 + $0xb0] sm:$0xff]  }
 0x201   : > { %v494_v32 = vrot.slane %v493_v31, 1 }
 0x203   : > { %v495_v33 = vadd.f32 %v494_v32, %v493_v31  ;;  %v2412_v31 = vld [vmem:[#allocation8 + $0xa8] sm:$0xff]   ;;  %v2413_v32 = vld [vmem:[#allocation8 + $0xa0] sm:$0xff]  }
 0x205   : > { %v496_v34 = vmul.f32 0.00048828125, %v495_v33  ;;  %v2414_v33 = vld [vmem:[#allocation8 + $0x98] sm:$0xff]  }
 0x207   : > { %v2963_v35 = vsub.f32 %v479_v12, %v496_v34  ;;  %v2967_v37 = vsub.f32 %v482_v15, %v496_v34  ;;  %v2415_v34 = vld [vmem:[#allocation8 + $0x90] sm:$0xff]  }
 0x209   : > { %v499_v36 = vmul.f32 %v2963_v35, %v2963_v35  ;;  %v500_v38 = vmul.f32 %v2967_v37, %v2967_v37 }
 0x20b   : > { %501 = vadd.xlane.f32.xlu1 %v499_v36  ;;  %v2417_v36 = vld [vmem:[#allocation8 + $0x80] sm:$0xff]  }
 0x20f   : > { %503 = vadd.xlane.f32.xlu1 %v500_v38 }
 0x24f   : > { %v2170_v52 = vpop.f32.mrf.mxu0 }
 0x251   : > { %v973_v54 = vpop.f32.mrf.mxu0 }
 0x294   : > { %v502_v59 = vpop.xlane.xlu1 %501 }
 0x298   : > { %v504_v60 = vpop.xlane.xlu1 %503 }
 0x299   : > { %v505_v61 = vadd.f32 %v504_v60, %v502_v59 }
 0x29b   : > { %v506_v62 = vrot.slane %v505_v61, 4 }
 0x29d   : > { %v507_v63 = vadd.f32 %v506_v62, %v505_v61 }
 0x29f   : > { %v508_v1 = vrot.slane %v507_v63, 2 }
 0x2a1   : > { %v509_v2 = vadd.f32 %v508_v1, %v507_v63 }
 0x2a3   : > { %v510_v3 = vrot.slane %v509_v2, 1 }
 0x2a5   : > { %v511_v4 = vadd.f32 %v510_v3, %v509_v2 }
 0x2a7   : > { %v512_v5 = vmul.f32 0.00048828125, %v511_v4 }
 0x2a9   : > { %v513_v6 = vadd.f32 1e-05, %v512_v5 }
 0x2ab   : > { %2442 = vrsqrt.f32 %v513_v6 }
 0x2b8   : > { %v2443_v10 = vpop.eup %2442 }
 0x2b9   : > { %v515_v11 = vmul.f32 %v2443_v10, %v368_v7 }
 0x2bb   : > { %v519_v12 = vrot.slane %v515_v11, %v3001_v8 }
 0x2bd   : > { %v520_v14 = vmul.f32 %v519_v12, %v2963_v35  ;;  %v521_v15 = vmul.f32 %v519_v12, %v2967_v37  ;;  %v2416_v35 = vld [vmem:[#allocation8 + $0x88] sm:$0xff]   ;;  %v357_v37 = vadd.s32 1, %v2979_v49 }
 0x2bf   : > { %v526_v16 = vadd.f32 %v1918_v13, %v520_v14  ;;  %v527_v17 = vadd.f32 %v1918_v13, %v521_v15  ;;  %vm359_vm4 = vcmp.eq.s32.totalorder %v2984_v53, %v357_v37 }
 0x2c0   : > { %v3033_v38 = vsel %vm359_vm4, 1.0, %v2696_v0 }
 0x2c1   : > { %v528_v18 = vmax.f32 %v526_v16, 0.0  ;;  %v529_v19 = vmax.f32 %v527_v17, 0.0  ;;  %2195 = vmatprep.mubr.msk.f32.mxu0 %vm900_vm2, %v3033_v38 }
 0x2c3   : > { %v530_v21 = vpack.c.bf16 %v529_v19, %v528_v18  ;;  %v1919_v18 = vld [vmem:[#allocation11 + $0x3] ss:$0 sm:$0xff] }
 0x2c5   : > { %2121 = vmatmul.mubr.bf16.vlgmr.msra.gmra.mxu1 %v530_v21  ;;  %v2418_v21 = vld [vmem:[#allocation10 + $0x38] sm:$0xff]  }
 0x2c6   : > { %2145 = vmatpush3.bf16.msra.mxu1 %v2402_v20  ;;  %2160 = vmatprep.mubr.msk.bf16.mxu1 %vm2697_vm0, %v2696_v0 }
 0x2c7   : > { %2146 = vmatprep.subr.bf16.mxu1 %v2696_v0 }
 0x2ca   : > { %2147 = vmatpush3.bf16.msra.mxu1 %v2403_v22  ;;  %v2419_v22 = vld [vmem:[#allocation10 + $0x78] sm:$0xff]  }
 0x2cb   : > { %2148 = vmatprep.subr.bf16.mxu1 %v2696_v0 }
 0x2ce   : > { %2149 = vmatpush3.bf16.msra.mxu1 %v2404_v23  ;;  %v2420_v23 = vld [vmem:[#allocation10 + $0x30] sm:$0xff]  }
 0x2cf   : > { %2150 = vmatprep.subr.bf16.mxu1 %v2696_v0 }
 0x2d2   : > { %2151 = vmatpush3.bf16.msra.mxu1 %v2405_v24  ;;  %v2421_v24 = vld [vmem:[#allocation10 + $0x70] sm:$0xff]  }
 0x2d3   : > { %2152 = vmatprep.subr.bf16.mxu1 %v2696_v0 }
 0x2d6   : > { %2153 = vmatpush3.bf16.msra.mxu1 %v2406_v25  ;;  %v2422_v25 = vld [vmem:[#allocation10 + $0x28] sm:$0xff]  }
 0x2d7   : > { %2154 = vmatprep.subr.bf16.mxu1 %v2696_v0 }
 0x2da   : > { %2155 = vmatpush3.bf16.msra.mxu1 %v2407_v26  ;;  %v2423_v26 = vld [vmem:[#allocation10 + $0x68] sm:$0xff]  }
 0x2db   : > { %2156 = vmatprep.subr.bf16.mxu1 %v2696_v0 }
 0x2de   : > { %2157 = vmatpush3.bf16.msra.mxu1 %v2408_v27  ;;  %v2424_v27 = vld [vmem:[#allocation10 + $0x20] sm:$0xff]  }
 0x2df   : > { %2158 = vmatprep.subr.bf16.mxu1 %v2696_v0 }
 0x2e2   : > { %2159 = vmatpush3.bf16.msra.mxu1 %v2409_v28  ;;  %v2425_v28 = vld [vmem:[#allocation10 + $0x60] sm:$0xff]  }
 0x2e3   : > { %2171 = vmatprep.subr.bf16.mxu1 %v2696_v0 }
 0x2e5   : > { %2161 = vmatmul.mubr.bf16.vlgmr.msra.gmra.mxu1 %v2949_v9 }
 0x2e6   : > { %2172 = vmatpush3.bf16.msra.mxu1 %v2410_v29  ;;  %2187 = vmatprep.mubr.msk.bf16.mxu1 %vm2697_vm0, %v2696_v0  ;;  %v2426_v29 = vld [vmem:[#allocation10 + $0x18] sm:$0xff]  }
 0x2e7   : > { %2173 = vmatprep.subr.bf16.mxu1 %v2696_v0 }
 0x2ea   : > { %2174 = vmatpush3.bf16.msra.mxu1 %v2411_v30  ;;  %v2427_v30 = vld [vmem:[#allocation10 + $0x58] sm:$0xff]  }
 0x2eb   : > { %2175 = vmatprep.subr.bf16.mxu1 %v2696_v0 }
 0x2ee   : > { %2176 = vmatpush3.bf16.msra.mxu1 %v2412_v31  ;;  %v2428_v31 = vld [vmem:[#allocation10 + $0x10] sm:$0xff]  }
 0x2ef   : > { %2177 = vmatprep.subr.bf16.mxu1 %v2696_v0 }
 0x2f2   : > { %2178 = vmatpush3.bf16.msra.mxu1 %v2413_v32  ;;  %v2429_v32 = vld [vmem:[#allocation10 + $0x50] sm:$0xff]  }
 0x2f3   : > { %2179 = vmatprep.subr.bf16.mxu1 %v2696_v0 }
 0x2f6   : > { %2180 = vmatpush3.bf16.msra.mxu1 %v2414_v33  ;;  %v2430_v33 = vld [vmem:[#allocation10 + $0x8] sm:$0xff]  }
 0x2f7   : > { %2181 = vmatprep.subr.bf16.mxu1 %v2696_v0 }
 0x2fa   : > { %2182 = vmatpush3.bf16.msra.mxu1 %v2415_v34  ;;  %v2431_v34 = vld [vmem:[#allocation10 + $0x48] sm:$0xff]  }
 0x2fb   : > { %2183 = vmatprep.subr.bf16.mxu1 %v2696_v0 }
 0x2fe   : > { %2184 = vmatpush3.bf16.msra.mxu1 %v2416_v35  ;;  %v2432_v35 = vld [vmem:[#allocation10] sm:$0xff]  }
 0x2ff   : > { %2185 = vmatprep.subr.bf16.mxu1 %v2696_v0 }
 0x302   : > { %2186 = vmatpush3.bf16.msra.mxu1 %v2417_v36  ;;  %v2433_v36 = vld [vmem:[#allocation10 + $0x40] sm:$0xff]  }
 0x303   : > { %2218 = vmatprep.subr.bf16.mxu1 %v2696_v0 }
 0x305   : > { %2188 = vmatmul.mubr.bf16.vlgmr.msra.gmra.mxu1 %v2949_v9 }
 0x306   : > { %2234 = vmatprep.mubr.msk.bf16.mxu1 %vm2697_vm0, %v2696_v0  ;;  %2219 = vmatpush3.bf16.msra.mxu1 %v2419_v22 }
 0x307   : > { %2220 = vmatprep.subr.bf16.mxu1 %v2696_v0 }
 0x30a   : > { %2221 = vmatpush3.bf16.msra.mxu1 %v2421_v24 }
 0x30b   : > { %2222 = vmatprep.subr.bf16.mxu1 %v2696_v0 }
 0x30e   : > { %2223 = vmatpush3.bf16.msra.mxu1 %v2423_v26 }
 0x30f   : > { %2224 = vmatprep.subr.bf16.mxu1 %v2696_v0 }
 0x312   : > { %2225 = vmatpush3.bf16.msra.mxu1 %v2425_v28 }
 0x313   : > { %2226 = vmatprep.subr.bf16.mxu1 %v2696_v0 }
 0x316   : > { %2227 = vmatpush3.bf16.msra.mxu1 %v2427_v30 }
 0x317   : > { %2228 = vmatprep.subr.bf16.mxu1 %v2696_v0 }
 0x31a   : > { %2229 = vmatpush3.bf16.msra.mxu1 %v2429_v32 }
 0x31b   : > { %2230 = vmatprep.subr.bf16.mxu1 %v2696_v0 }
 0x31e   : > { %2231 = vmatpush3.bf16.msra.mxu1 %v2431_v34  ;;  %v1987_v34 = vld [vmem:[#allocation11 + $0x9] ss:$0 sm:$0xff] }
 0x31f   : > { %2232 = vmatprep.subr.bf16.mxu1 %v2696_v0 }
 0x322   : > { %2233 = vmatpush3.bf16.msra.mxu1 %v2433_v36 }
 0x385   : > { %v636_v39 = vpop.f32.mrf.mxu1 }
 0x386   : > { %v3055_v19 = vadd.f32 %v1919_v18, %v636_v39 }
 0x387   : > { %v2122_v40 = vpop.f32.mrf.mxu1 }
 0x389   : > { %v639_v41 = vpop.f32.mrf.mxu1 }
 0x38a   : > { %v3057_v20 = vadd.f32 %v1919_v18, %v639_v41 }
 0x38b   : > { %v2123_v42 = vpop.f32.mrf.mxu1 }
 0x3a5   : > { %v893_v43 = vpop.f32.mrf.mxu1 }
 0x3a6   : > { %v974_v59 = vadd.f32 %v973_v54, %v893_v43  ;;  %v1958_v54 = vld [vmem:[#allocation11 + $0x8] ss:$0 sm:$0xff] }
 0x3a7   : > { %v2162_v44 = vpop.f32.mrf.mxu1 }
 0x3a9   : > { %v896_v9 = vpop.f32.mrf.mxu1 }
 0x3aa   : > { %v979_v53 = vadd.f32 %v2170_v52, %v896_v9 }
 0x3ab   : > { %v2163_v45 = vpop.f32.mrf.mxu1 }
 0x3c5   : > { %v1081_v47 = vpop.f32.mrf.mxu1 }
 0x3c7   : > { %v2189_v48 = vpop.f32.mrf.mxu1 }
 0x3c8   : > { %v687_v48 = vld [vmem:[#allocation11 + $0x7] sm:$0x1] }
 0x3c9   : > { %v1084_v49 = vpop.f32.mrf.mxu1 }
 0x3ca   : > { %2191 = vmatprep.subr.mxu0 %v1084_v49 }
 0x3cb   : > { %v2190_v50 = vpop.f32.mrf.mxu1  ;;  %2192 = vmatpush3.msra.mxu0 %v1084_v49 }
 0x3cc   : > { %2193 = vmatprep.subr.mxu0 %v1081_v47 }
 0x3cd   : > { %2194 = vmatpush3.msra.mxu0 %v1081_v47 }
 0x3ce   : > { %2196 = vmatmul.mubr.msk.f32.vlgmr.msra.gmra.mxu0 %vm900_vm2, %v3040_v51  ;;  %2198 = vmatprep.subr.bf16.mxu0 %v2696_v0 }
 0x3cf   : > { %2214 = vmatprep.mubr.msk.bf16.mxu0 %vm2697_vm0, %v2696_v0  ;;  %2199 = vmatpush3.bf16.msra.mxu0 %v2418_v21 }
 0x3d0   : > { %2200 = vmatprep.subr.bf16.mxu0 %v2696_v0 }
 0x3d3   : > { %2201 = vmatpush3.bf16.msra.mxu0 %v2420_v23 }
 0x3d4   : > { %2202 = vmatprep.subr.bf16.mxu0 %v2696_v0 }
 0x3d7   : > { %2203 = vmatpush3.bf16.msra.mxu0 %v2422_v25 }
 0x3d8   : > { %2204 = vmatprep.subr.bf16.mxu0 %v2696_v0 }
 0x3db   : > { %2205 = vmatpush3.bf16.msra.mxu0 %v2424_v27 }
 0x3dc   : > { %2206 = vmatprep.subr.bf16.mxu0 %v2696_v0 }
 0x3df   : > { %2207 = vmatpush3.bf16.msra.mxu0 %v2426_v29 }
 0x3e0   : > { %2208 = vmatprep.subr.bf16.mxu0 %v2696_v0 }
 0x3e3   : > { %2209 = vmatpush3.bf16.msra.mxu0 %v2428_v31 }
 0x3e4   : > { %2210 = vmatprep.subr.bf16.mxu0 %v2696_v0 }
 0x3e7   : > { %2211 = vmatpush3.bf16.msra.mxu0 %v2430_v33 }
 0x3e8   : > { %2212 = vmatprep.subr.bf16.mxu0 %v2696_v0 }
 0x3eb   : > { %2213 = vmatpush3.bf16.msra.mxu0 %v2432_v35 }
 0x3ec   : > { %2245 = vmatprep.subr.bf16.mxu0 %v2696_v0 }
 0x48e   : > { %v2197_v55 = vpop.f32.mrf.mxu0 }
 0x48f   : > { %v1170_v60 = vadd.f32 %v2197_v55, %v979_v53 }
 0x490   : > { %v1160_v61 = vpop.f32.mrf.mxu0 }
 0x491   : > { %v1169_v62 = vadd.f32 %v1160_v61, %v974_v59  ;;  %v1176_v63 = vadd.f32 %v1957_v56, %v1170_v60 }
 0x493   : > { %1179 = vadd.xlane.f32.xlu1 %v1176_v63  ;;  %v1175_v1 = vadd.f32 %v1957_v56, %v1169_v62  ;;  %v2434_v62 = vld [vmem:[#allocation10 + $0xb8] sm:$0xff]  }
 0x495   : > { %1177 = vadd.xlane.f32.xlu0 %v1175_v1 }
 0x51c   : > { %v1180_v2 = vpop.xlane.xlu1 %1179 }
 0x51e   : > { %v1178_v3 = vpop.xlane.xlu0 %1177 }
 0x51f   : > { %v1181_v4 = vadd.f32 %v1180_v2, %v1178_v3  ;;  %v2436_v2 = vld [vmem:[#allocation10 + $0xa8] sm:$0xff]   ;;  %v2437_v3 = vld [vmem:[#allocation10 + $0xa0] sm:$0xff]  }
 0x521   : > { %v1182_v5 = vrot.slane %v1181_v4, 4 }
 0x523   : > { %v1183_v6 = vadd.f32 %v1182_v5, %v1181_v4  ;;  %v2438_v4 = vld [vmem:[#allocation10 + $0x98] sm:$0xff]   ;;  %v2439_v5 = vld [vmem:[#allocation10 + $0x90] sm:$0xff]  }
 0x525   : > { %v1184_v7 = vrot.slane %v1183_v6, 2 }
 0x527   : > { %v1185_v10 = vadd.f32 %v1184_v7, %v1183_v6  ;;  %v2440_v6 = vld [vmem:[#allocation10 + $0x88] sm:$0xff]  }
 0x529   : > { %v1186_v11 = vrot.slane %v1185_v10, 1 }
 0x52b   : > { %v1187_v12 = vadd.f32 %v1186_v11, %v1185_v10 }
 0x52d   : > { %v1188_v13 = vmul.f32 0.00048828125, %v1187_v12 }
 0x52f   : > { %v3047_v14 = vsub.f32 %v1176_v63, %v1188_v13  ;;  %v3049_v15 = vsub.f32 %v1175_v1, %v1188_v13  ;;  %v2435_v1 = vld [vmem:[#allocation10 + $0xb0] sm:$0xff]  }
 0x531   : > { %v1192_v16 = vmul.f32 %v3047_v14, %v3047_v14  ;;  %v1191_v17 = vmul.f32 %v3049_v15, %v3049_v15 }
 0x533   : > { %1195 = vadd.xlane.f32.xlu1 %v1192_v16  ;;  %1193 = vadd.xlane.f32.xlu0 %v1191_v17 }
 0x537   : > { %645 = vadd.xlane.f32.xlu1 %v3057_v20  ;;  %643 = vadd.xlane.f32.xlu0 %v3055_v19 }
 0x5bc   : > { %v1196_v37 = vpop.xlane.xlu1 %1195  ;;  %v1194_v39 = vpop.xlane.xlu0 %1193 }
 0x5bd   : > { %v1197_v40 = vadd.f32 %v1196_v37, %v1194_v39 }
 0x5bf   : > { %v1198_v41 = vrot.slane %v1197_v40, 4 }
 0x5c0   : > { %v646_v22 = vpop.xlane.xlu1 %645  ;;  %v644_v23 = vpop.xlane.xlu0 %643 }
 0x5c1   : > { %v1199_v42 = vadd.f32 %v1198_v41, %v1197_v40  ;;  %v647_v24 = vadd.f32 %v646_v22, %v644_v23  ;;  %v1224_v23 = vld [vmem:[#allocation11 + $0xa] sm:$0x1] }
 0x5c3   : > { %v1200_v43 = vrot.slane %v1199_v42, 2  ;;  %v648_v25 = vrot.slane %v647_v24, 4 }
 0x5c5   : > { %v1201_v44 = vadd.f32 %v1200_v43, %v1199_v42  ;;  %v649_v26 = vadd.f32 %v648_v25, %v647_v24 }
 0x5c7   : > { %v1202_v9 = vrot.slane %v1201_v44, 1 }
 0x5c9   : > { %v1203_v45 = vadd.f32 %v1202_v9, %v1201_v44 }
 0x5cb   : > { %v1204_v46 = vmul.f32 0.00048828125, %v1203_v45 }
 0x5cd   : > { %v1205_v47 = vadd.f32 1e-05, %v1204_v46 }
 0x5cf   : > { %2444 = vrsqrt.f32 %v1205_v47 }
 0x5dc   : > { %v2445_v49 = vpop.eup %2444 }
 0x5dd   : > { %v1207_v50 = vmul.f32 %v2445_v49, %v687_v48 }
 0x5df   : > { %v1211_v52 = vrot.slane %v1207_v50, %v3001_v8 }
 0x5e1   : > { %v1212_v53 = vmul.f32 %v1211_v52, %v3049_v15  ;;  %v1213_v55 = vmul.f32 %v1211_v52, %v3047_v14 }
 0x5e3   : > { %v1218_v56 = vadd.f32 %v1958_v54, %v1212_v53  ;;  %v1219_v59 = vadd.f32 %v1958_v54, %v1213_v55 }
 0x5e5   : > { %v1220_v60 = vmax.f32 %v1218_v56, 0.0  ;;  %v1221_v61 = vmax.f32 %v1219_v59, 0.0 }
 0x5e7   : > { %v1222_v63 = vpack.c.bf16 %v1221_v61, %v1220_v60 }
 0x5e9   : > { %2215 = vmatmul.mubr.bf16.vlgmr.msra.gmra.mxu0 %v1222_v63  ;;  %2235 = vmatmul.mubr.bf16.vlgmr.msra.gmra.mxu1 %v1222_v63 }
 0x5ea   : > { %2246 = vmatpush3.bf16.msra.mxu0 %v2434_v62  ;;  %2261 = vmatprep.mubr.msk.bf16.mxu0 %vm2697_vm0, %v2696_v0 }
 0x5eb   : > { %2247 = vmatprep.subr.bf16.mxu0 %v2696_v0  ;;  %2242 = vmatprep.mubr.msk.f32.mxu1 %vm900_vm2, %v2990_v57  ;;  %v2441_v57 = vld [vmem:[#allocation10 + $0x80] sm:$0xff]  }
 0x5ee   : > { %2248 = vmatpush3.bf16.msra.mxu0 %v2435_v1 }
 0x5ef   : > { %2249 = vmatprep.subr.bf16.mxu0 %v2696_v0 }
 0x5f2   : > { %2250 = vmatpush3.bf16.msra.mxu0 %v2436_v2 }
 0x5f3   : > { %2251 = vmatprep.subr.bf16.mxu0 %v2696_v0 }
 0x5f6   : > { %2252 = vmatpush3.bf16.msra.mxu0 %v2437_v3 }
 0x5f7   : > { %2253 = vmatprep.subr.bf16.mxu0 %v2696_v0 }
 0x5fa   : > { %2254 = vmatpush3.bf16.msra.mxu0 %v2438_v4 }
 0x5fb   : > { %2255 = vmatprep.subr.bf16.mxu0 %v2696_v0 }
 0x5fe   : > { %2256 = vmatpush3.bf16.msra.mxu0 %v2439_v5 }
 0x5ff   : > { %2257 = vmatprep.subr.bf16.mxu0 %v2696_v0 }
 0x602   : > { %2258 = vmatpush3.bf16.msra.mxu0 %v2440_v6 }
 0x603   : > { %2259 = vmatprep.subr.bf16.mxu0 %v2696_v0 }
 0x606   : > { %2260 = vmatpush3.bf16.msra.mxu0 %v2441_v57 }
 0x609   : > { %2262 = vmatmul.mubr.bf16.vlgmr.msra.gmra.mxu0 %v1222_v63 }
 0x6a9   : > { %v1324_v7 = vpop.f32.mrf.mxu0  ;;  %v1430_v10 = vpop.f32.mrf.mxu1 }
 0x6ab   : > { %v2216_v11 = vpop.f32.mrf.mxu0  ;;  %v2236_v12 = vpop.f32.mrf.mxu1 }
 0x6ad   : > { %v1327_v13 = vpop.f32.mrf.mxu0  ;;  %v1433_v14 = vpop.f32.mrf.mxu1 }
 0x6ae   : > { %2238 = vmatprep.subr.mxu1 %v1327_v13 }
 0x6af   : > { %v2217_v15 = vpop.f32.mrf.mxu0  ;;  %v2237_v16 = vpop.f32.mrf.mxu1  ;;  %2239 = vmatpush3.msra.mxu1 %v1327_v13 }
 0x6b0   : > { %2240 = vmatprep.subr.mxu1 %v1324_v7 }
 0x6b1   : > { %2241 = vmatpush3.msra.mxu1 %v1324_v7 }
 0x6b2   : > { %2243 = vmatmul.mubr.msk.f32.vlgmr.msra.gmra.mxu1 %vm900_vm2, %v2996_v58  ;;  %v650_v58 = vrot.slane %v649_v26, 2 }
 0x6b3   : > { %2269 = vmatprep.mubr.msk.f32.mxu1 %vm900_vm2, %v3033_v38 }
 0x6b4   : > { %v651_v27 = vadd.f32 %v650_v58, %v649_v26 }
 0x6b6   : > { %v652_v28 = vrot.slane %v651_v27, 1 }
 0x6b8   : > { %v653_v29 = vadd.f32 %v652_v28, %v651_v27 }
 0x6ba   : > { %v654_v32 = vmul.f32 0.00048828125, %v653_v29  ;;  %v1988_v29 = vld [vmem:[#allocation11 + $0xb] ss:$0 sm:$0xff] }
 0x6bc   : > { %v656_v40 = vsub.f32 %v3057_v20, %v654_v32  ;;  %v655_v42 = vsub.f32 %v3055_v19, %v654_v32 }
 0x6be   : > { %v658_v43 = vmul.f32 %v656_v40, %v656_v40  ;;  %v657_v44 = vmul.f32 %v655_v42, %v655_v42 }
 0x6c9   : > { %v1611_v0 = vpop.f32.mrf.mxu0 }
 0x6cb   : > { %v2263_v17 = vpop.f32.mrf.mxu0 }
 0x6cd   : > { %v1614_v18 = vpop.f32.mrf.mxu0 }
 0x6ce   : > { %2265 = vmatprep.subr.mxu1 %v1614_v18 }
 0x6cf   : > { %v2264_v21 = vpop.f32.mrf.mxu0  ;;  %2266 = vmatpush3.msra.mxu1 %v1614_v18 }
 0x6d0   : > { %2267 = vmatprep.subr.mxu1 %v1611_v0  ;;  %v532_v21 = vld [vmem:[#allocation11 + $0x4] sm:$0x1] }
 0x6d1   : > { %2268 = vmatpush3.msra.mxu1 %v1611_v0 }
 0x6d2   : > { %2270 = vmatmul.mubr.msk.f32.vlgmr.msra.gmra.mxu1 %vm900_vm2, %v3040_v51 }
 0x772   : > { %v2244_v38 = vpop.f32.mrf.mxu1 }
 0x773   : > { %v1509_v31 = vadd.f32 %v2244_v38, %v1433_v14  ;;  %v1928_v38 = vld [vmem:[#allocation11 + $0x5] ss:$0 sm:$0xff] }
 0x774   : > { %v1503_v30 = vpop.f32.mrf.mxu1 }
 0x775   : > { %v1504_v35 = vadd.f32 %v1503_v30, %v1430_v10 }
 0x792   : > { %v2271_v33 = vpop.f32.mrf.mxu1 }
 0x793   : > { %v1694_v36 = vadd.f32 %v2271_v33, %v1509_v31 }
 0x794   : > { %v1684_v37 = vpop.f32.mrf.mxu1 }
 0x795   : > { %v1693_v39 = vadd.f32 %v1684_v37, %v1504_v35  ;;  %v1700_v51 = vadd.f32 %v1987_v34, %v1694_v36 }
 0x797   : > { %1703 = vadd.xlane.f32.xlu1 %v1700_v51  ;;  %v1699_v41 = vadd.f32 %v1987_v34, %v1693_v39 }
 0x799   : > { %1701 = vadd.xlane.f32.xlu0 %v1699_v41 }
 0x79b   : > { %661 = vadd.xlane.f32.xlu1 %v658_v43 }
 0x79d   : > { %659 = vadd.xlane.f32.xlu0 %v657_v44 }
 0x820   : > { %v1704_v9 = vpop.xlane.xlu1 %1703 }
 0x822   : > { %v1702_v45 = vpop.xlane.xlu0 %1701 }
 0x823   : > { %v1705_v46 = vadd.f32 %v1704_v9, %v1702_v45 }
 0x824   : > { %v662_v60 = vpop.xlane.xlu1 %661 }
 0x825   : > { %v1706_v47 = vrot.slane %v1705_v46, 4 }
 0x826   : > { %v660_v19 = vpop.xlane.xlu0 %659 }
 0x827   : > { %v1707_v48 = vadd.f32 %v1706_v47, %v1705_v46  ;;  %v663_v61 = vadd.f32 %v662_v60, %v660_v19 }
 0x829   : > { %v1708_v49 = vrot.slane %v1707_v48, 2  ;;  %v664_v62 = vrot.slane %v663_v61, 4 }
 0x82b   : > { %v1709_v50 = vadd.f32 %v1708_v49, %v1707_v48  ;;  %v665_v63 = vadd.f32 %v664_v62, %v663_v61 }
 0x82d   : > { %v1710_v52 = vrot.slane %v1709_v50, 1  ;;  %v666_v1 = vrot.slane %v665_v63, 2 }
 0x82f   : > { %v1711_v54 = vadd.f32 %v1710_v52, %v1709_v50  ;;  %v667_v2 = vadd.f32 %v666_v1, %v665_v63 }
 0x831   : > { %v1712_v53 = vmul.f32 0.00048828125, %v1711_v54  ;;  %v668_v3 = vrot.slane %v667_v2, 1 }
 0x833   : > { %v1714_v20 = vsub.f32 %v1700_v51, %v1712_v53  ;;  %v1713_v55 = vsub.f32 %v1699_v41, %v1712_v53  ;;  %v669_v4 = vadd.f32 %v668_v3, %v667_v2 }
 0x835   : > { %v1716_v56 = vmul.f32 %v1714_v20, %v1714_v20  ;;  %v1715_v59 = vmul.f32 %v1713_v55, %v1713_v55  ;;  %v670_v7 = vmul.f32 0.00048828125, %v669_v4 }
 0x837   : > { %1719 = vadd.xlane.f32.xlu1 %v1716_v56  ;;  %1717 = vadd.xlane.f32.xlu0 %v1715_v59  ;;  %v671_v12 = vadd.f32 1e-05, %v670_v7 }
 0x839   : > { %2446 = vrsqrt.f32 %v671_v12 }
 0x846   : > { %v2447_v18 = vpop.eup %2446 }
 0x847   : > { %v673_v22 = vmul.f32 %v2447_v18, %v532_v21 }
 0x849   : > { %v677_v24 = vrot.slane %v673_v22, %v3001_v8 }
 0x84b   : > { %v678_v27 = vmul.f32 %v677_v24, %v655_v42  ;;  %v679_v28 = vmul.f32 %v677_v24, %v656_v40 }
 0x84d   : > { %v684_v32 = vadd.f32 %v1928_v38, %v678_v27  ;;  %v685_v33 = vadd.f32 %v1928_v38, %v679_v28 }
 0x8c0   : > { %v1720_v5 = vpop.xlane.xlu1 %1719  ;;  %v1718_v6 = vpop.xlane.xlu0 %1717 }
 0x8c1   : > { %v1721_v57 = vadd.f32 %v1720_v5, %v1718_v6 }
 0x8c3   : > { %v1722_v10 = vrot.slane %v1721_v57, 4 }
 0x8c5   : > { %v1723_v11 = vadd.f32 %v1722_v10, %v1721_v57 }
 0x8c7   : > { %v1724_v13 = vrot.slane %v1723_v11, 2 }
 0x8c9   : > { %v1725_v14 = vadd.f32 %v1724_v13, %v1723_v11 }
 0x8cb   : > { %v1726_v15 = vrot.slane %v1725_v14, 1 }
 0x8cd   : > { %v1727_v16 = vadd.f32 %v1726_v15, %v1725_v14 }
 0x8cf   : > { %v1728_v0 = vmul.f32 0.00048828125, %v1727_v16 }
 0x8d1   : > { %v1729_v17 = vadd.f32 1e-05, %v1728_v0 }
 0x8d3   : > { %2448 = vrsqrt.f32 %v1729_v17 }
 0x8e0   : > { %v2449_v25 = vpop.eup %2448 }
 0x8e1   : > { %v1731_v26 = vmul.f32 %v2449_v25, %v1224_v23 }
 0x8e3   : > { %v1735_v58 = vrot.slane %v1731_v26, %v3001_v8 }
 0x8e5   : > { %v1736_v30 = vmul.f32 %v1735_v58, %v1713_v55  ;;  %v1737_v31 = vmul.f32 %v1735_v58, %v1714_v20 }
 0x8e7   : > { %v1742_v34 = vadd.f32 %v1988_v29, %v1736_v30  ;;  %v1743_v35 = vadd.f32 %v1988_v29, %v1737_v31 }
 0x8e9   : > { %v1744_v36 = vadd.f32 %v1742_v34, %v684_v32  ;;  %v1745_v37 = vadd.f32 %v1743_v35, %v685_v33 }
 0x8eb   : > { %v1746_v8 = vmax.f32 %v1744_v36, 0.0  ;;  %v1747_v39 = vmax.f32 %v1745_v37, 0.0 }
 0x8ed   : > { %1748 = vst [vmem:[%s342_s10] sm:$0xff] %v1746_v8  ;;  %1749 = vst [vmem:[%s342_s10 + $0x8] sm:$0xff] %v1747_v39 }
 0x8ee   : > { %2621 = shalt.err (!%p2618_p3)
}
 0x8ef   : > { %s2622_s13 = scalar_lea.hbm %s3105_s17, 256  ;;  %s2626_s28 = scalar_lea.hbm %s3156_s6, 512 }
 0x8f0   : > { %p2623_p4 = scmp.ne.s32.totalorder %s3105_s17, %s2622_s13  ;;  %p2627_p2 = scmp.lt.s32.totalorder %s3105_s17, %s3156_s6 }
 0x8f1   : > { %p2628_p7 = scmp.lt.s32.totalorder %s2626_s28, %s2622_s13 }
 0x8f2   : > { %p2624_p12 = pnand %p2623_p4, %p3180_p11 }
 0x8f3   : > { %p2629_p8 = por %p2628_p7, %p2627_p2 }
 0x8f4   : > { %p2625_p6 = pneg %p2624_p12 }
 0x8f6   : > { %p2630_p10 = pnand %p2629_p8, %p2625_p6 }
 0x8f8   : > { %2633 = shalt.err (!%p2630_p10)
}
 0x8f9   : > { %s2699_s19 = smov 128   ;;  %s2700_s25 = smov 8  }
 0x8fa   : > { %2294 = dma.vmem_to_hbm [thread:$0]  (%p3180_p11), %s3107_s18, 256, %s3105_s17, %s1751_s8, %s2699_s19, %s2699_s19, %s2700_s25  }
 0x8fb PF: > { %s1779_s27 = sand.u32 1, %s2672_s21   ;;  %p3181_p0 = scmp.ne.s32.totalorder %s3168_s11, 0 }
 0x8fc   : > { %p3182_p13 = scmp.ge.s32.totalorder %s2684_s24, 2  ;;  %s1780_s14 = scalar_lea.sflag [#allocation4], %s1779_s27 }
 0x8fe   : > { %p2317_p5 = pnand %p3182_p13, %p3181_p0 }
 0x900   : > { %p2318_p9 = pneg %p2317_p5 }
 0x902   : > { %2667 = dma.done.wait (%p2318_p9), %s1780_s14, 256  }
 0x903   : > { %2669 = vsyncadd (%p2318_p9), %s1780_s14, 4294967040  ;;  %p22_p1 = scmp.ge.s32.totalorder %s2844_s20, 4   ;;  %s3183_s21 = smov %s2676_s22 }
 0x904   : > { %s3184_s22 = smov %s2680_s23  ;;  %s3185_s23 = smov %s2856_s29 }
 0x905   : > { %s3186_s24 = smov %s2844_s20  ;;  %24 = sbr.rel (!%p22_p1) target bundleno = 8 (0x8), region = 113 }
 0x90a   :  { %1785 = vsyncpa [#allocation3], 1 }
 0x90b   :  { %1787 = vsyncpa [#allocation3 + $0x1], 1 }
 0x90c   :  { %1788 = vsyncpa [#allocation6], 1 }
 0x90d   :  { %1789 = vsyncpa [#allocation9], 1 }
 0x90e   :  { %1790 = vsyncpa [#allocation12], 1 }
 0x90f   :  { %1791 = vsyncpa [#allocation4], 1 }
 0x910   :  { %1793 = vsyncpa [#allocation4 + $0x1], 1 }

</bundles_post_ra>
